<compile_context>
chip_gen: v7x
topology: tpu7x:2x2x1
jax: 0.10.0
libtpu: 0.0.40
codegen_flags: <defaults>
</compile_context>

<pallas_src>
import functools

import jax
import jax.numpy as jnp
from jax.experimental import pallas as pl
from jax.experimental.pallas import tpu as pltpu

EPS = 1e-5                   # nn.BatchNorm2d default eps
ROW0 = 8                     # sublane-aligned interior row offset in the scratch
LPAD = 128                   # lane-aligned interior lane offset in the scratch
MXU_DTYPE = jnp.bfloat16     # native MXU operand dtype on v5e/v6e/v7x

# mutate_conv() is not part of the provided source; map layer_type to a square
# conv kernel size (stride 1, 'same' padding, bias=True).
# TODO(synk): exact mutate_conv variants (depthwise/separable, etc.) cannot be
# reproduced from the given snippet.
KSIZE_BY_TYPE = {1: 3, 2: 5, 3: 1, 4: 3}


def _full_spec(shape):
    # whole-array block (block_shape == array shape satisfies the (8,128) rule)
    return pl.BlockSpec(shape, lambda i: (0,) * len(shape))


def _skip_connect_forward(real_input, apply_block, stage_num, structure):
    """Literal replication of CNN_final_block.forward's skip-connection logic."""
    sample_structure = [[9], [9]]
    temp = list(structure)
    for i in range(stage_num):
        sample_structure.append(temp[:i + 1])
        temp = temp[i + 1:]
    out_layer = [apply_block(0, real_input)]
    for i in range(2, len(sample_structure)):
        n = sum(sample_structure[i])
        middle_input = 0.0
        if n == 0:
            middle_input = real_input
        if n > 0:
            for j in range(len(sample_structure[i])):
                if sample_structure[i][j] == 1:
                    middle_input = middle_input + out_layer[j]
        out_layer.append(apply_block(i - 1, middle_input))
    return out_layer[-1]


# ----------------------------- fused Pallas kernel --------------------------

def _fused_forward_kernel(*refs, N, H, W, C, ksizes, relus, structure,
                          stage_num):
    """Whole CNN_final_block forward in one kernel invocation.

    refs layout (L = stage_num + 1 layers):
      refs[0]              : x        (N*H, W*C)  lane-dense input slab
      refs[1]              : A        (W*C, W*C)  per-channel sum+broadcast matrix
      refs[2 : 2+L]        : weights  (K_i*K_i*W*C, W*C)  block-diag im2col packed
      refs[2+L : 2+2L]     : gamma    (1, W*C)  tiled per-channel
      refs[2+2L : 2+3L]    : beta     (1, W*C)  tiled per-channel
      refs[2+3L]           : output   (N*H, W*C)
      refs[3+3L]           : padded-activation VMEM scratch (N, Hp, lanes)
    """
    L = stage_num + 1
    x_ref = refs[0]
    a_ref = refs[1]
    w_refs = refs[2:2 + L]
    g_refs = refs[2 + L:2 + 2 * L]
    bt_refs = refs[2 + 2 * L:2 + 3 * L]
    o_ref = refs[2 + 3 * L]
    pad_ref = refs[3 + 3 * L]

    WC = W * C
    inv_cnt = 1.0 / float(N * H * W)

    # Zero the padded scratch ONCE; every interior store below covers the same
    # region, so the halo stays zero across all conv/pool layers.
    pad_ref[...] = jnp.zeros(pad_ref.shape, pad_ref.dtype)

    def store_interior(act2d):
        # aligned store: ROW0 % 8 == 0 (sublanes), LPAD % 128 == 0 (lanes)
        pad_ref[:, ROW0:ROW0 + H, LPAD:LPAD + WC] = act2d.reshape(N, H, WC)

    def tap(dy, dx, p):
        # shifted window read straight off the Ref (no materialised padded value)
        r = ROW0 - p + dy
        c = LPAD + (dx - p) * C
        return pad_ref[:, r:r + H, c:c + WC].reshape(N * H, WC)

    def conv_bn_act(act2d, li):
        K = ksizes[li]
        p = K // 2
        if p > 0:
            store_interior(act2d)
            patches = jnp.concatenate(
                [tap(dy, dx, p) for dy in range(K) for dx in range(K)], axis=-1)
        else:
            patches = act2d
        acc = jax.lax.dot_general(
            patches.astype(MXU_DTYPE), w_refs[li][...],
            (((1,), (0,)), ((), ())),
            preferred_element_type=jnp.float32)            # (N*H, W*C) f32

        # Training-mode BatchNorm folded into one per-channel affine.  Conv bias
        # omitted (cancelled exactly by the batch-mean subtraction).  Centered
        # (two-pass) variance avoids E[y^2]-mean^2 cancellation.  a_ref sums a
        # (1, W*C) row over the W lane-groups per channel and broadcasts it
        # back, keeping the whole BN path lane-dense.
        colsum = jnp.sum(acc, axis=0, keepdims=True)
        mean = jax.lax.dot_general(
            colsum, a_ref[...], (((1,), (0,)), ((), ())),
            preferred_element_type=jnp.float32) * inv_cnt
        centered = acc - mean
        sqsum = jnp.sum(centered * centered, axis=0, keepdims=True)
        var = jax.lax.dot_general(
            sqsum, a_ref[...], (((1,), (0,)), ((), ())),
            preferred_element_type=jnp.float32) * inv_cnt
        y = (centered * (g_refs[li][...] * jax.lax.rsqrt(var + EPS))
             + bt_refs[li][...])
        if relus[li]:
            y = jnp.maximum(y, 0.0)
        return y

    def avgpool3(act2d):
        # AvgPool2d(kernel=3, stride=1, pad=1), count_include_pad=True,
        # while the activation is still VMEM-resident.
        store_interior(act2d)
        s = jnp.zeros((N * H, WC), jnp.float32)
        for dy in range(3):
            for dx in range(3):
                s = s + tap(dy, dx, 1)
        return s * (1.0 / 9.0)

    def apply_block(idx, inp):
        y = conv_bn_act(inp, idx)
        if idx == stage_num:              # last block is the _Pooling_layer
            y = avgpool3(y)
        return y

    real_input = x_ref[...].astype(jnp.float32)
    out = _skip_connect_forward(real_input, apply_block, stage_num, structure)
    o_ref[...] = out.astype(o_ref.dtype)   # full-lane, unmasked store


# ----------------------------- wrapper --------------------------------------

def cnn_final_block_forward(x_nchw, params, stage_num, structure):
    """Fused Pallas forward.  x_nchw: (N, C, H, W) PyTorch-layout input."""
    x = jnp.transpose(x_nchw, (0, 2, 3, 1))          # NCHW -> NHWC
    N, H, W, C = x.shape
    WC = W * C
    x2d = x.reshape(N * H, WC).astype(jnp.float32)   # lane-dense slab (free reshape)

    ksizes = tuple(int(p['w'].shape[0]) for p in params)
    relus = tuple(bool(p['relu']) for p in params)
    pmax = max(max(k // 2 for k in ksizes), 1)       # >= 1 for the avgpool
    assert pmax <= ROW0, "conv kernel sizes above 17 not supported"
    assert pmax * C <= LPAD, "pmax * C must fit inside the lane halo"

    hp = 2 * ROW0 + H                                # padded rows
    lanes = 2 * LPAD + WC                            # padded lane width

    eye_w = jnp.eye(W, dtype=jnp.float32)

    def pack_w(w):
        # (K, K, Cin, Cout) -> block-diagonal-per-w (K*K*W*C, W*C) so the im2col
        # matmul runs entirely in the lane-dense (row, w*C+c) layout.
        k = int(w.shape[0])
        bd = jnp.einsum('klco,wv->klwcvo', w.astype(jnp.float32), eye_w)
        return bd.reshape(k * k * W * C, W * C).astype(MXU_DTYPE)

    # per-channel sum over the W lane-groups, broadcast back over W (0/1 matrix)
    a_mat = jnp.kron(jnp.ones((W, W), jnp.float32), jnp.eye(C, dtype=jnp.float32))

    w_in = [pack_w(p['w']) for p in params]
    g_in = [jnp.tile(p['gamma'].reshape(1, C).astype(jnp.float32), (1, W))
            for p in params]
    b_in = [jnp.tile(p['beta'].reshape(1, C).astype(jnp.float32), (1, W))
            for p in params]
    # NOTE: p['b'] (conv bias) is intentionally not passed: training-mode BN
    # cancels it exactly.

    inputs = [x2d, a_mat] + w_in + g_in + b_in
    kernel = functools.partial(
        _fused_forward_kernel, N=N, H=H, W=W, C=C, ksizes=ksizes, relus=relus,
        structure=tuple(structure), stage_num=stage_num)

    out2d = pl.pallas_call(
        kernel,
        out_shape=jax.ShapeDtypeStruct((N * H, WC), x.dtype),
        grid=(1,),
        in_specs=[_full_spec(a.shape) for a in inputs],
        out_specs=_full_spec((N * H, WC)),
        scratch_shapes=[pltpu.VMEM((N, hp, lanes), jnp.float32)],
        compiler_params=pltpu.CompilerParams(
            dimension_semantics=("arbitrary",),
            vmem_limit_bytes=32 << 20),              # explicit; plenty at these shapes
    )(*inputs)

    out = out2d.reshape(N, H, W, C)                  # free byte-order reshape
    return jnp.transpose(out, (0, 3, 1, 2))          # NHWC -> NCHW


# ----------------------------- params ---------------------------------------

def init_params(key, stage_num, layer_list, c):
    """Mirrors CNN_final_block.__init__: stage_num conv layers (out_put->out_put)
    plus one _Pooling_layer (1x1 conv + BN + ReLU + avgpool)."""
    params = []
    for i in range(stage_num):
        K = KSIZE_BY_TYPE.get(layer_list[i], 3)
        key, k1, k2 = jax.random.split(key, 3)
        params.append(dict(
            w=jax.random.normal(k1, (K, K, c, c), jnp.float32) * 0.1,
            b=jax.random.normal(k2, (c,), jnp.float32) * 0.1,
            gamma=jnp.ones((c,), jnp.float32),
            beta=jnp.zeros((c,), jnp.float32),
            relu=layer_list[i] in (1, 2, 3, 4),      # types 1-4: BN+ReLU, else BN only
        ))
    key, k1, k2 = jax.random.split(key, 3)
    params.append(dict(
        w=jax.random.normal(k1, (1, 1, c, c), jnp.float32) * 0.1,
        b=jax.random.normal(k2, (c,), jnp.float32) * 0.1,
        gamma=jnp.ones((c,), jnp.float32),
        beta=jnp.zeros((c,), jnp.float32),
        relu=True,
    ))
    return params


# ----------------------------- pure-JAX reference ---------------------------

def _ref_conv_bn_act(x, w, b, gamma, beta, relu):
    N, H, W, _ = x.shape
    K = w.shape[0]
    cout = w.shape[-1]
    p = K // 2
    xp = jnp.pad(x.astype(jnp.float32), ((0, 0), (p, p), (p, p), (0, 0)))
    y = jnp.zeros((N, H, W, cout), jnp.float32)
    for dy in range(K):
        for dx in range(K):
            y = y + jnp.einsum('nhwc,co->nhwo',
                               xp[:, dy:dy + H, dx:dx + W, :],
                               w[dy, dx].astype(jnp.float32))
    y = y + b                                        # explicit conv bias
    mean = jnp.mean(y, axis=(0, 1, 2), keepdims=True)
    var = jnp.mean((y - mean) ** 2, axis=(0, 1, 2), keepdims=True)
    y = (y - mean) / jnp.sqrt(var + EPS) * gamma + beta
    if relu:
        y = jnp.maximum(y, 0.0)
    return y


def _ref_avgpool3(x):
    N, H, W, C = x.shape
    xp = jnp.pad(x, ((0, 0), (1, 1), (1, 1), (0, 0)))
    acc = jnp.zeros((N, H, W, C), jnp.float32)
    for dy in range(3):
        for dx in range(3):
            acc = acc + xp[:, dy:dy + H, dx:dx + W, :]
    return acc / 9.0


def cnn_final_block_forward_ref(x_nchw, params, stage_num, structure):
    x = jnp.transpose(x_nchw, (0, 2, 3, 1)).astype(jnp.float32)

    def apply_block(idx, inp):
        p = params[idx]
        y = _ref_conv_bn_act(inp, p['w'], p['b'], p['gamma'], p['beta'], p['relu'])
        if idx == stage_num:
            y = _ref_avgpool3(y)
        return y

    out = _skip_connect_forward(x, apply_block, stage_num, structure)
    return jnp.transpose(out, (0, 3, 1, 2)).astype(x_nchw.dtype)


# ----------------------------- main ------------------------------------------

if __name__ == "__main__":
    key = jax.random.PRNGKey(0)
    stage_num = 2
    layer_list = [1, 2]            # 3x3 conv and 5x5 conv blocks (BN + ReLU)
    structure = [1, 1, 1]          # all skip connections enabled
    C = 8                          # out_put channels (W*C = 128 -> lane-dense)
    N, H, W = 2, 16, 16

    kx, kp = jax.random.split(key)
    x = jax.random.normal(kx, (N, C, H, W), jnp.float32)   # PyTorch-style NCHW
    params = init_params(kp, stage_num, layer_list, C)

    out = cnn_final_block_forward(x, params, stage_num, structure)
    out = jax.block_until_ready(out)

    ref = cnn_final_block_forward_ref(x, params, stage_num, structure)
    ref = jax.block_until_ready(ref)

    assert out.shape == (N, C, H, W), out.shape
    # Tolerance accounts for bf16 MXU operands (f32 accumulation / BN stats).
    if not bool(jnp.allclose(out, ref, atol=3e-2, rtol=3e-2)):
        raise AssertionError("Pallas output mismatch vs JAX reference")

    print("KERNEL_OK")
</pallas_src>

<mosaic_0001>
module attributes {stable_mosaic.version = 11 : i64} {
  func.func @_fused_forward_kernel(%arg0: i32, %arg1: memref<32x128xf32, #tpu.memory_space<vmem>>, %arg2: memref<128x128xf32, #tpu.memory_space<vmem>>, %arg3: memref<1152x128xbf16, #tpu.memory_space<vmem>>, %arg4: memref<3200x128xbf16, #tpu.memory_space<vmem>>, %arg5: memref<128x128xbf16, #tpu.memory_space<vmem>>, %arg6: memref<1x128xf32, #tpu.memory_space<vmem>>, %arg7: memref<1x128xf32, #tpu.memory_space<vmem>>, %arg8: memref<1x128xf32, #tpu.memory_space<vmem>>, %arg9: memref<1x128xf32, #tpu.memory_space<vmem>>, %arg10: memref<1x128xf32, #tpu.memory_space<vmem>>, %arg11: memref<1x128xf32, #tpu.memory_space<vmem>>, %arg12: memref<32x128xf32, #tpu.memory_space<vmem>>, %arg13: memref<2x32x384xf32, #tpu.memory_space<vmem>>) attributes {dimension_semantics = [#tpu.dimension_semantics<arbitrary>], iteration_bounds = array<i64: 1>, scalar_prefetch = 0 : i64, scratch_operands = 1 : i64, tpu.core_type = #tpu.core_type<tc>, window_params = [{pipeline_mode = #tpu.pipeline_mode<synchronous>, transform_indices = @transform_0, window_bounds = array<i64: 32, 128>}, {pipeline_mode = #tpu.pipeline_mode<synchronous>, transform_indices = @transform_1, window_bounds = array<i64: 128, 128>}, {pipeline_mode = #tpu.pipeline_mode<synchronous>, transform_indices = @transform_2, window_bounds = array<i64: 1152, 128>}, {pipeline_mode = #tpu.pipeline_mode<synchronous>, transform_indices = @transform_3, window_bounds = array<i64: 3200, 128>}, {pipeline_mode = #tpu.pipeline_mode<synchronous>, transform_indices = @transform_4, window_bounds = array<i64: 128, 128>}, {pipeline_mode = #tpu.pipeline_mode<synchronous>, transform_indices = @transform_5, window_bounds = array<i64: 1, 128>}, {pipeline_mode = #tpu.pipeline_mode<synchronous>, transform_indices = @transform_6, window_bounds = array<i64: 1, 128>}, {pipeline_mode = #tpu.pipeline_mode<synchronous>, transform_indices = @transform_7, window_bounds = array<i64: 1, 128>}, {pipeline_mode = #tpu.pipeline_mode<synchronous>, transform_indices = @transform_8, window_bounds = array<i64: 1, 128>}, {pipeline_mode = #tpu.pipeline_mode<synchronous>, transform_indices = @transform_9, window_bounds = array<i64: 1, 128>}, {pipeline_mode = #tpu.pipeline_mode<synchronous>, transform_indices = @transform_10, window_bounds = array<i64: 1, 128>}, {pipeline_mode = #tpu.pipeline_mode<synchronous>, transform_indices = @transform_11, window_bounds = array<i64: 32, 128>}]} {
    %cst = arith.constant 0.000000e+00 : f32
    %0 = vector.broadcast %cst : f32 to vector<2x32x384xf32>
    %c0 = arith.constant 0 : index
    %c0_0 = arith.constant 0 : index
    %c0_1 = arith.constant 0 : index
    %1 = vector.load %arg13[%c0, %c0_0, %c0_1] : memref<2x32x384xf32, #tpu.memory_space<vmem>>, vector<2x32x384xf32>
    tpu.vector_store %arg13[%c0, %c0_0, %c0_1], %0 {strides = array<i32>} : memref<2x32x384xf32, #tpu.memory_space<vmem>>, vector<2x32x384xf32>,
    %c0_2 = arith.constant 0 : index
    %c0_3 = arith.constant 0 : index
    %2 = vector.load %arg1[%c0_2, %c0_3] : memref<32x128xf32, #tpu.memory_space<vmem>>, vector<32x128xf32>
    %3 = vector.shape_cast %2 : vector<32x128xf32> to vector<2x16x128xf32>
    %c0_4 = arith.constant 0 : index
    %c8 = arith.constant 8 : index
    %c128 = arith.constant 128 : index
    %4 = vector.load %arg13[%c0_4, %c8, %c128] : memref<2x32x384xf32, #tpu.memory_space<vmem>>, vector<2x16x128xf32>
    tpu.vector_store %arg13[%c0_4, %c8, %c128], %3 {strides = array<i32>} : memref<2x32x384xf32, #tpu.memory_space<vmem>>, vector<2x16x128xf32>,
    %c0_5 = arith.constant 0 : index
    %c7 = arith.constant 7 : index
    %c120 = arith.constant 120 : index
    %5 = vector.load %arg13[%c0_5, %c7, %c120] : memref<2x32x384xf32, #tpu.memory_space<vmem>>, vector<2x16x128xf32>
    %6 = vector.shape_cast %5 : vector<2x16x128xf32> to vector<32x128xf32>
    %c0_6 = arith.constant 0 : index
    %c7_7 = arith.constant 7 : index
    %c128_8 = arith.constant 128 : index
    %7 = vector.load %arg13[%c0_6, %c7_7, %c128_8] : memref<2x32x384xf32, #tpu.memory_space<vmem>>, vector<2x16x128xf32>
    %8 = vector.shape_cast %7 : vector<2x16x128xf32> to vector<32x128xf32>
    %c0_9 = arith.constant 0 : index
    %c7_10 = arith.constant 7 : index
    %c136 = arith.constant 136 : index
    %9 = vector.load %arg13[%c0_9, %c7_10, %c136] : memref<2x32x384xf32, #tpu.memory_space<vmem>>, vector<2x16x128xf32>
    %10 = vector.shape_cast %9 : vector<2x16x128xf32> to vector<32x128xf32>
    %c0_11 = arith.constant 0 : index
    %c8_12 = arith.constant 8 : index
    %c120_13 = arith.constant 120 : index
    %11 = vector.load %arg13[%c0_11, %c8_12, %c120_13] : memref<2x32x384xf32, #tpu.memory_space<vmem>>, vector<2x16x128xf32>
    %12 = vector.shape_cast %11 : vector<2x16x128xf32> to vector<32x128xf32>
    %c0_14 = arith.constant 0 : index
    %c8_15 = arith.constant 8 : index
    %c128_16 = arith.constant 128 : index
    %13 = vector.load %arg13[%c0_14, %c8_15, %c128_16] : memref<2x32x384xf32, #tpu.memory_space<vmem>>, vector<2x16x128xf32>
    %14 = vector.shape_cast %13 : vector<2x16x128xf32> to vector<32x128xf32>
    %c0_17 = arith.constant 0 : index
    %c8_18 = arith.constant 8 : index
    %c136_19 = arith.constant 136 : index
    %15 = vector.load %arg13[%c0_17, %c8_18, %c136_19] : memref<2x32x384xf32, #tpu.memory_space<vmem>>, vector<2x16x128xf32>
    %16 = vector.shape_cast %15 : vector<2x16x128xf32> to vector<32x128xf32>
    %c0_20 = arith.constant 0 : index
    %c9 = arith.constant 9 : index
    %c120_21 = arith.constant 120 : index
    %17 = vector.load %arg13[%c0_20, %c9, %c120_21] : memref<2x32x384xf32, #tpu.memory_space<vmem>>, vector<2x16x128xf32>
    %18 = vector.shape_cast %17 : vector<2x16x128xf32> to vector<32x128xf32>
    %c0_22 = arith.constant 0 : index
    %c9_23 = arith.constant 9 : index
    %c128_24 = arith.constant 128 : index
    %19 = vector.load %arg13[%c0_22, %c9_23, %c128_24] : memref<2x32x384xf32, #tpu.memory_space<vmem>>, vector<2x16x128xf32>
    %20 = vector.shape_cast %19 : vector<2x16x128xf32> to vector<32x128xf32>
    %c0_25 = arith.constant 0 : index
    %c9_26 = arith.constant 9 : index
    %c136_27 = arith.constant 136 : index
    %21 = vector.load %arg13[%c0_25, %c9_26, %c136_27] : memref<2x32x384xf32, #tpu.memory_space<vmem>>, vector<2x16x128xf32>
    %22 = vector.shape_cast %21 : vector<2x16x128xf32> to vector<32x128xf32>
    %23 = tpu.concatenate %6, %8, %10, %12, %14, %16, %18, %20, %22 in 1 : vector<32x128xf32>, vector<32x128xf32>, vector<32x128xf32>, vector<32x128xf32>, vector<32x128xf32>, vector<32x128xf32>, vector<32x128xf32>, vector<32x128xf32>, vector<32x128xf32> -> vector<32x1152xf32>
    %24 = arith.truncf %23 : vector<32x1152xf32> to vector<32x1152xbf16>
    %c0_28 = arith.constant 0 : index
    %c0_29 = arith.constant 0 : index
    %25 = vector.load %arg3[%c0_28, %c0_29] : memref<1152x128xbf16, #tpu.memory_space<vmem>>, vector<1152x128xbf16>
    %cst_30 = arith.constant dense<0.000000e+00> : vector<32x128xf32>
    %26 = tpu.matmul %24, %25, %cst_30 {dimension_numbers = #tpu.dot_dimension_numbers<[1], [0], [0], [1], [0, 0, 1, 1], [], []>} : vector<32x1152xbf16>, vector<1152x128xbf16>, vector<32x128xf32> -> vector<32x128xf32>
    %cst_31 = arith.constant dense<0.000000e+00> : vector<128xf32>
    %27 = vector.multi_reduction <add>, %26, %cst_31 [0] : vector<32x128xf32> to vector<128xf32>
    %28 = vector.shape_cast %27 : vector<128xf32> to vector<1x128xf32>
    %c0_32 = arith.constant 0 : index
    %c0_33 = arith.constant 0 : index
    %29 = vector.load %arg2[%c0_32, %c0_33] : memref<128x128xf32, #tpu.memory_space<vmem>>, vector<128x128xf32>
    %cst_34 = arith.constant dense<0.000000e+00> : vector<1x128xf32>
    %30 = tpu.matmul %28, %29, %cst_34 {dimension_numbers = #tpu.dot_dimension_numbers<[1], [0], [0], [1], [0, 0, 1, 1], [], []>} : vector<1x128xf32>, vector<128x128xf32>, vector<1x128xf32> -> vector<1x128xf32>
    %cst_35 = arith.constant 0.001953125 : f32
    %31 = vector.broadcast %cst_35 : f32 to vector<1x128xf32>
    %32 = arith.mulf %30, %31 : vector<1x128xf32>
    %33 = vector.broadcast %32 : vector<1x128xf32> to vector<32x128xf32>
    %34 = arith.subf %26, %33 : vector<32x128xf32>
    %35 = arith.mulf %34, %34 : vector<32x128xf32>
    %cst_36 = arith.constant dense<0.000000e+00> : vector<128xf32>
    %36 = vector.multi_reduction <add>, %35, %cst_36 [0] : vector<32x128xf32> to vector<128xf32>
    %37 = vector.shape_cast %36 : vector<128xf32> to vector<1x128xf32>
    %c0_37 = arith.constant 0 : index
    %c0_38 = arith.constant 0 : index
    %38 = vector.load %arg2[%c0_37, %c0_38] : memref<128x128xf32, #tpu.memory_space<vmem>>, vector<128x128xf32>
    %cst_39 = arith.constant dense<0.000000e+00> : vector<1x128xf32>
    %39 = tpu.matmul %37, %38, %cst_39 {dimension_numbers = #tpu.dot_dimension_numbers<[1], [0], [0], [1], [0, 0, 1, 1], [], []>} : vector<1x128xf32>, vector<128x128xf32>, vector<1x128xf32> -> vector<1x128xf32>
    %cst_40 = arith.constant 0.001953125 : f32
    %40 = vector.broadcast %cst_40 : f32 to vector<1x128xf32>
    %41 = arith.mulf %39, %40 : vector<1x128xf32>
    %c0_41 = arith.constant 0 : index
    %c0_42 = arith.constant 0 : index
    %42 = vector.load %arg6[%c0_41, %c0_42] : memref<1x128xf32, #tpu.memory_space<vmem>>, vector<1x128xf32>
    %cst_43 = arith.constant 9.99999974E-6 : f32
    %43 = vector.broadcast %cst_43 : f32 to vector<1x128xf32>
    %44 = arith.addf %41, %43 : vector<1x128xf32>
    %45 = math.rsqrt %44 : vector<1x128xf32>
    %46 = arith.mulf %42, %45 : vector<1x128xf32>
    %47 = vector.broadcast %46 : vector<1x128xf32> to vector<32x128xf32>
    %48 = arith.mulf %34, %47 : vector<32x128xf32>
    %c0_44 = arith.constant 0 : index
    %c0_45 = arith.constant 0 : index
    %49 = vector.load %arg9[%c0_44, %c0_45] : memref<1x128xf32, #tpu.memory_space<vmem>>, vector<1x128xf32>
    %50 = vector.broadcast %49 : vector<1x128xf32> to vector<32x128xf32>
    %51 = arith.addf %48, %50 : vector<32x128xf32>
    %cst_46 = arith.constant 0.000000e+00 : f32
    %52 = vector.broadcast %cst_46 : f32 to vector<32x128xf32>
    %53 = arith.maximumf %51, %52 : vector<32x128xf32>
    %cst_47 = arith.constant 0.000000e+00 : f32
    %54 = vector.broadcast %cst_47 : f32 to vector<32x128xf32>
    %55 = arith.addf %54, %53 : vector<32x128xf32>
    %56 = vector.shape_cast %55 : vector<32x128xf32> to vector<2x16x128xf32>
    %c0_48 = arith.constant 0 : index
    %c8_49 = arith.constant 8 : index
    %c128_50 = arith.constant 128 : index
    %57 = vector.load %arg13[%c0_48, %c8_49, %c128_50] : memref<2x32x384xf32, #tpu.memory_space<vmem>>, vector<2x16x128xf32>
    tpu.vector_store %arg13[%c0_48, %c8_49, %c128_50], %56 {strides = array<i32>} : memref<2x32x384xf32, #tpu.memory_space<vmem>>, vector<2x16x128xf32>,
    %c0_51 = arith.constant 0 : index
    %c6 = arith.constant 6 : index
    %c112 = arith.constant 112 : index
    %58 = vector.load %arg13[%c0_51, %c6, %c112] : memref<2x32x384xf32, #tpu.memory_space<vmem>>, vector<2x16x128xf32>
    %59 = vector.shape_cast %58 : vector<2x16x128xf32> to vector<32x128xf32>
    %c0_52 = arith.constant 0 : index
    %c6_53 = arith.constant 6 : index
    %c120_54 = arith.constant 120 : index
    %60 = vector.load %arg13[%c0_52, %c6_53, %c120_54] : memref<2x32x384xf32, #tpu.memory_space<vmem>>, vector<2x16x128xf32>
    %61 = vector.shape_cast %60 : vector<2x16x128xf32> to vector<32x128xf32>
    %c0_55 = arith.constant 0 : index
    %c6_56 = arith.constant 6 : index
    %c128_57 = arith.constant 128 : index
    %62 = vector.load %arg13[%c0_55, %c6_56, %c128_57] : memref<2x32x384xf32, #tpu.memory_space<vmem>>, vector<2x16x128xf32>
    %63 = vector.shape_cast %62 : vector<2x16x128xf32> to vector<32x128xf32>
    %c0_58 = arith.constant 0 : index
    %c6_59 = arith.constant 6 : index
    %c136_60 = arith.constant 136 : index
    %64 = vector.load %arg13[%c0_58, %c6_59, %c136_60] : memref<2x32x384xf32, #tpu.memory_space<vmem>>, vector<2x16x128xf32>
    %65 = vector.shape_cast %64 : vector<2x16x128xf32> to vector<32x128xf32>
    %c0_61 = arith.constant 0 : index
    %c6_62 = arith.constant 6 : index
    %c144 = arith.constant 144 : index
    %66 = vector.load %arg13[%c0_61, %c6_62, %c144] : memref<2x32x384xf32, #tpu.memory_space<vmem>>, vector<2x16x128xf32>
    %67 = vector.shape_cast %66 : vector<2x16x128xf32> to vector<32x128xf32>
    %c0_63 = arith.constant 0 : index
    %c7_64 = arith.constant 7 : index
    %c112_65 = arith.constant 112 : index
    %68 = vector.load %arg13[%c0_63, %c7_64, %c112_65] : memref<2x32x384xf32, #tpu.memory_space<vmem>>, vector<2x16x128xf32>
    %69 = vector.shape_cast %68 : vector<2x16x128xf32> to vector<32x128xf32>
    %c0_66 = arith.constant 0 : index
    %c7_67 = arith.constant 7 : index
    %c120_68 = arith.constant 120 : index
    %70 = vector.load %arg13[%c0_66, %c7_67, %c120_68] : memref<2x32x384xf32, #tpu.memory_space<vmem>>, vector<2x16x128xf32>
    %71 = vector.shape_cast %70 : vector<2x16x128xf32> to vector<32x128xf32>
    %c0_69 = arith.constant 0 : index
    %c7_70 = arith.constant 7 : index
    %c128_71 = arith.constant 128 : index
    %72 = vector.load %arg13[%c0_69, %c7_70, %c128_71] : memref<2x32x384xf32, #tpu.memory_space<vmem>>, vector<2x16x128xf32>
    %73 = vector.shape_cast %72 : vector<2x16x128xf32> to vector<32x128xf32>
    %c0_72 = arith.constant 0 : index
    %c7_73 = arith.constant 7 : index
    %c136_74 = arith.constant 136 : index
    %74 = vector.load %arg13[%c0_72, %c7_73, %c136_74] : memref<2x32x384xf32, #tpu.memory_space<vmem>>, vector<2x16x128xf32>
    %75 = vector.shape_cast %74 : vector<2x16x128xf32> to vector<32x128xf32>
    %c0_75 = arith.constant 0 : index
    %c7_76 = arith.constant 7 : index
    %c144_77 = arith.constant 144 : index
    %76 = vector.load %arg13[%c0_75, %c7_76, %c144_77] : memref<2x32x384xf32, #tpu.memory_space<vmem>>, vector<2x16x128xf32>
    %77 = vector.shape_cast %76 : vector<2x16x128xf32> to vector<32x128xf32>
    %c0_78 = arith.constant 0 : index
    %c8_79 = arith.constant 8 : index
    %c112_80 = arith.constant 112 : index
    %78 = vector.load %arg13[%c0_78, %c8_79, %c112_80] : memref<2x32x384xf32, #tpu.memory_space<vmem>>, vector<2x16x128xf32>
    %79 = vector.shape_cast %78 : vector<2x16x128xf32> to vector<32x128xf32>
    %c0_81 = arith.constant 0 : index
    %c8_82 = arith.constant 8 : index
    %c120_83 = arith.constant 120 : index
    %80 = vector.load %arg13[%c0_81, %c8_82, %c120_83] : memref<2x32x384xf32, #tpu.memory_space<vmem>>, vector<2x16x128xf32>
    %81 = vector.shape_cast %80 : vector<2x16x128xf32> to vector<32x128xf32>
    %c0_84 = arith.constant 0 : index
    %c8_85 = arith.constant 8 : index
    %c128_86 = arith.constant 128 : index
    %82 = vector.load %arg13[%c0_84, %c8_85, %c128_86] : memref<2x32x384xf32, #tpu.memory_space<vmem>>, vector<2x16x128xf32>
    %83 = vector.shape_cast %82 : vector<2x16x128xf32> to vector<32x128xf32>
    %c0_87 = arith.constant 0 : index
    %c8_88 = arith.constant 8 : index
    %c136_89 = arith.constant 136 : index
    %84 = vector.load %arg13[%c0_87, %c8_88, %c136_89] : memref<2x32x384xf32, #tpu.memory_space<vmem>>, vector<2x16x128xf32>
    %85 = vector.shape_cast %84 : vector<2x16x128xf32> to vector<32x128xf32>
    %c0_90 = arith.constant 0 : index
    %c8_91 = arith.constant 8 : index
    %c144_92 = arith.constant 144 : index
    %86 = vector.load %arg13[%c0_90, %c8_91, %c144_92] : memref<2x32x384xf32, #tpu.memory_space<vmem>>, vector<2x16x128xf32>
    %87 = vector.shape_cast %86 : vector<2x16x128xf32> to vector<32x128xf32>
    %c0_93 = arith.constant 0 : index
    %c9_94 = arith.constant 9 : index
    %c112_95 = arith.constant 112 : index
    %88 = vector.load %arg13[%c0_93, %c9_94, %c112_95] : memref<2x32x384xf32, #tpu.memory_space<vmem>>, vector<2x16x128xf32>
    %89 = vector.shape_cast %88 : vector<2x16x128xf32> to vector<32x128xf32>
    %c0_96 = arith.constant 0 : index
    %c9_97 = arith.constant 9 : index
    %c120_98 = arith.constant 120 : index
    %90 = vector.load %arg13[%c0_96, %c9_97, %c120_98] : memref<2x32x384xf32, #tpu.memory_space<vmem>>, vector<2x16x128xf32>
    %91 = vector.shape_cast %90 : vector<2x16x128xf32> to vector<32x128xf32>
    %c0_99 = arith.constant 0 : index
    %c9_100 = arith.constant 9 : index
    %c128_101 = arith.constant 128 : index
    %92 = vector.load %arg13[%c0_99, %c9_100, %c128_101] : memref<2x32x384xf32, #tpu.memory_space<vmem>>, vector<2x16x128xf32>
    %93 = vector.shape_cast %92 : vector<2x16x128xf32> to vector<32x128xf32>
    %c0_102 = arith.constant 0 : index
    %c9_103 = arith.constant 9 : index
    %c136_104 = arith.constant 136 : index
    %94 = vector.load %arg13[%c0_102, %c9_103, %c136_104] : memref<2x32x384xf32, #tpu.memory_space<vmem>>, vector<2x16x128xf32>
    %95 = vector.shape_cast %94 : vector<2x16x128xf32> to vector<32x128xf32>
    %c0_105 = arith.constant 0 : index
    %c9_106 = arith.constant 9 : index
    %c144_107 = arith.constant 144 : index
    %96 = vector.load %arg13[%c0_105, %c9_106, %c144_107] : memref<2x32x384xf32, #tpu.memory_space<vmem>>, vector<2x16x128xf32>
    %97 = vector.shape_cast %96 : vector<2x16x128xf32> to vector<32x128xf32>
    %c0_108 = arith.constant 0 : index
    %c10 = arith.constant 10 : index
    %c112_109 = arith.constant 112 : index
    %98 = vector.load %arg13[%c0_108, %c10, %c112_109] : memref<2x32x384xf32, #tpu.memory_space<vmem>>, vector<2x16x128xf32>
    %99 = vector.shape_cast %98 : vector<2x16x128xf32> to vector<32x128xf32>
    %c0_110 = arith.constant 0 : index
    %c10_111 = arith.constant 10 : index
    %c120_112 = arith.constant 120 : index
    %100 = vector.load %arg13[%c0_110, %c10_111, %c120_112] : memref<2x32x384xf32, #tpu.memory_space<vmem>>, vector<2x16x128xf32>
    %101 = vector.shape_cast %100 : vector<2x16x128xf32> to vector<32x128xf32>
    %c0_113 = arith.constant 0 : index
    %c10_114 = arith.constant 10 : index
    %c128_115 = arith.constant 128 : index
    %102 = vector.load %arg13[%c0_113, %c10_114, %c128_115] : memref<2x32x384xf32, #tpu.memory_space<vmem>>, vector<2x16x128xf32>
    %103 = vector.shape_cast %102 : vector<2x16x128xf32> to vector<32x128xf32>
    %c0_116 = arith.constant 0 : index
    %c10_117 = arith.constant 10 : index
    %c136_118 = arith.constant 136 : index
    %104 = vector.load %arg13[%c0_116, %c10_117, %c136_118] : memref<2x32x384xf32, #tpu.memory_space<vmem>>, vector<2x16x128xf32>
    %105 = vector.shape_cast %104 : vector<2x16x128xf32> to vector<32x128xf32>
    %c0_119 = arith.constant 0 : index
    %c10_120 = arith.constant 10 : index
    %c144_121 = arith.constant 144 : index
    %106 = vector.load %arg13[%c0_119, %c10_120, %c144_121] : memref<2x32x384xf32, #tpu.memory_space<vmem>>, vector<2x16x128xf32>
    %107 = vector.shape_cast %106 : vector<2x16x128xf32> to vector<32x128xf32>
    %108 = tpu.concatenate %59, %61, %63, %65, %67, %69, %71, %73, %75, %77, %79, %81, %83, %85, %87, %89 in 1 : vector<32x128xf32>, vector<32x128xf32>, vector<32x128xf32>, vector<32x128xf32>, vector<32x128xf32>, vector<32x128xf32>, vector<32x128xf32>, vector<32x128xf32>, vector<32x128xf32>, vector<32x128xf32>, vector<32x128xf32>, vector<32x128xf32>, vector<32x128xf32>, vector<32x128xf32>, vector<32x128xf32>, vector<32x128xf32> -> vector<32x2048xf32>
    %109 = tpu.concatenate %91, %93, %95, %97, %99, %101, %103, %105, %107 in 1 : vector<32x128xf32>, vector<32x128xf32>, vector<32x128xf32>, vector<32x128xf32>, vector<32x128xf32>, vector<32x128xf32>, vector<32x128xf32>, vector<32x128xf32>, vector<32x128xf32> -> vector<32x1152xf32>
    %110 = tpu.concatenate %108, %109 in 1 : vector<32x2048xf32>, vector<32x1152xf32> -> vector<32x3200xf32>
    %111 = arith.truncf %110 : vector<32x3200xf32> to vector<32x3200xbf16>
    %c0_122 = arith.constant 0 : index
    %c0_123 = arith.constant 0 : index
    %112 = vector.load %arg4[%c0_122, %c0_123] : memref<3200x128xbf16, #tpu.memory_space<vmem>>, vector<3200x128xbf16>
    %cst_124 = arith.constant dense<0.000000e+00> : vector<32x128xf32>
    %113 = tpu.matmul %111, %112, %cst_124 {dimension_numbers = #tpu.dot_dimension_numbers<[1], [0], [0], [1], [0, 0, 1, 1], [], []>} : vector<32x3200xbf16>, vector<3200x128xbf16>, vector<32x128xf32> -> vector<32x128xf32>
    %cst_125 = arith.constant dense<0.000000e+00> : vector<128xf32>
    %114 = vector.multi_reduction <add>, %113, %cst_125 [0] : vector<32x128xf32> to vector<128xf32>
    %115 = vector.shape_cast %114 : vector<128xf32> to vector<1x128xf32>
    %c0_126 = arith.constant 0 : index
    %c0_127 = arith.constant 0 : index
    %116 = vector.load %arg2[%c0_126, %c0_127] : memref<128x128xf32, #tpu.memory_space<vmem>>, vector<128x128xf32>
    %cst_128 = arith.constant dense<0.000000e+00> : vector<1x128xf32>
    %117 = tpu.matmul %115, %116, %cst_128 {dimension_numbers = #tpu.dot_dimension_numbers<[1], [0], [0], [1], [0, 0, 1, 1], [], []>} : vector<1x128xf32>, vector<128x128xf32>, vector<1x128xf32> -> vector<1x128xf32>
    %cst_129 = arith.constant 0.001953125 : f32
    %118 = vector.broadcast %cst_129 : f32 to vector<1x128xf32>
    %119 = arith.mulf %117, %118 : vector<1x128xf32>
    %120 = vector.broadcast %119 : vector<1x128xf32> to vector<32x128xf32>
    %121 = arith.subf %113, %120 : vector<32x128xf32>
    %122 = arith.mulf %121, %121 : vector<32x128xf32>
    %cst_130 = arith.constant dense<0.000000e+00> : vector<128xf32>
    %123 = vector.multi_reduction <add>, %122, %cst_130 [0] : vector<32x128xf32> to vector<128xf32>
    %124 = vector.shape_cast %123 : vector<128xf32> to vector<1x128xf32>
    %c0_131 = arith.constant 0 : index
    %c0_132 = arith.constant 0 : index
    %125 = vector.load %arg2[%c0_131, %c0_132] : memref<128x128xf32, #tpu.memory_space<vmem>>, vector<128x128xf32>
    %cst_133 = arith.constant dense<0.000000e+00> : vector<1x128xf32>
    %126 = tpu.matmul %124, %125, %cst_133 {dimension_numbers = #tpu.dot_dimension_numbers<[1], [0], [0], [1], [0, 0, 1, 1], [], []>} : vector<1x128xf32>, vector<128x128xf32>, vector<1x128xf32> -> vector<1x128xf32>
    %cst_134 = arith.constant 0.001953125 : f32
    %127 = vector.broadcast %cst_134 : f32 to vector<1x128xf32>
    %128 = arith.mulf %126, %127 : vector<1x128xf32>
    %c0_135 = arith.constant 0 : index
    %c0_136 = arith.constant 0 : index
    %129 = vector.load %arg7[%c0_135, %c0_136] : memref<1x128xf32, #tpu.memory_space<vmem>>, vector<1x128xf32>
    %cst_137 = arith.constant 9.99999974E-6 : f32
    %130 = vector.broadcast %cst_137 : f32 to vector<1x128xf32>
    %131 = arith.addf %128, %130 : vector<1x128xf32>
    %132 = math.rsqrt %131 : vector<1x128xf32>
    %133 = arith.mulf %129, %132 : vector<1x128xf32>
    %134 = vector.broadcast %133 : vector<1x128xf32> to vector<32x128xf32>
    %135 = arith.mulf %121, %134 : vector<32x128xf32>
    %c0_138 = arith.constant 0 : index
    %c0_139 = arith.constant 0 : index
    %136 = vector.load %arg10[%c0_138, %c0_139] : memref<1x128xf32, #tpu.memory_space<vmem>>, vector<1x128xf32>
    %137 = vector.broadcast %136 : vector<1x128xf32> to vector<32x128xf32>
    %138 = arith.addf %135, %137 : vector<32x128xf32>
    %cst_140 = arith.constant 0.000000e+00 : f32
    %139 = vector.broadcast %cst_140 : f32 to vector<32x128xf32>
    %140 = arith.maximumf %138, %139 : vector<32x128xf32>
    %cst_141 = arith.constant 0.000000e+00 : f32
    %141 = vector.broadcast %cst_141 : f32 to vector<32x128xf32>
    %142 = arith.addf %141, %53 : vector<32x128xf32>
    %143 = arith.addf %142, %140 : vector<32x128xf32>
    %144 = arith.truncf %143 : vector<32x128xf32> to vector<32x128xbf16>
    %c0_142 = arith.constant 0 : index
    %c0_143 = arith.constant 0 : index
    %145 = vector.load %arg5[%c0_142, %c0_143] : memref<128x128xbf16, #tpu.memory_space<vmem>>, vector<128x128xbf16>
    %cst_144 = arith.constant dense<0.000000e+00> : vector<32x128xf32>
    %146 = tpu.matmul %144, %145, %cst_144 {dimension_numbers = #tpu.dot_dimension_numbers<[1], [0], [0], [1], [0, 0, 1, 1], [], []>} : vector<32x128xbf16>, vector<128x128xbf16>, vector<32x128xf32> -> vector<32x128xf32>
    %cst_145 = arith.constant dense<0.000000e+00> : vector<128xf32>
    %147 = vector.multi_reduction <add>, %146, %cst_145 [0] : vector<32x128xf32> to vector<128xf32>
    %148 = vector.shape_cast %147 : vector<128xf32> to vector<1x128xf32>
    %c0_146 = arith.constant 0 : index
    %c0_147 = arith.constant 0 : index
    %149 = vector.load %arg2[%c0_146, %c0_147] : memref<128x128xf32, #tpu.memory_space<vmem>>, vector<128x128xf32>
    %cst_148 = arith.constant dense<0.000000e+00> : vector<1x128xf32>
    %150 = tpu.matmul %148, %149, %cst_148 {dimension_numbers = #tpu.dot_dimension_numbers<[1], [0], [0], [1], [0, 0, 1, 1], [], []>} : vector<1x128xf32>, vector<128x128xf32>, vector<1x128xf32> -> vector<1x128xf32>
    %cst_149 = arith.constant 0.001953125 : f32
    %151 = vector.broadcast %cst_149 : f32 to vector<1x128xf32>
    %152 = arith.mulf %150, %151 : vector<1x128xf32>
    %153 = vector.broadcast %152 : vector<1x128xf32> to vector<32x128xf32>
    %154 = arith.subf %146, %153 : vector<32x128xf32>
    %155 = arith.mulf %154, %154 : vector<32x128xf32>
    %cst_150 = arith.constant dense<0.000000e+00> : vector<128xf32>
    %156 = vector.multi_reduction <add>, %155, %cst_150 [0] : vector<32x128xf32> to vector<128xf32>
    %157 = vector.shape_cast %156 : vector<128xf32> to vector<1x128xf32>
    %c0_151 = arith.constant 0 : index
    %c0_152 = arith.constant 0 : index
    %158 = vector.load %arg2[%c0_151, %c0_152] : memref<128x128xf32, #tpu.memory_space<vmem>>, vector<128x128xf32>
    %cst_153 = arith.constant dense<0.000000e+00> : vector<1x128xf32>
    %159 = tpu.matmul %157, %158, %cst_153 {dimension_numbers = #tpu.dot_dimension_numbers<[1], [0], [0], [1], [0, 0, 1, 1], [], []>} : vector<1x128xf32>, vector<128x128xf32>, vector<1x128xf32> -> vector<1x128xf32>
    %cst_154 = arith.constant 0.001953125 : f32
    %160 = vector.broadcast %cst_154 : f32 to vector<1x128xf32>
    %161 = arith.mulf %159, %160 : vector<1x128xf32>
    %c0_155 = arith.constant 0 : index
    %c0_156 = arith.constant 0 : index
    %162 = vector.load %arg8[%c0_155, %c0_156] : memref<1x128xf32, #tpu.memory_space<vmem>>, vector<1x128xf32>
    %cst_157 = arith.constant 9.99999974E-6 : f32
    %163 = vector.broadcast %cst_157 : f32 to vector<1x128xf32>
    %164 = arith.addf %161, %163 : vector<1x128xf32>
    %165 = math.rsqrt %164 : vector<1x128xf32>
    %166 = arith.mulf %162, %165 : vector<1x128xf32>
    %167 = vector.broadcast %166 : vector<1x128xf32> to vector<32x128xf32>
    %168 = arith.mulf %154, %167 : vector<32x128xf32>
    %c0_158 = arith.constant 0 : index
    %c0_159 = arith.constant 0 : index
    %169 = vector.load %arg11[%c0_158, %c0_159] : memref<1x128xf32, #tpu.memory_space<vmem>>, vector<1x128xf32>
    %170 = vector.broadcast %169 : vector<1x128xf32> to vector<32x128xf32>
    %171 = arith.addf %168, %170 : vector<32x128xf32>
    %cst_160 = arith.constant 0.000000e+00 : f32
    %172 = vector.broadcast %cst_160 : f32 to vector<32x128xf32>
    %173 = arith.maximumf %171, %172 : vector<32x128xf32>
    %174 = vector.shape_cast %173 : vector<32x128xf32> to vector<2x16x128xf32>
    %c0_161 = arith.constant 0 : index
    %c8_162 = arith.constant 8 : index
    %c128_163 = arith.constant 128 : index
    %175 = vector.load %arg13[%c0_161, %c8_162, %c128_163] : memref<2x32x384xf32, #tpu.memory_space<vmem>>, vector<2x16x128xf32>
    tpu.vector_store %arg13[%c0_161, %c8_162, %c128_163], %174 {strides = array<i32>} : memref<2x32x384xf32, #tpu.memory_space<vmem>>, vector<2x16x128xf32>,
    %cst_164 = arith.constant 0.000000e+00 : f32
    %176 = vector.broadcast %cst_164 : f32 to vector<32x128xf32>
    %c0_165 = arith.constant 0 : index
    %c7_166 = arith.constant 7 : index
    %c120_167 = arith.constant 120 : index
    %177 = vector.load %arg13[%c0_165, %c7_166, %c120_167] : memref<2x32x384xf32, #tpu.memory_space<vmem>>, vector<2x16x128xf32>
    %178 = vector.shape_cast %177 : vector<2x16x128xf32> to vector<32x128xf32>
    %179 = arith.addf %176, %178 : vector<32x128xf32>
    %c0_168 = arith.constant 0 : index
    %c7_169 = arith.constant 7 : index
    %c128_170 = arith.constant 128 : index
    %180 = vector.load %arg13[%c0_168, %c7_169, %c128_170] : memref<2x32x384xf32, #tpu.memory_space<vmem>>, vector<2x16x128xf32>
    %181 = vector.shape_cast %180 : vector<2x16x128xf32> to vector<32x128xf32>
    %182 = arith.addf %179, %181 : vector<32x128xf32>
    %c0_171 = arith.constant 0 : index
    %c7_172 = arith.constant 7 : index
    %c136_173 = arith.constant 136 : index
    %183 = vector.load %arg13[%c0_171, %c7_172, %c136_173] : memref<2x32x384xf32, #tpu.memory_space<vmem>>, vector<2x16x128xf32>
    %184 = vector.shape_cast %183 : vector<2x16x128xf32> to vector<32x128xf32>
    %185 = arith.addf %182, %184 : vector<32x128xf32>
    %c0_174 = arith.constant 0 : index
    %c8_175 = arith.constant 8 : index
    %c120_176 = arith.constant 120 : index
    %186 = vector.load %arg13[%c0_174, %c8_175, %c120_176] : memref<2x32x384xf32, #tpu.memory_space<vmem>>, vector<2x16x128xf32>
    %187 = vector.shape_cast %186 : vector<2x16x128xf32> to vector<32x128xf32>
    %188 = arith.addf %185, %187 : vector<32x128xf32>
    %c0_177 = arith.constant 0 : index
    %c8_178 = arith.constant 8 : index
    %c128_179 = arith.constant 128 : index
    %189 = vector.load %arg13[%c0_177, %c8_178, %c128_179] : memref<2x32x384xf32, #tpu.memory_space<vmem>>, vector<2x16x128xf32>
    %190 = vector.shape_cast %189 : vector<2x16x128xf32> to vector<32x128xf32>
    %191 = arith.addf %188, %190 : vector<32x128xf32>
    %c0_180 = arith.constant 0 : index
    %c8_181 = arith.constant 8 : index
    %c136_182 = arith.constant 136 : index
    %192 = vector.load %arg13[%c0_180, %c8_181, %c136_182] : memref<2x32x384xf32, #tpu.memory_space<vmem>>, vector<2x16x128xf32>
    %193 = vector.shape_cast %192 : vector<2x16x128xf32> to vector<32x128xf32>
    %194 = arith.addf %191, %193 : vector<32x128xf32>
    %c0_183 = arith.constant 0 : index
    %c9_184 = arith.constant 9 : index
    %c120_185 = arith.constant 120 : index
    %195 = vector.load %arg13[%c0_183, %c9_184, %c120_185] : memref<2x32x384xf32, #tpu.memory_space<vmem>>, vector<2x16x128xf32>
    %196 = vector.shape_cast %195 : vector<2x16x128xf32> to vector<32x128xf32>
    %197 = arith.addf %194, %196 : vector<32x128xf32>
    %c0_186 = arith.constant 0 : index
    %c9_187 = arith.constant 9 : index
    %c128_188 = arith.constant 128 : index
    %198 = vector.load %arg13[%c0_186, %c9_187, %c128_188] : memref<2x32x384xf32, #tpu.memory_space<vmem>>, vector<2x16x128xf32>
    %199 = vector.shape_cast %198 : vector<2x16x128xf32> to vector<32x128xf32>
    %200 = arith.addf %197, %199 : vector<32x128xf32>
    %c0_189 = arith.constant 0 : index
    %c9_190 = arith.constant 9 : index
    %c136_191 = arith.constant 136 : index
    %201 = vector.load %arg13[%c0_189, %c9_190, %c136_191] : memref<2x32x384xf32, #tpu.memory_space<vmem>>, vector<2x16x128xf32>
    %202 = vector.shape_cast %201 : vector<2x16x128xf32> to vector<32x128xf32>
    %203 = arith.addf %200, %202 : vector<32x128xf32>
    %cst_192 = arith.constant 0.111111112 : f32
    %204 = vector.broadcast %cst_192 : f32 to vector<32x128xf32>
    %205 = arith.mulf %203, %204 : vector<32x128xf32>
    %c0_193 = arith.constant 0 : index
    %c0_194 = arith.constant 0 : index
    %206 = vector.load %arg12[%c0_193, %c0_194] : memref<32x128xf32, #tpu.memory_space<vmem>>, vector<32x128xf32>
    tpu.vector_store %arg12[%c0_193, %c0_194], %205 {strides = array<i32>} : memref<32x128xf32, #tpu.memory_space<vmem>>, vector<32x128xf32>,
    return
  }
  func.func @transform_0(%arg0: i32) -> (i32, i32) {
    %c0_i32 = arith.constant 0 : i32
    %c0_i32_0 = arith.constant 0 : i32
    %c0_i32_1 = arith.constant 0 : i32
    return %c0_i32, %c0_i32_0 : i32, i32
  }
  func.func @transform_1(%arg0: i32) -> (i32, i32) {
    %c0_i32 = arith.constant 0 : i32
    %c0_i32_0 = arith.constant 0 : i32
    %c0_i32_1 = arith.constant 0 : i32
    return %c0_i32, %c0_i32_0 : i32, i32
  }
  func.func @transform_2(%arg0: i32) -> (i32, i32) {
    %c0_i32 = arith.constant 0 : i32
    %c0_i32_0 = arith.constant 0 : i32
    %c0_i32_1 = arith.constant 0 : i32
    return %c0_i32, %c0_i32_0 : i32, i32
  }
  func.func @transform_3(%arg0: i32) -> (i32, i32) {
    %c0_i32 = arith.constant 0 : i32
    %c0_i32_0 = arith.constant 0 : i32
    %c0_i32_1 = arith.constant 0 : i32
    return %c0_i32, %c0_i32_0 : i32, i32
  }
  func.func @transform_4(%arg0: i32) -> (i32, i32) {
    %c0_i32 = arith.constant 0 : i32
    %c0_i32_0 = arith.constant 0 : i32
    %c0_i32_1 = arith.constant 0 : i32
    return %c0_i32, %c0_i32_0 : i32, i32
  }
  func.func @transform_5(%arg0: i32) -> (i32, i32) {
    %c0_i32 = arith.constant 0 : i32
    %c0_i32_0 = arith.constant 0 : i32
    %c0_i32_1 = arith.constant 0 : i32
    return %c0_i32, %c0_i32_0 : i32, i32
  }
  func.func @transform_6(%arg0: i32) -> (i32, i32) {
    %c0_i32 = arith.constant 0 : i32
    %c0_i32_0 = arith.constant 0 : i32
    %c0_i32_1 = arith.constant 0 : i32
    return %c0_i32, %c0_i32_0 : i32, i32
  }
  func.func @transform_7(%arg0: i32) -> (i32, i32) {
    %c0_i32 = arith.constant 0 : i32
    %c0_i32_0 = arith.constant 0 : i32
    %c0_i32_1 = arith.constant 0 : i32
    return %c0_i32, %c0_i32_0 : i32, i32
  }
  func.func @transform_8(%arg0: i32) -> (i32, i32) {
    %c0_i32 = arith.constant 0 : i32
    %c0_i32_0 = arith.constant 0 : i32
    %c0_i32_1 = arith.constant 0 : i32
    return %c0_i32, %c0_i32_0 : i32, i32
  }
  func.func @transform_9(%arg0: i32) -> (i32, i32) {
    %c0_i32 = arith.constant 0 : i32
    %c0_i32_0 = arith.constant 0 : i32
    %c0_i32_1 = arith.constant 0 : i32
    return %c0_i32, %c0_i32_0 : i32, i32
  }
  func.func @transform_10(%arg0: i32) -> (i32, i32) {
    %c0_i32 = arith.constant 0 : i32
    %c0_i32_0 = arith.constant 0 : i32
    %c0_i32_1 = arith.constant 0 : i32
    return %c0_i32, %c0_i32_0 : i32, i32
  }
  func.func @transform_11(%arg0: i32) -> (i32, i32) {
    %c0_i32 = arith.constant 0 : i32
    %c0_i32_0 = arith.constant 0 : i32
    %c0_i32_1 = arith.constant 0 : i32
    return %c0_i32, %c0_i32_0 : i32, i32
  }
}

</mosaic_0001>

<bundles_post_ra>
// kernel: tpu_custom_call.1
= control target key start
LH: loop header
LB: loop body
LE: loop exit
PB: predicated region body
PF: predicated region fallthrough
CT: control target
= control target key end

     0   :  { %16 = vsyncpa [#allocation4], 0  ;;  %s9182_s0 = inlined_call_operand.hbm [shape: f32[32,128], index: 0, kind: input, shape index: {}]   ;;  %s9183_s1 = inlined_call_operand.hbm [shape: f32[128,128], index: 1, kind: input, shape index: {}]   ;;  %s9184_s2 = inlined_call_operand.hbm [shape: bf16[1152,128], index: 2, kind: input, shape index: {}]   ;;  %s9185_s3 = inlined_call_operand.hbm [shape: bf16[3200,128], index: 3, kind: input, shape index: {}]   ;;  %s9186_s4 = inlined_call_operand.hbm [shape: bf16[128,128], index: 4, kind: input, shape index: {}]   ;;  %s9187_s5 = inlined_call_operand.vmem [shape: f32[1,128], index: 5, kind: input, shape index: {}]   ;;  %s9188_s6 = inlined_call_operand.vmem [shape: f32[1,128], index: 6, kind: input, shape index: {}]   ;;  %s9189_s7 = inlined_call_operand.vmem [shape: f32[1,128], index: 7, kind: input, shape index: {}]   ;;  %s9190_s8 = inlined_call_operand.vmem [shape: f32[1,128], index: 8, kind: input, shape index: {}]   ;;  %s9191_s9 = inlined_call_operand.vmem [shape: f32[1,128], index: 9, kind: input, shape index: {}]   ;;  %s9192_s10 = inlined_call_operand.vmem [shape: f32[1,128], index: 10, kind: input, shape index: {}]   ;;  %s9193_s11 = inlined_call_operand.hbm [shape: f32[32,128], index: 11, kind: output, shape index: {}]  }
   0x1   :  { %17 = vsyncpa [#allocation7], 0 }
   0x2   :  { %18 = vsyncpa [#allocation10], 0 }
   0x3   :  { %19 = vsyncpa [#allocation5], 0  ;;  %s7809_s17 = smov [#allocation6]   ;;  %s7669_s21 = scalar_lea.hbm %s9183_s1, 2048 }
   0x4   :  { %s37_s18 = sshll.u32 %s7809_s17, 4  ;;  %p7670_p0 = scmp.ne.s32.totalorder %s9183_s1, %s7669_s21  ;;  %s38_s18 = int_to_ptr.vmem [resolvable:$true] %s37_s18 }
   0x5   :  { %p7673_p1 = scmp.lt.u32.totalorder %s7669_s21, %s9183_s1 }
   0x7   :  { %p7675_p2 = pnand %p7673_p1, %p7670_p0 }
   0x9   :  { %7678 = shalt.err (!%p7675_p2)
}
   0xa   :  { %s7679_s26 = scalar_lea.vmem %s38_s18, 2048  ;;  %p7684_p4 = scmp.lt.s32.totalorder %s38_s18, %s38_s18 }
   0xb   :  { %p7680_p3 = scmp.ne.s32.totalorder %s38_s18, %s7679_s26  ;;  %p7685_p5 = scmp.lt.s32.totalorder %s7679_s26, %s7679_s26 }
   0xd   :  { %p7686_p6 = por %p7685_p5, %p7684_p4 }
   0xf   :  { %p7687_p7 = pnand %p7686_p6, %p7680_p3 }
  0x11   :  { %7690 = shalt.err (!%p7687_p7)
}
  0x12   :  { %s7810_s27 = smov 128   ;;  %s7811_s28 = smov 8  }
  0x13   :  { %43 = dma.hbm_to_vmem [thread:$0]  %s9183_s1, 2048, %s38_s18, [#allocation7], %s7810_s27, %s7810_s27, %s7811_s28  }
  0x14   :  { %s7812_s12 = smov [#allocation9]   ;;  %s7813_s14 = smov [#allocation3]  }
  0x15   :  { %s61_s13 = sshll.u32 %s7812_s12, 4  ;;  %s25_s15 = sshll.u32 %s7813_s14, 4  ;;  %s62_s13 = int_to_ptr.vmem [resolvable:$true] %s61_s13  ;;  %s26_s15 = int_to_ptr.vmem [resolvable:$true] %s25_s15 }
  0x16   :  { %s7691_s19 = scalar_lea.hbm %s9185_s3, 25600 }
  0x17   :  { %p7692_p8 = scmp.ne.s32.totalorder %s9185_s3, %s7691_s19  ;;  %p7695_p9 = scmp.lt.u32.totalorder %s7691_s19, %s9185_s3 }
  0x19   :  { %p7697_p10 = pnand %p7695_p9, %p7692_p8 }
  0x1b   :  { %7700 = shalt.err (!%p7697_p10)
}
  0x1c   :  { %s7701_s1 = scalar_lea.vmem %s62_s13, 25600  ;;  %p7706_p12 = scmp.lt.s32.totalorder %s62_s13, %s62_s13 }
  0x1d   :  { %p7702_p11 = scmp.ne.s32.totalorder %s62_s13, %s7701_s1  ;;  %p7707_p13 = scmp.lt.s32.totalorder %s7701_s1, %s7701_s1 }
  0x1f   :  { %p7708_p0 = por %p7707_p13, %p7706_p12 }
  0x21   :  { %p7709_p1 = pnand %p7708_p0, %p7702_p11 }
  0x23   :  { %7712 = shalt.err (!%p7709_p1)
}
  0x24   :  { %s7814_s18 = smov 64   ;;  %s7815_s24 = smov 4  }
  0x25   :  { %67 = dma.hbm_to_vmem [thread:$0]  %s9185_s3, 25600, %s62_s13, [#allocation10], %s7814_s18, %s7814_s18, %s7815_s24  }
  0x26   :  { %s7713_s12 = scalar_lea.hbm %s9182_s0, 512 }
  0x27   :  { %p7714_p2 = scmp.ne.s32.totalorder %s9182_s0, %s7713_s12  ;;  %p7717_p3 = scmp.lt.u32.totalorder %s7713_s12, %s9182_s0 }
  0x29   :  { %p7719_p4 = pnand %p7717_p3, %p7714_p2 }
  0x2b   :  { %7722 = shalt.err (!%p7719_p4)
}
  0x2c   :  { %s7723_s20 = scalar_lea.vmem %s26_s15, 512  ;;  %p7728_p6 = scmp.lt.s32.totalorder %s26_s15, %s26_s15 }
  0x2d   :  { %p7724_p5 = scmp.ne.s32.totalorder %s26_s15, %s7723_s20  ;;  %p7729_p7 = scmp.lt.s32.totalorder %s7723_s20, %s7723_s20 }
  0x2f   :  { %p7730_p8 = por %p7729_p7, %p7728_p6 }
  0x31   :  { %p7731_p9 = pnand %p7730_p8, %p7724_p5 }
  0x33   :  { %7734 = shalt.err (!%p7731_p9)
}
  0x34   :  { %31 = dma.hbm_to_vmem [thread:$0]  %s9182_s0, 512, %s26_s15, [#allocation4], %s7810_s27, %s7810_s27, %s7811_s28  }
  0x35   :  { %s7816_s21 = smov [#allocation8]   ;;  %s7817_s23 = smov [#allocation11]  }
  0x36   :  { %s49_s22 = sshll.u32 %s7816_s21, 4  ;;  %s73_s1 = sshll.u32 %s7817_s23, 4  ;;  %s50_s22 = int_to_ptr.vmem [resolvable:$true] %s49_s22  ;;  %s74_s1 = int_to_ptr.vmem [resolvable:$true] %s73_s1 }
  0x37   :  { %s7735_s29 = scalar_lea.hbm %s9184_s2, 9216 }
  0x38   :  { %p7736_p10 = scmp.ne.s32.totalorder %s9184_s2, %s7735_s29  ;;  %p7739_p11 = scmp.lt.u32.totalorder %s7735_s29, %s9184_s2 }
  0x3a   :  { %p7741_p12 = pnand %p7739_p11, %p7736_p10 }
  0x3c   :  { %7744 = shalt.err (!%p7741_p12)
}
  0x3d   :  { %s7745_s0 = scalar_lea.vmem %s50_s22, 9216  ;;  %p7750_p0 = scmp.lt.s32.totalorder %s50_s22, %s50_s22 }
  0x3e   :  { %p7746_p13 = scmp.ne.s32.totalorder %s50_s22, %s7745_s0  ;;  %p7751_p1 = scmp.lt.s32.totalorder %s7745_s0, %s7745_s0 }
  0x40   :  { %p7752_p2 = por %p7751_p1, %p7750_p0 }
  0x42   :  { %p7753_p3 = pnand %p7752_p2, %p7746_p13 }
  0x44   :  { %7756 = shalt.err (!%p7753_p3)
}
  0x45   :  { %55 = dma.hbm_to_vmem [thread:$0]  %s9184_s2, 9216, %s50_s22, [#allocation7], %s7814_s18, %s7814_s18, %s7815_s24  }
  0x46   :  { %s7757_s3 = scalar_lea.hbm %s9186_s4, 1024 }
  0x47   :  { %p7758_p4 = scmp.ne.s32.totalorder %s9186_s4, %s7757_s3  ;;  %p7761_p5 = scmp.lt.u32.totalorder %s7757_s3, %s9186_s4 }
  0x49   :  { %p7763_p6 = pnand %p7761_p5, %p7758_p4 }
  0x4b   :  { %7766 = shalt.err (!%p7763_p6)
}
  0x4c   :  { %s7767_s26 = scalar_lea.vmem %s74_s1, 1024  ;;  %p7772_p8 = scmp.lt.s32.totalorder %s74_s1, %s74_s1 }
  0x4d   :  { %p7768_p7 = scmp.ne.s32.totalorder %s74_s1, %s7767_s26  ;;  %p7773_p9 = scmp.lt.s32.totalorder %s7767_s26, %s7767_s26 }
  0x4f   :  { %p7774_p10 = por %p7773_p9, %p7772_p8 }
  0x51   :  { %p7775_p11 = pnand %p7774_p10, %p7768_p7 }
  0x53   :  { %7778 = shalt.err (!%p7775_p11)
}
  0x54   :  { %79 = dma.hbm_to_vmem [thread:$0]  %s9186_s4, 1024, %s74_s1, [#allocation10], %s7814_s18, %s7814_s18, %s7815_s24  }
  0x55   :  { %7801 = dma.done.wait [#allocation4], 512  }
  0x56   :  { %7802 = vsyncadd [#allocation4], 4294966784 }
  0x57   :  { %7803 = dma.done.wait [#allocation7], 11264  }
  0x58   :  { %7804 = vsyncadd [#allocation7], 4294956032 }
  0x59   :  { %7805 = dma.done.wait [#allocation10], 26624  }
  0x5a   :  { %7806 = vsyncadd [#allocation10], 4294940672  ;;  %v7818_v0 = vmov 0.0   ;;  %v7980_v1 = vld [vmem:[#allocation3] sm:$0xff]  ;;  %vm164_vm0 = vcmask 1040384   ;;  %v7985_v3 = vld [vmem:[#allocation3 + $0x8] sm:$0xff] }
  0x5b   :  { %111 = vst [vmem:[#allocation2 + $0x18] sm:$0xff] %v7818_v0  ;;  %108 = vst [vmem:[#allocation2] sm:$0xff] %v7818_v0  ;;  %v7983_v2 = vrot.slane %v7818_v0, 7  ;;  %v7987_v4 = vld [vmem:[#allocation3 + $0x10] sm:$0xff]  ;;  %v6862_v5 = vpack.i.bf16 %v7980_v1, %v7818_v0  ;;  %v169_v8 = vrot.slane %v7980_v1, 7  ;;  %v7994_v9 = vld [vmem:[#allocation3 + $0x18] sm:$0xff]  ;;  %v6867_v14 = vpack.i.bf16 %v7985_v3, %v7818_v0 }
  0x5c   :  { %109 = vst [vmem:[#allocation2 + $0x8] sm:$0xff] %v7818_v0  ;;  %110 = vst [vmem:[#allocation2 + $0x10] sm:$0xff] %v7818_v0  ;;  %v7372_v16 = vld [vmem:[#allocation8 + $0x40] sm:$0xff]   ;;  %v7374_v25 = vld [vmem:[#allocation8 + $0x48] sm:$0xff]   ;;  %v179_v28 = vrot.slane %v7987_v4, 7  ;;  %vm237_vm1 = vcmask 1046528  }
  0x5d   :  { %113 = vst [vmem:[#allocation2 + $0x28] sm:$0xff] %v7818_v0  ;;  %114 = vst [vmem:[#allocation2 + $0x30] sm:$0xff] %v7818_v0  ;;  %6863 = vrot.lane.b32.xlu1 %v6862_v5, %s7811_s28  ;;  %v7373_v20 = vld [vmem:[#allocation8] sm:$0xff]   ;;  %5842 = vmatprep.subr.bf16.mxu0 %v7372_v16  ;;  %v7375_v27 = vld [vmem:[#allocation8 + $0x8] sm:$0xff]   ;;  %v8017_v41 = vrot.slane %v7985_v3, 1  ;;  %v8045_v61 = vrot.slane %v7994_v9, 1 }
  0x5e   :  { %116 = vst [vmem:[#allocation2 + $0x40] sm:$0xff] %v7818_v0  ;;  %117 = vst [vmem:[#allocation2 + $0x48] sm:$0xff] %v7818_v0  ;;  %5843 = vmatpush3.bf16.msra.mxu0 %v7373_v20  ;;  %v7376_v43 = vld [vmem:[#allocation8 + $0x50] sm:$0xff]   ;;  %s7819_s4 = smov 120   ;;  %vm322_vm2 = vcmask 64512   ;;  %vm347_vm3 = vcmask 982016  }
  0x5f   :  { %118 = vst [vmem:[#allocation2 + $0x50] sm:$0xff] %v7818_v0  ;;  %119 = vst [vmem:[#allocation2 + $0x58] sm:$0xff] %v7818_v0  ;;  %5844 = vmatprep.subr.bf16.mxu0 %v7374_v25  ;;  %vm7821_vm4 = vmmov 0   ;;  %vm1542_vm5 = vcmask 1041408   ;;  %vm1757_vm6 = vcmask 1045504   ;;  %vm1834_vm7 = vcmask 130048  }
  0x60   :  { %120 = vst [vmem:[#allocation2 + $0x60] sm:$0xff] %v7818_v0  ;;  %121 = vst [vmem:[#allocation2 + $0x68] sm:$0xff] %v7818_v0  ;;  %vm1907_vm8 = vcmask 916480  }
  0x61   :  { %122 = vst [vmem:[#allocation2 + $0x70] sm:$0xff] %v7818_v0  ;;  %123 = vst [vmem:[#allocation2 + $0x78] sm:$0xff] %v7818_v0  ;;  %6868 = vrot.lane.b32.xlu1 %v6867_v14, %s7811_s28 }
  0x62   :  { %125 = vst [vmem:[#allocation2 + $0x88] sm:$0xff] %v7818_v0  ;;  %126 = vst [vmem:[#allocation2 + $0x90] sm:$0xff] %v7818_v0  ;;  %v140_v6 = vld [vmem:[#allocation2] sm:$0x80]  ;;  %5845 = vmatpush3.bf16.msra.mxu0 %v7375_v27  ;;  %v217_v25 = vld [vmem:[#allocation2 + $0x18] sm:$0xfe]  ;;  %v6902_v27 = vpack.i.bf16 %v7987_v4, %v7818_v0 }
  0x63   :  { %128 = vst [vmem:[#allocation2 + $0xa0] sm:$0xff] %v7818_v0  ;;  %129 = vst [vmem:[#allocation2 + $0xa8] sm:$0xff] %v7818_v0  ;;  %v141_v7 = vld [vmem:[#allocation2 + $0x8] sm:$0x80]  ;;  %v165_v10 = vrot.slane %v140_v6, 7  ;;  %5846 = vmatprep.subr.bf16.mxu0 %v7376_v43  ;;  %v7387_v43 = vld [vmem:[#allocation8 + $0x90] sm:$0xff]  }
  0x64   :  { %130 = vst [vmem:[#allocation2 + $0xb0] sm:$0xff] %v7818_v0  ;;  %131 = vst [vmem:[#allocation2 + $0xb8] sm:$0xff] %v7818_v0  ;;  %v168_v11 = vrot.slane %v141_v7, 7  ;;  %v144_v12 = vld [vmem:[#allocation2 + $0x30] sm:$0x7f]  ;;  %v7377_v7 = vld [vmem:[#allocation8 + $0xc0] sm:$0xff]  }
  0x65   :  { %136 = vst [vmem:[#allocation2 + $0x20] sm:$0xff] %v7980_v1  ;;  %137 = vst [vmem:[#allocation2 + $0x38] sm:$0xff] %v7985_v3  ;;  %v167_v17 = vsel %vm164_vm0, %v165_v10, %v7983_v2  ;;  %v171_v22 = vrot.slane %v144_v12, 7  ;;  %v191_v24 = vld [vmem:[#allocation2 + $0x40] sm:$0x7f]  ;;  %v7378_v12 = vld [vmem:[#allocation8 + $0x10] sm:$0xff]   ;;  %5870 = vmatprep.subr.bf16.mxu1 %v7377_v7 }
  0x66   :  { %138 = vst [vmem:[#allocation2 + $0x80] sm:$0xff] %v7987_v4  ;;  %139 = vst [vmem:[#allocation2 + $0x98] sm:$0xff] %v7994_v9  ;;  %v8004_v18 = vsel %vm164_vm0, %v168_v11, %v169_v8  ;;  %v189_v30 = vld [vmem:[#allocation2 + $0x10] sm:$0x80]  ;;  %v220_v31 = vld [vmem:[#allocation2 + $0x50] sm:$0x1]  ;;  %5847 = vmatpush3.bf16.msra.mxu0 %v7378_v12 }
  0x67   :  { %v146_v15 = vld [vmem:[#allocation2 + $0x60] sm:$0x80]  ;;  %v147_v19 = vld [vmem:[#allocation2 + $0x68] sm:$0x80]  ;;  %v6852_v21 = vpack.i.bf16 %v8004_v18, %v167_v17  ;;  %v204_v33 = vrot.slane %v191_v24, 7  ;;  %v172_v35 = vsel %vm164_vm0, %v7983_v2, %v171_v22  ;;  %v246_v42 = vrot.slane %v220_v31, 1 }
  0x68   :  { %v175_v26 = vrot.slane %v146_v15, 7  ;;  %v178_v29 = vrot.slane %v147_v19, 7  ;;  %v201_v46 = vrot.slane %v189_v30, 7  ;;  %v192_v62 = vld [vmem:[#allocation2 + $0x70] sm:$0x80]  ;;  %v7379_v15 = vld [vmem:[#allocation8 + $0x80] sm:$0xff]   ;;  %v6907_v22 = vpack.i.bf16 %v7994_v9, %v7818_v0 }
  0x69   :  { %v150_v13 = vld [vmem:[#allocation2 + $0x90] sm:$0x7f]  ;;  %6853 = vrot.lane.b32.xlu0 %v6852_v21, %s7811_s28  ;;  %v205_v50 = vsel %vm164_vm0, %v7983_v2, %v204_v33  ;;  %v8033_v54 = vsel %vm237_vm1, %v8017_v41, %v246_v42  ;;  %v206_v16 = vrot.slane %v192_v62, 7  ;;  %v7380_v17 = vld [vmem:[#allocation8 + $0x58] sm:$0xff]   ;;  %v6892_v21 = vpack.i.bf16 %v7818_v0, %v7980_v1  ;;  %5871 = vmatpush3.bf16.msra.mxu1 %v7379_v15  ;;  %v263_v42 = vld [vmem:[#allocation2 + $0x28] sm:$0xfe] }
  0x6a   :  { %v181_v23 = vrot.slane %v150_v13, 7  ;;  %v177_v40 = vsel %vm164_vm0, %v175_v26, %v7983_v2  ;;  %v8021_v45 = vsel %vm164_vm0, %v178_v29, %v179_v28  ;;  %v203_v58 = vsel %vm164_vm0, %v201_v46, %v7983_v2  ;;  %v194_v59 = vld [vmem:[#allocation2 + $0xa0] sm:$0x7f]  ;;  %5848 = vmatprep.subr.bf16.mxu0 %v7380_v17  ;;  %v7382_v26 = vld [vmem:[#allocation8 + $0x18] sm:$0xff]   ;;  %v7383_v29 = vld [vmem:[#allocation8 + $0x88] sm:$0xff]  }
  0x6b   :  { %v224_v52 = vld [vmem:[#allocation2 + $0xb0] sm:$0x1]  ;;  %v6872_v53 = vpack.i.bf16 %v8021_v45, %v177_v40  ;;  %v6882_v6 = vpack.i.bf16 %v203_v58, %v8004_v18  ;;  %v209_v13 = vrot.slane %v194_v59, 7  ;;  %v8077_v30 = vrot.slane %v7818_v0, 1  ;;  %v267_v33 = vld [vmem:[#allocation2 + $0x58] sm:$0x1]  ;;  %5849 = vmatpush3.bf16.msra.mxu0 %v7382_v26 }
  0x6c   :  { %v145_v32 = vld [vmem:[#allocation2 + $0x38] sm:$0x7f]  ;;  %v218_v34 = vld [vmem:[#allocation2 + $0x20] sm:$0xfe]  ;;  %v182_v38 = vsel %vm164_vm0, %v7983_v2, %v181_v23  ;;  %v256_v63 = vrot.slane %v224_v52, 1  ;;  %v238_v40 = vrot.slane %v217_v25, 1 }
  0x6d   :  { %v173_v36 = vrot.slane %v145_v32, 7  ;;  %v151_v37 = vld [vmem:[#allocation2 + $0x98] sm:$0x7f]  ;;  %v241_v47 = vrot.slane %v218_v34, 1  ;;  %v222_v56 = vld [vmem:[#allocation2 + $0x80] sm:$0xfe]  ;;  %v210_v24 = vsel %vm164_vm0, %v7983_v2, %v209_v13  ;;  %v208_v32 = vsel %vm164_vm0, %v206_v16, %v7983_v2 }
  0x6e   :  { %v183_v39 = vrot.slane %v151_v37, 7  ;;  %v251_v5 = vrot.slane %v222_v56, 1  ;;  %v8054_v10 = vsel %vm237_vm1, %v8045_v61, %v256_v63  ;;  %v219_v23 = vld [vmem:[#allocation2 + $0x48] sm:$0x1]  ;;  %v7384_v34 = vld [vmem:[#allocation8 + $0x60] sm:$0xff]   ;;  %v6927_v2 = vpack.i.bf16 %v7818_v0, %v7994_v9  ;;  %v7391_v59 = vld [vmem:[#allocation8 + $0x98] sm:$0xff]  }
  0x6f   :  { %v174_v44 = vsel %vm164_vm0, %v169_v8, %v173_v36  ;;  %v8037_v55 = vsel %vm237_vm1, %v241_v47, %v8017_v41  ;;  %v6897_v8 = vpack.i.bf16 %v7818_v0, %v7985_v3  ;;  %v7385_v36 = vld [vmem:[#allocation8 + $0xd0] sm:$0xff]   ;;  %v262_v37 = vld [vmem:[#allocation2 + $0x20] sm:$0xfe]  ;;  %5850 = vmatprep.subr.bf16.mxu0 %v7384_v34  ;;  %v223_v46 = vld [vmem:[#allocation2 + $0xa8] sm:$0x1]  ;;  %v6922_v56 = vpack.i.bf16 %v7818_v0, %v7987_v4 }
  0x70   :  { %v6857_v48 = vpack.i.bf16 %v174_v44, %v172_v35  ;;  %v8024_v49 = vsel %vm164_vm0, %v179_v28, %v183_v39  ;;  %v6887_v57 = vpack.i.bf16 %v205_v50, %v174_v44  ;;  %v461_v60 = vpack.c.bf16 %v8033_v54, %v8037_v55  ;;  %v266_v28 = vld [vmem:[#allocation2 + $0x50] sm:$0x1]  ;;  %v7388_v47 = vld [vmem:[#allocation8 + $0x68] sm:$0xff]   ;;  %v221_v52 = vld [vmem:[#allocation2 + $0x78] sm:$0xfe] }
  0x71   :  { %v6877_v51 = vpack.i.bf16 %v8024_v49, %v182_v38  ;;  %v8058_v11 = vsel %vm237_vm1, %v251_v5, %v8045_v61  ;;  %v455_v19 = vpack.c.bf16 %v174_v44, %v8004_v18  ;;  %v464_v20 = vpack.c.bf16 %v8024_v49, %v8021_v45  ;;  %v7381_v18 = vld [vmem:[#allocation8 + $0xc8] sm:$0xff]   ;;  %v7386_v38 = vld [vmem:[#allocation8 + $0x20] sm:$0xff]   ;;  %v272_v58 = vld [vmem:[#allocation2 + $0xb0] sm:$0x1] }
  0x72   :  { %6858 = vrot.lane.b32.xlu0 %v6857_v48, %s7811_s28  ;;  %v470_v14 = vpack.c.bf16 %v8054_v10, %v8058_v11  ;;  %5872 = vmatprep.subr.bf16.mxu1 %v7381_v18  ;;  %v6917_v31 = vpack.i.bf16 %v210_v24, %v8024_v49  ;;  %v244_v35 = vrot.slane %v219_v23, 1  ;;  %v6912_v39 = vpack.i.bf16 %v208_v32, %v8021_v45  ;;  %v7392_v7 = vld [vmem:[#allocation8 + $0x70] sm:$0xff]   ;;  %v7393_v15 = vld [vmem:[#allocation8 + $0xe0] sm:$0xff]   ;;  %v7398_v32 = vld [vmem:[#allocation8 + $0x38] sm:$0xff]  }
  0x73   :  { %6878 = vrot.lane.b32.xlu1 %v6877_v51, %s7811_s28  ;;  %1080 = vmatprep.mubr.bf16.mxu0 %v455_v19  ;;  %v292_v44 = vrot.slane %v266_v28, 1  ;;  %v294_v50 = vrot.slane %v267_v33, 1  ;;  %v7389_v51 = vld [vmem:[#allocation8 + $0xd8] sm:$0xff]   ;;  %v240_v63 = vsel %vm237_vm1, %v238_v40, %v8077_v30  ;;  %v289_v5 = vrot.slane %v263_v42, 1  ;;  %v268_v16 = vld [vmem:[#allocation2 + $0x80] sm:$0xfe] }
  0x74   :  { %5873 = vmatpush3.bf16.msra.mxu1 %v7383_v29  ;;  %5851 = vmatpush3.bf16.msra.mxu0 %v7386_v38  ;;  %v245_v48 = vsel %vm237_vm1, %v8077_v30, %v244_v35  ;;  %v254_v13 = vrot.slane %v223_v46, 1  ;;  %v7394_v17 = vld [vmem:[#allocation8 + $0x30] sm:$0xff]   ;;  %v6932_v19 = vpack.i.bf16 %v8037_v55, %v240_v63  ;;  %v7395_v23 = vld [vmem:[#allocation8 + $0xa0] sm:$0xff]   ;;  %v302_v26 = vrot.slane %v272_v58, 1 }
  0x75   :  { %5874 = vmatprep.subr.bf16.mxu1 %v7385_v36  ;;  %5852 = vmatprep.subr.bf16.mxu0 %v7388_v47  ;;  %v6937_v62 = vpack.i.bf16 %v8033_v54, %v245_v48  ;;  %v293_v0 = vsel %vm237_vm1, %v8017_v41, %v292_v44  ;;  %v295_v12 = vsel %vm237_vm1, %v8077_v30, %v294_v50  ;;  %v296_v34 = vrot.slane %v268_v16, 1  ;;  %v7400_v38 = vld [vmem:[#allocation8 + $0xf0] sm:$0xff]   ;;  %v7404_v50 = vld [vmem:[#allocation8 + $0xf8] sm:$0xff]  }
  0x76   :  { %6873 = vrot.lane.b32.xlu0 %v6872_v53, %s7811_s28  ;;  %v7390_v53 = vld [vmem:[#allocation8 + $0x28] sm:$0xff]   ;;  %v6947_v24 = vpack.i.bf16 %v295_v12, %v293_v0  ;;  %v291_v25 = vsel %vm237_vm1, %v289_v5, %v8077_v30  ;;  %v255_v28 = vsel %vm237_vm1, %v8077_v30, %v254_v13  ;;  %v303_v40 = vsel %vm237_vm1, %v8045_v61, %v302_v26 }
  0x77   :  { %6888 = vrot.lane.b32.xlu1 %v6887_v57, %s7819_s4  ;;  %v286_v57 = vrot.slane %v262_v37, 1  ;;  %v6957_v35 = vpack.i.bf16 %v8054_v10, %v255_v28  ;;  %v298_v47 = vsel %vm237_vm1, %v296_v34, %v8045_v61 }
  0x78   :  { %5875 = vmatpush3.bf16.msra.mxu1 %v7387_v43  ;;  %5853 = vmatpush3.bf16.msra.mxu0 %v7390_v53  ;;  %v7401_v43 = vld [vmem:[#allocation8 + $0x140] sm:$0xff]  }
  0x79   :  { %5876 = vmatprep.subr.bf16.mxu1 %v7389_v51  ;;  %5854 = vmatprep.subr.bf16.mxu0 %v7392_v7  ;;  %v288_v18 = vsel %vm237_vm1, %v286_v57, %v8017_v41  ;;  %v7399_v41 = vld [vmem:[#allocation8 + $0xa8] sm:$0xff]   ;;  %v7406_v51 = vld [vmem:[#allocation8 + $0xb8] sm:$0xff]   ;;  %v7409_v53 = vld [vmem:[#allocation8 + $0x1c0] sm:$0xff]  }
  0x7a   :  { %6883 = vrot.lane.b32.xlu0 %v6882_v6, %s7819_s4  ;;  %v273_v6 = vld [vmem:[#allocation2 + $0xb8] sm:$0x1]  ;;  %v6942_v33 = vpack.i.bf16 %v291_v25, %v288_v18 }
  0x7b   :  { %6898 = vrot.lane.b32.xlu1 %v6897_v8, %s7819_s4  ;;  %v458_v8 = vpack.c.bf16 %v7985_v3, %v7980_v1  ;;  %v304_v29 = vrot.slane %v273_v6, 1 }
  0x7c   :  { %5877 = vmatpush3.bf16.msra.mxu1 %v7391_v59  ;;  %5855 = vmatpush3.bf16.msra.mxu0 %v7394_v17  ;;  %v7403_v17 = vld [vmem:[#allocation8 + $0x100] sm:$0xff]  }
  0x7d   :  { %5878 = vmatprep.subr.bf16.mxu1 %v7393_v15  ;;  %v305_v42 = vsel %vm237_vm1, %v8077_v30, %v304_v29  ;;  %v7407_v29 = vld [vmem:[#allocation8 + $0x108] sm:$0xff]  }
  0x7e   :  { %6893 = vrot.lane.b32.xlu0 %v6892_v21, %s7819_s4  ;;  %v248_v21 = vrot.slane %v221_v52, 1  ;;  %v6967_v46 = vpack.i.bf16 %v305_v42, %v303_v40  ;;  %v7410_v42 = vld [vmem:[#allocation8 + $0x110] sm:$0xff]  }
  0x7f   :  { %6908 = vrot.lane.b32.xlu1 %v6907_v22, %s7811_s28  ;;  %v269_v22 = vld [vmem:[#allocation2 + $0x88] sm:$0xfe] }
  0x80   :  { %5879 = vmatpush3.bf16.msra.mxu1 %v7395_v23  ;;  %v250_v36 = vsel %vm237_vm1, %v248_v21, %v8077_v30  ;;  %v299_v37 = vrot.slane %v269_v22, 1 }
  0x81   :  { %v6952_v44 = vpack.i.bf16 %v8058_v11, %v250_v36 }
  0x82   :  { %6903 = vrot.lane.b32.xlu0 %v6902_v27, %s7811_s28  ;;  %v7396_v27 = vld [vmem:[#allocation8 + $0x78] sm:$0xff]   ;;  %v301_v48 = vsel %vm237_vm1, %v299_v37, %v8077_v30 }
  0x83   :  { %6918 = vrot.lane.b32.xlu1 %v6917_v31, %s7819_s4  ;;  %v7397_v31 = vld [vmem:[#allocation8 + $0xe8] sm:$0xff]   ;;  %5856 = vmatprep.subr.bf16.mxu0 %v7396_v27  ;;  %v6962_v52 = vpack.i.bf16 %v301_v48, %v298_v47 }
  0x84   :  { %5880 = vmatprep.subr.bf16.mxu1 %v7397_v31  ;;  %5857 = vmatpush3.bf16.msra.mxu0 %v7398_v32  ;;  %v7413_v47 = vld [vmem:[#allocation8 + $0x1c8] sm:$0xff]  }
  0x85   :  { %5881 = vmatpush3.bf16.msra.mxu1 %v7399_v41  ;;  %5898 = vmatprep.subr.bf16.mxu0 %v7401_v43  ;;  %v7411_v43 = vld [vmem:[#allocation8 + $0x180] sm:$0xff]  }
  0x86   :  { %6913 = vrot.lane.b32.xlu0 %v6912_v39, %s7819_s4  ;;  %v467_v39 = vpack.c.bf16 %v7994_v9, %v7987_v4  ;;  %5882 = vmatprep.subr.bf16.mxu1 %v7400_v38  ;;  %v7442_v4 = vld [vmem:[#allocation8 + $0x230] sm:$0xff]  }
  0x87   :  { %6928 = vrot.lane.b32.xlu1 %v6927_v2, %s7819_s4  ;;  %v7402_v2 = vld [vmem:[#allocation8 + $0xb0] sm:$0xff]  }
  0x89   :  { %5883 = vmatpush3.bf16.msra.mxu1 %v7402_v2 }
  0x8a   :  { %6923 = vrot.lane.b32.xlu0 %v6922_v56, %s7819_s4  ;;  %5884 = vmatprep.subr.bf16.mxu1 %v7404_v50 }
  0x8b   :  { %6938 = vrot.lane.b32.xlu1 %v6937_v62, %s7811_s28 }
  0x8d   :  { %5885 = vmatpush3.bf16.msra.mxu1 %v7406_v51 }
  0x8e   :  { %6933 = vrot.lane.b32.xlu0 %v6932_v19, %s7811_s28  ;;  %5926 = vmatprep.subr.bf16.mxu1 %v7409_v53  ;;  %v7405_v19 = vld [vmem:[#allocation8 + $0x148] sm:$0xff]   ;;  %v7414_v53 = vld [vmem:[#allocation8 + $0x118] sm:$0xff]  }
  0x8f   :  { %6948 = vrot.lane.b32.xlu1 %v6947_v24, %s7819_s4 }
  0x92   :  { %6943 = vrot.lane.b32.xlu0 %v6942_v33, %s7819_s4  ;;  %v7408_v33 = vld [vmem:[#allocation8 + $0x150] sm:$0xff]  }
  0x93   :  { %6958 = vrot.lane.b32.xlu1 %v6957_v35, %s7811_s28 }
  0x96   :  { %6953 = vrot.lane.b32.xlu0 %v6952_v44, %s7811_s28 }
  0x97   :  { %6968 = vrot.lane.b32.xlu1 %v6967_v46, %s7819_s4  ;;  %v7412_v46 = vld [vmem:[#allocation8 + $0x158] sm:$0xff]  }
  0x9a   :  { %6963 = vrot.lane.b32.xlu0 %v6962_v52, %s7819_s4 }
  0xcf   :  { %v6864_v56 = vpop.permute.xlu1 %6863 }
  0xd0   :  { %v6866_v61 = vunpack.i.h.bf16 %v6864_v56  ;;  %v6865_v57 = vunpack.i.l.bf16 %v6864_v56  ;;  %v7415_v56 = vld [vmem:[#allocation8 + $0x188] sm:$0xff]  }
  0xd2   :  { %v372_v63 = vsel %vm322_vm2, %v6865_v57, %v6866_v61 }
  0xd3   :  { %v6869_v58 = vpop.permute.xlu1 %6868 }
  0xd4   :  { %v6871_v59 = vunpack.i.h.bf16 %v6869_v58  ;;  %v6870_v62 = vunpack.i.l.bf16 %v6869_v58 }
  0xd6   :  { %v373_v5 = vsel %vm322_vm2, %v6870_v62, %v6871_v59  ;;  %v7417_v59 = vld [vmem:[#allocation8 + $0x1d0] sm:$0xff]  }
  0xd7   :  { %v457_v6 = vpack.c.bf16 %v373_v5, %v372_v63 }
  0xd9   :  { %1129 = vmatprep.mubr.bf16.mxu1 %v457_v6 }
  0xdb   :  { %v6854_v30 = vpop.permute.xlu0 %6853 }
  0xdc   :  { %v6856_v7 = vunpack.i.h.bf16 %v6854_v30  ;;  %v6855_v0 = vunpack.i.l.bf16 %v6854_v30  ;;  %v7416_v30 = vld [vmem:[#allocation8 + $0x160] sm:$0xff]  }
  0xde   :  { %v323_v23 = vsel %vm322_vm2, %v6855_v0, %v6856_v7 }
  0xe4   :  { %v6859_v12 = vpop.permute.xlu0 %6858 }
  0xe5   :  { %v6861_v13 = vunpack.i.h.bf16 %v6859_v12  ;;  %v6860_v15 = vunpack.i.l.bf16 %v6859_v12  ;;  %v6879_v16 = vpop.permute.xlu1 %6878  ;;  %v7418_v12 = vld [vmem:[#allocation8 + $0x120] sm:$0xff]  }
  0xe6   :  { %v6881_v21 = vunpack.i.h.bf16 %v6879_v16  ;;  %v6880_v22 = vunpack.i.l.bf16 %v6879_v16 }
  0xe7   :  { %v324_v24 = vsel %vm322_vm2, %v6860_v15, %v6861_v13  ;;  %v7419_v13 = vld [vmem:[#allocation8 + $0x190] sm:$0xff]  }
  0xe8   :  { %v6874_v18 = vpop.permute.xlu0 %6873  ;;  %v454_v25 = vpack.c.bf16 %v324_v24, %v323_v23  ;;  %v326_v41 = vsel %vm322_vm2, %v6880_v22, %v6881_v21  ;;  %v7421_v21 = vld [vmem:[#allocation8 + $0x1d8] sm:$0xff]  }
  0xe9   :  { %v6876_v26 = vunpack.i.h.bf16 %v6874_v18  ;;  %v6875_v27 = vunpack.i.l.bf16 %v6874_v18  ;;  %v6889_v28 = vpop.permute.xlu1 %6888 }
  0xea   :  { %1081 = vmatmul.mubr.bf16.vlgmr.msra.gmra.mrb[0].mxu0 %v454_v25  ;;  %v6891_v31 = vunpack.i.h.bf16 %v6889_v28  ;;  %v6890_v32 = vunpack.i.l.bf16 %v6889_v28  ;;  %v7423_v28 = vld [vmem:[#allocation8 + $0x198] sm:$0xff]  }
  0xeb   :  { %5899 = vmatpush3.bf16.msra.mxu0 %v7403_v17  ;;  %1088 = vmatprep.mubr.bf16.mxu0 %v464_v20  ;;  %v325_v34 = vsel %vm322_vm2, %v6875_v27, %v6876_v26  ;;  %v7422_v27 = vld [vmem:[#allocation8 + $0x128] sm:$0xff]  }
  0xec   :  { %v6884_v35 = vpop.permute.xlu0 %6883  ;;  %5900 = vmatprep.subr.bf16.mxu0 %v7405_v19  ;;  %v349_v40 = vsel %vm347_vm3, %v6890_v32, %v6891_v31  ;;  %v463_v48 = vpack.c.bf16 %v326_v41, %v325_v34  ;;  %v7420_v19 = vld [vmem:[#allocation8 + $0x168] sm:$0xff]   ;;  %v7425_v31 = vld [vmem:[#allocation8 + $0x1e0] sm:$0xff]  }
  0xed   :  { %v6886_v36 = vunpack.i.h.bf16 %v6884_v35  ;;  %v6885_v37 = vunpack.i.l.bf16 %v6884_v35  ;;  %v6899_v38 = vpop.permute.xlu1 %6898  ;;  %v7426_v35 = vld [vmem:[#allocation8 + $0x130] sm:$0xff]  }
  0xee   :  { %v6901_v2 = vunpack.i.h.bf16 %v6899_v38  ;;  %v6900_v44 = vunpack.i.l.bf16 %v6899_v38  ;;  %v7429_v38 = vld [vmem:[#allocation8 + $0x1e8] sm:$0xff]  }
  0xef   :  { %5901 = vmatpush3.bf16.msra.mxu0 %v7407_v29  ;;  %v348_v45 = vsel %vm347_vm3, %v6885_v37, %v6886_v36  ;;  %v7424_v29 = vld [vmem:[#allocation8 + $0x170] sm:$0xff]   ;;  %v7427_v36 = vld [vmem:[#allocation8 + $0x1a0] sm:$0xff]   ;;  %v7428_v37 = vld [vmem:[#allocation8 + $0x178] sm:$0xff]  }
  0xf0   :  { %v6894_v49 = vpop.permute.xlu0 %6893  ;;  %5902 = vmatprep.subr.bf16.mxu0 %v7408_v33  ;;  %v456_v20 = vpack.c.bf16 %v349_v40, %v348_v45  ;;  %v399_v61 = vsel %vm347_vm3, %v6900_v44, %v6901_v2  ;;  %v7431_v2 = vld [vmem:[#allocation8 + $0x1a8] sm:$0xff]   ;;  %v7432_v45 = vld [vmem:[#allocation8 + $0x1f0] sm:$0xff]  }
  0xf1   :  { %v6896_v50 = vunpack.i.h.bf16 %v6894_v49  ;;  %v6895_v51 = vunpack.i.l.bf16 %v6894_v49  ;;  %v6909_v52 = vpop.permute.xlu1 %6908  ;;  %v7433_v49 = vld [vmem:[#allocation8 + $0x200] sm:$0xff]  }
  0xf2   :  { %1130 = vmatmul.mubr.bf16.vlgmr.msra.gmra.mrb[0].mxu1 %v456_v20  ;;  %v6911_v57 = vunpack.i.h.bf16 %v6909_v52  ;;  %v6910_v58 = vunpack.i.l.bf16 %v6909_v52  ;;  %1089 = vmatmul.mubr.bf16.gmra.mrb[4].mxu0 %v463_v48  ;;  %v7434_v20 = vld [vmem:[#allocation8 + $0x1b0] sm:$0xff]   ;;  %v7435_v52 = vld [vmem:[#allocation8 + $0x1f8] sm:$0xff]  }
  0xf3   :  { %5903 = vmatpush3.bf16.msra.mxu0 %v7410_v42  ;;  %5927 = vmatpush3.bf16.msra.mxu1 %v7411_v43  ;;  %v398_v62 = vsel %vm347_vm3, %v6895_v51, %v6896_v50  ;;  %v7430_v43 = vld [vmem:[#allocation8 + $0x138] sm:$0xff]  }
  0xf4   :  { %v6904_v63 = vpop.permute.xlu0 %6903  ;;  %5904 = vmatprep.subr.bf16.mxu0 %v7412_v46  ;;  %5928 = vmatprep.subr.bf16.mxu1 %v7413_v47  ;;  %v459_v5 = vpack.c.bf16 %v399_v61, %v398_v62  ;;  %v375_v15 = vsel %vm322_vm2, %v6910_v58, %v6911_v57 }
  0xf5   :  { %v6906_v6 = vunpack.i.h.bf16 %v6904_v63  ;;  %v6905_v7 = vunpack.i.l.bf16 %v6904_v63  ;;  %v6919_v0 = vpop.permute.xlu1 %6918 }
  0xf6   :  { %v6921_v16 = vunpack.i.h.bf16 %v6919_v0  ;;  %v6920_v17 = vunpack.i.l.bf16 %v6919_v0  ;;  %1178 = vmatprep.mubr.bf16.mxu0 %v459_v5 }
  0xf7   :  { %5905 = vmatpush3.bf16.msra.mxu0 %v7414_v53  ;;  %5929 = vmatpush3.bf16.msra.mxu1 %v7415_v56  ;;  %v374_v22 = vsel %vm322_vm2, %v6905_v7, %v6906_v6  ;;  %v7436_v53 = vld [vmem:[#allocation8 + $0x208] sm:$0xff]   ;;  %v7438_v6 = vld [vmem:[#allocation8 + $0x210] sm:$0xff]  }
  0xf8   :  { %v6914_v23 = vpop.permute.xlu0 %6913  ;;  %5906 = vmatprep.subr.bf16.mxu0 %v7416_v30  ;;  %5930 = vmatprep.subr.bf16.mxu1 %v7417_v59  ;;  %v466_v24 = vpack.c.bf16 %v375_v15, %v374_v22  ;;  %v351_v26 = vsel %vm347_vm3, %v6920_v17, %v6921_v16  ;;  %v7437_v30 = vld [vmem:[#allocation8 + $0x1b8] sm:$0xff]  }
  0xf9   :  { %v6916_v18 = vunpack.i.h.bf16 %v6914_v23  ;;  %v6915_v25 = vunpack.i.l.bf16 %v6914_v23  ;;  %v6929_v32 = vpop.permute.xlu1 %6928  ;;  %v7440_v23 = vld [vmem:[#allocation8 + $0x220] sm:$0xff]  }
  0xfa   :  { %1137 = vmatprep.mubr.bf16.mxu1 %v466_v24  ;;  %v6931_v44 = vunpack.i.h.bf16 %v6929_v32  ;;  %v6930_v46 = vunpack.i.l.bf16 %v6929_v32 }
  0xfb   :  { %5907 = vmatpush3.bf16.msra.mxu0 %v7418_v12  ;;  %5931 = vmatpush3.bf16.msra.mxu1 %v7419_v13  ;;  %v350_v33 = vsel %vm347_vm3, %v6915_v25, %v6916_v18 }
  0xfc   :  { %5908 = vmatprep.subr.bf16.mxu0 %v7420_v19  ;;  %5932 = vmatprep.subr.bf16.mxu1 %v7421_v21  ;;  %v465_v34 = vpack.c.bf16 %v351_v26, %v350_v33  ;;  %v6924_v41 = vpop.permute.xlu0 %6923  ;;  %v401_v51 = vsel %vm347_vm3, %v6930_v46, %v6931_v44  ;;  %v7439_v19 = vld [vmem:[#allocation8 + $0x218] sm:$0xff]   ;;  %v7441_v26 = vld [vmem:[#allocation8 + $0x228] sm:$0xff]   ;;  %v1302_v33 = vld [vmem:[#allocation6] sm:$0xff] }
  0xfd   :  { %v6939_v40 = vpop.permute.xlu1 %6938  ;;  %v6926_v47 = vunpack.i.h.bf16 %v6924_v41  ;;  %v6925_v48 = vunpack.i.l.bf16 %v6924_v41  ;;  %v1304_v41 = vld [vmem:[#allocation6 + $0x10] sm:$0xff]  ;;  %v1309_v44 = vld [vmem:[#allocation6 + $0x38] sm:$0xff] }
  0xfe   :  { %1138 = vmatmul.mubr.bf16.gmra.mrb[4].mxu1 %v465_v34  ;;  %v6941_v57 = vunpack.i.h.bf16 %v6939_v40  ;;  %v6940_v54 = vunpack.i.l.bf16 %v6939_v40  ;;  %v1303_v34 = vld [vmem:[#allocation6 + $0x8] sm:$0xff]  ;;  %v1306_v40 = vld [vmem:[#allocation6 + $0x20] sm:$0xff] }
  0xff   :  { %5909 = vmatpush3.bf16.msra.mxu0 %v7422_v27  ;;  %5933 = vmatpush3.bf16.msra.mxu1 %v7423_v28  ;;  %v400_v50 = vsel %vm347_vm3, %v6925_v48, %v6926_v47  ;;  %v7443_v27 = vld [vmem:[#allocation8 + $0x238] sm:$0xff]   ;;  %v1310_v47 = vld [vmem:[#allocation6 + $0x40] sm:$0xff]  ;;  %v1311_v48 = vld [vmem:[#allocation6 + $0x48] sm:$0xff] }
 0x100   :  { %5910 = vmatprep.subr.bf16.mxu0 %v7424_v29  ;;  %5934 = vmatprep.subr.bf16.mxu1 %v7425_v31  ;;  %v6934_v42 = vpop.permute.xlu0 %6933  ;;  %v468_v58 = vpack.c.bf16 %v401_v51, %v400_v50  ;;  %v423_v7 = vsel %vm322_vm2, %v6940_v54, %v6941_v57  ;;  %v1314_v51 = vld [vmem:[#allocation6 + $0x60] sm:$0xff]  ;;  %v8188_v54 = vld [vmem:[#allocation2 + $0x18] sm:$0xff] }
 0x101   :  { %1227 = vmatprep.mubr.bf16.mxu1 %v461_v60  ;;  %v6949_v56 = vpop.permute.xlu1 %6948  ;;  %v6936_v55 = vunpack.i.h.bf16 %v6934_v42  ;;  %v6935_v60 = vunpack.i.l.bf16 %v6934_v42  ;;  %v1307_v42 = vld [vmem:[#allocation6 + $0x28] sm:$0xff] }
 0x102   :  { %v6951_v59 = vunpack.i.h.bf16 %v6949_v56  ;;  %v6950_v62 = vunpack.i.l.bf16 %v6949_v56  ;;  %v1316_v56 = vld [vmem:[#allocation6 + $0x70] sm:$0xff] }
 0x103   :  { %5911 = vmatpush3.bf16.msra.mxu0 %v7426_v35  ;;  %5935 = vmatpush3.bf16.msra.mxu1 %v7427_v36  ;;  %v422_v0 = vsel %vm322_vm2, %v6935_v60, %v6936_v55  ;;  %v7820_v35 = vmov 0.0|0.0   ;;  %v6693_v36 = vpack.c.bf16 %v1303_v34, %v1302_v33 }
 0x104   :  { %5912 = vmatprep.subr.bf16.mxu0 %v7428_v37  ;;  %5936 = vmatprep.subr.bf16.mxu1 %v7429_v38  ;;  %v6944_v61 = vpop.permute.xlu0 %6943  ;;  %v447_v16 = vsel %vm347_vm3, %v6950_v62, %v6951_v59  ;;  %v460_v17 = vpack.c.bf16 %v423_v7, %v422_v0  ;;  %v1305_v37 = vld [vmem:[#allocation6 + $0x18] sm:$0xff] }
 0x105   :  { %v6946_v63 = vunpack.i.h.bf16 %v6944_v61  ;;  %v6945_v5 = vunpack.i.l.bf16 %v6944_v61  ;;  %v6959_v12 = vpop.permute.xlu1 %6958  ;;  %v6696_v38 = vpack.c.bf16 %v1305_v37, %v1304_v41  ;;  %v1317_v61 = vld [vmem:[#allocation6 + $0x78] sm:$0xff] }
 0x106   :  { %v6961_v1 = vunpack.i.h.bf16 %v6959_v12  ;;  %v6960_v3 = vunpack.i.l.bf16 %v6959_v12  ;;  %v6714_v57 = vpack.c.bf16 %v1317_v61, %v1316_v56 }
 0x107   :  { %5913 = vmatpush3.bf16.msra.mxu0 %v7430_v43  ;;  %5937 = vmatpush3.bf16.msra.mxu1 %v7431_v2  ;;  %v446_v15 = vsel %vm347_vm3, %v6945_v5, %v6946_v63  ;;  %v6699_v43 = vpack.c.bf16 %v1307_v42, %v1306_v40  ;;  %v1308_v2 = vld [vmem:[#allocation6 + $0x30] sm:$0xff] }
 0x108   :  { %5938 = vmatprep.subr.bf16.mxu1 %v7432_v45  ;;  %6422 = vmatprep.subr.bf16.mxu0 %v7433_v49  ;;  %v6954_v13 = vpop.permute.xlu0 %6953  ;;  %v462_v22 = vpack.c.bf16 %v447_v16, %v446_v15  ;;  %v425_v18 = vsel %vm322_vm2, %v6960_v3, %v6961_v1  ;;  %v6702_v46 = vpack.c.bf16 %v1309_v44, %v1308_v2 }
 0x109   :  { %v6955_v21 = vunpack.i.l.bf16 %v6954_v13  ;;  %v6969_v9 = vpop.permute.xlu1 %6968  ;;  %v6705_v45 = vpack.c.bf16 %v1311_v48, %v1310_v47 }
 0x10a   :  { %1179 = vmatmul.mubr.bf16.vlgmr.msra.gmra.mrb[8].mxu0 %v458_v8  ;;  %v6956_v8 = vunpack.i.h.bf16 %v6954_v13  ;;  %v6971_v10 = vunpack.i.h.bf16 %v6969_v9  ;;  %v6970_v11 = vunpack.i.l.bf16 %v6969_v9 }
 0x10b   :  { %5939 = vmatpush3.bf16.msra.mxu1 %v7434_v20  ;;  %6423 = vmatpush3.bf16.msra.mxu0 %v7433_v49  ;;  %v1312_v49 = vld [vmem:[#allocation6 + $0x50] sm:$0xff]  ;;  %v1313_v20 = vld [vmem:[#allocation6 + $0x58] sm:$0xff] }
 0x10c   :  { %5940 = vmatprep.subr.bf16.mxu1 %v7435_v52  ;;  %6424 = vmatprep.subr.bf16.mxu0 %v7436_v53  ;;  %v424_v24 = vsel %vm322_vm2, %v6955_v21, %v6956_v8  ;;  %v449_v29 = vsel %vm347_vm3, %v6970_v11, %v6971_v10  ;;  %v6708_v50 = vpack.c.bf16 %v1313_v20, %v1312_v49  ;;  %v1315_v52 = vld [vmem:[#allocation6 + $0x68] sm:$0xff] }
 0x10d   :  { %1186 = vmatprep.mubr.bf16.mxu0 %v468_v58  ;;  %v469_v25 = vpack.c.bf16 %v425_v18, %v424_v24 }
 0x10f   :  { %5941 = vmatpush3.bf16.msra.mxu1 %v7437_v30  ;;  %6425 = vmatpush3.bf16.msra.mxu0 %v7436_v53  ;;  %v6711_v53 = vpack.c.bf16 %v1315_v52, %v1314_v51 }
 0x110   :  { %6426 = vmatprep.subr.bf16.mxu0 %v7438_v6  ;;  %6692 = vmatprep.subr.bf16.mxu1 %v7820_v35 }
 0x112   :  { %1187 = vmatmul.mubr.bf16.gmra.mrb[12].mxu0 %v467_v39  ;;  %1228 = vmatmul.mubr.bf16.vlgmr.msra.gmra.mrb[8].mxu1 %v460_v17  ;;  %v6964_v39 = vpop.permute.xlu0 %6963 }
 0x113   :  { %6427 = vmatpush3.bf16.msra.mxu0 %v7438_v6  ;;  %1235 = vmatprep.mubr.bf16.mxu1 %v470_v14  ;;  %v6966_v14 = vunpack.i.h.bf16 %v6964_v39  ;;  %v6965_v28 = vunpack.i.l.bf16 %v6964_v39 }
 0x114   :  { %6428 = vmatprep.subr.bf16.mxu0 %v7439_v19  ;;  %6438 = vmatprep.mubr.bf16.mxu0 %v462_v22 }
 0x115   :  { %v448_v31 = vsel %vm347_vm3, %v6965_v28, %v6966_v14  ;;  %6694 = vmatpush3.bf16.msra.mxu1 %v6693_v36 }
 0x116   :  { %v471_v32 = vpack.c.bf16 %v449_v29, %v448_v31  ;;  %6695 = vmatprep.subr.bf16.mxu1 %v7820_v35 }
 0x117   :  { %6429 = vmatpush3.bf16.msra.mxu0 %v7439_v19 }
 0x118   :  { %6430 = vmatprep.subr.bf16.mxu0 %v7440_v23 }
 0x119   :  { %6697 = vmatpush3.bf16.msra.mxu1 %v6696_v38 }
 0x11a   :  { %1236 = vmatmul.mubr.bf16.gmra.mrb[12].mxu1 %v469_v25  ;;  %6698 = vmatprep.subr.bf16.mxu1 %v7820_v35 }
 0x11b   :  { %6431 = vmatpush3.bf16.msra.mxu0 %v7440_v23  ;;  %6474 = vmatprep.mubr.msk.f32.mxu1 %vm7821_vm4, %v8188_v54 }
 0x11c   :  { %6432 = vmatprep.subr.bf16.mxu0 %v7441_v26 }
 0x11d   :  { %6700 = vmatpush3.bf16.msra.mxu1 %v6699_v43 }
 0x11e   :  { %6701 = vmatprep.subr.bf16.mxu1 %v7820_v35 }
 0x11f   :  { %6433 = vmatpush3.bf16.msra.mxu0 %v7441_v26 }
 0x120   :  { %6434 = vmatprep.subr.bf16.mxu0 %v7442_v4 }
 0x121   :  { %6703 = vmatpush3.bf16.msra.mxu1 %v6702_v46 }
 0x122   :  { %6704 = vmatprep.subr.bf16.mxu1 %v7820_v35 }
 0x123   :  { %6435 = vmatpush3.bf16.msra.mxu0 %v7442_v4 }
 0x124   :  { %6436 = vmatprep.subr.bf16.mxu0 %v7443_v27 }
 0x125   :  { %6706 = vmatpush3.bf16.msra.mxu1 %v6705_v45 }
 0x126   :  { %6707 = vmatprep.subr.bf16.mxu1 %v7820_v35 }
 0x127   :  { %6437 = vmatpush3.bf16.msra.mxu0 %v7443_v27 }
 0x128   :  { %6716 = vmatprep.subr.bf16.mxu0 %v7820_v35 }
 0x129   :  { %6709 = vmatpush3.bf16.msra.mxu1 %v6708_v50 }
 0x12a   :  { %6439 = vmatmul.mubr.bf16.vlgmr.msra.gmra.mrb[16].mxu0 %v471_v32  ;;  %6710 = vmatprep.subr.bf16.mxu1 %v7820_v35 }
 0x12b   :  { %6718 = vmatpush3.bf16.msra.mxu0 %v6693_v36  ;;  %6509 = vmatprep.mubr.msk.f32.mxu0 %vm7821_vm4, %v8188_v54 }
 0x12c   :  { %6719 = vmatprep.subr.bf16.mxu0 %v7820_v35 }
 0x12d   :  { %6712 = vmatpush3.bf16.msra.mxu1 %v6711_v53 }
 0x12e   :  { %6713 = vmatprep.subr.bf16.mxu1 %v7820_v35 }
 0x12f   :  { %6721 = vmatpush3.bf16.msra.mxu0 %v6696_v38 }
 0x130   :  { %6722 = vmatprep.subr.bf16.mxu0 %v7820_v35 }
 0x131   :  { %6715 = vmatpush3.bf16.msra.mxu1 %v6714_v57 }
 0x133   :  { %6724 = vmatpush3.bf16.msra.mxu0 %v6699_v43 }
 0x134   :  { %6725 = vmatprep.subr.bf16.mxu0 %v7820_v35 }
 0x137   :  { %6727 = vmatpush3.bf16.msra.mxu0 %v6702_v46 }
 0x138   :  { %6728 = vmatprep.subr.bf16.mxu0 %v7820_v35 }
 0x13b   :  { %6730 = vmatpush3.bf16.msra.mxu0 %v6705_v45 }
 0x13c   :  { %6731 = vmatprep.subr.bf16.mxu0 %v7820_v35 }
 0x13f   :  { %6733 = vmatpush3.bf16.msra.mxu0 %v6708_v50 }
 0x140   :  { %6734 = vmatprep.subr.bf16.mxu0 %v7820_v35 }
 0x143   :  { %6736 = vmatpush3.bf16.msra.mxu0 %v6711_v53 }
 0x144   :  { %6737 = vmatprep.subr.bf16.mxu0 %v7820_v35 }
 0x147   :  { %6739 = vmatpush3.bf16.msra.mxu0 %v6714_v57 }
 0x1bd   :  { %v5858_v55 = vpop.f32.mrb[0].mxu0 }
 0x1be   :  { %v5859_v60 = vpop.f32.mrb[1].mxu0 }
 0x1bf   :  { %v5860_v58 = vadd.f32 %v5859_v60, %v5858_v55  ;;  %v5861_v30 = vpop.f32.mrb[2].mxu0 }
 0x1c0   :  { %v5862_v59 = vpop.f32.mrb[3].mxu0 }
 0x1c1   :  { %v5863_v62 = vadd.f32 %v5862_v59, %v5861_v30 }
 0x1c5   :  { %v5886_v63 = vpop.f32.mrb[0].mxu1  ;;  %v5864_v5 = vpop.f32.mrb[4].mxu0 }
 0x1c6   :  { %v5887_v6 = vpop.f32.mrb[1].mxu1  ;;  %v5865_v7 = vpop.f32.mrb[5].mxu0 }
 0x1c7   :  { %v5888_v0 = vadd.f32 %v5887_v6, %v5886_v63  ;;  %v5889_v12 = vpop.f32.mrb[2].mxu1  ;;  %v5866_v13 = vadd.f32 %v5865_v7, %v5864_v5  ;;  %v5867_v15 = vpop.f32.mrb[6].mxu0 }
 0x1c8   :  { %v5890_v16 = vpop.f32.mrb[3].mxu1  ;;  %v5868_v17 = vpop.f32.mrb[7].mxu0 }
 0x1c9   :  { %v1132_v19 = vadd.f32 %v5888_v0, %v5860_v58  ;;  %v5891_v1 = vadd.f32 %v5890_v16, %v5889_v12  ;;  %v5869_v3 = vadd.f32 %v5868_v17, %v5867_v15  ;;  %v1389_v17 = vlaneseq }
 0x1cb   :  { %v1135_v8 = vadd.f32 %v5891_v1, %v5863_v62 }
 0x1d1   :  { %v5892_v21 = vpop.f32.mrb[4].mxu1 }
 0x1d2   :  { %v5893_v22 = vpop.f32.mrb[5].mxu1 }
 0x1d3   :  { %v5894_v23 = vadd.f32 %v5893_v22, %v5892_v21  ;;  %v5895_v24 = vpop.f32.mrb[6].mxu1 }
 0x1d4   :  { %v5896_v18 = vpop.f32.mrb[7].mxu1 }
 0x1d5   :  { %v1140_v25 = vadd.f32 %v5894_v23, %v5866_v13  ;;  %v5897_v26 = vadd.f32 %v5896_v18, %v5895_v24 }
 0x1d7   :  { %v1143_v4 = vadd.f32 %v5897_v26, %v5869_v3 }
 0x1dd   :  { %v5914_v9 = vpop.f32.mrb[8].mxu0 }
 0x1de   :  { %v5915_v39 = vpop.f32.mrb[9].mxu0 }
 0x1df   :  { %v5916_v27 = vadd.f32 %v5915_v39, %v5914_v9  ;;  %v5917_v10 = vpop.f32.mrb[10].mxu0 }
 0x1e0   :  { %v5918_v11 = vpop.f32.mrb[11].mxu0 }
 0x1e1   :  { %v1181_v14 = vadd.f32 %v5916_v27, %v1132_v19  ;;  %v5919_v28 = vadd.f32 %v5918_v11, %v5917_v10  ;;  %v1390_v19 = vshrl.u32 %v1389_v17, 7 }
 0x1e3   :  { %v1184_v29 = vadd.f32 %v5919_v28, %v1135_v8  ;;  %v8194_v1 = vsub.s32 0, %v1390_v19 }
 0x1e5   :  { %v5920_v31 = vpop.f32.mrb[12].mxu0  ;;  %v5942_v32 = vpop.f32.mrb[8].mxu1 }
 0x1e6   :  { %v5921_v33 = vpop.f32.mrb[13].mxu0  ;;  %v5943_v34 = vpop.f32.mrb[9].mxu1 }
 0x1e7   :  { %v5922_v41 = vadd.f32 %v5921_v33, %v5920_v31  ;;  %v5944_v36 = vadd.f32 %v5943_v34, %v5942_v32  ;;  %v5923_v37 = vpop.f32.mrb[14].mxu0  ;;  %v5945_v38 = vpop.f32.mrb[10].mxu1  ;;  %v7444_v34 = vld [vmem:[#allocation9 + $0x40] sm:$0xff]  }
 0x1e8   :  { %v5924_v40 = vpop.f32.mrb[15].mxu0  ;;  %v5946_v42 = vpop.f32.mrb[11].mxu1  ;;  %5998 = vmatprep.subr.bf16.mxu1 %v7444_v34  ;;  %v1567_v34 = vld [vmem:[#allocation2 + $0x10] sm:$0xc0] }
 0x1e9   :  { %v1189_v43 = vadd.f32 %v5922_v41, %v1140_v25  ;;  %v5925_v2 = vadd.f32 %v5924_v40, %v5923_v37  ;;  %v5947_v44 = vadd.f32 %v5946_v42, %v5945_v38  ;;  %v1230_v46 = vadd.f32 %v5944_v36, %v1181_v14  ;;  %v7445_v41 = vld [vmem:[#allocation9] sm:$0xff]   ;;  %v7446_v42 = vld [vmem:[#allocation9 + $0x48] sm:$0xff]  }
 0x1eb   :  { %v1192_v47 = vadd.f32 %v5925_v2, %v1143_v4  ;;  %v1233_v48 = vadd.f32 %v5947_v44, %v1184_v29  ;;  %v7448_v2 = vld [vmem:[#allocation9 + $0x50] sm:$0xff]  }
 0x1ec   :  { %v7449_v44 = vld [vmem:[#allocation9 + $0x10] sm:$0xff]  }
 0x1ed   :  { %v5948_v45 = vpop.f32.mrb[12].mxu1 }
 0x1ee   :  { %v5949_v49 = vpop.f32.mrb[13].mxu1 }
 0x1ef   :  { %v5950_v20 = vadd.f32 %v5949_v49, %v5948_v45  ;;  %v5951_v50 = vpop.f32.mrb[14].mxu1  ;;  %v7453_v45 = vld [vmem:[#allocation9 + $0x18] sm:$0xff]   ;;  %v7454_v49 = vld [vmem:[#allocation9 + $0xc8] sm:$0xff]  }
 0x1f0   :  { %v5952_v51 = vpop.f32.mrb[15].mxu1 }
 0x1f1   :  { %v5953_v52 = vadd.f32 %v5952_v51, %v5951_v50  ;;  %v1238_v53 = vadd.f32 %v5950_v20, %v1189_v43  ;;  %v7447_v43 = vld [vmem:[#allocation9 + $0x8] sm:$0xff]   ;;  %v1481_v20 = vld [vmem:[%s9187_s5] sm:$0x1]  ;;  %s7822_s5 = smov 16  }
 0x1f2   :  { %v7455_v51 = vld [vmem:[#allocation9 + $0x88] sm:$0xff]  }
 0x1f3   :  { %v1241_v56 = vadd.f32 %v5953_v52, %v1192_v47  ;;  %v7451_v47 = vld [vmem:[#allocation9 + $0x80] sm:$0xff]  }
 0x1f4   :  { %v7456_v52 = vld [vmem:[#allocation9 + $0x60] sm:$0xff]  }
 0x1fd   :  { %v6440_v61 = vpop.f32.mrb[16].mxu0 }
 0x1fe   :  { %v1287_v57 = vadd.f32 %v6440_v61, %v1238_v53  ;;  %v1278_v55 = vpop.f32.mrb[17].mxu0  ;;  %v7457_v53 = vld [vmem:[#allocation9 + $0x20] sm:$0xff]   ;;  %v7458_v61 = vld [vmem:[#allocation9 + $0xd0] sm:$0xff]  }
 0x1ff   :  { %v1279_v60 = vadd.f32 %v1278_v55, %v1230_v46  ;;  %v6441_v58 = vpop.f32.mrb[18].mxu0  ;;  %v7450_v46 = vld [vmem:[#allocation9 + $0xc0] sm:$0xff]  }
 0x200   :  { %v1290_v30 = vadd.f32 %v6441_v58, %v1241_v56  ;;  %v1281_v59 = vpop.f32.mrb[19].mxu0  ;;  %6026 = vmatprep.subr.bf16.mxu0 %v7450_v46  ;;  %v5631_v55 = vld [vmem:[%s9190_s8] ss:$0 sm:$0xff]  ;;  %v7459_v58 = vld [vmem:[#allocation9 + $0x90] sm:$0xff]   ;;  %v1589_v46 = vld [vmem:[#allocation2] sm:$0x80] }
 0x201   :  { %v1282_v62 = vadd.f32 %v1281_v59, %v1233_v48  ;;  %v7452_v48 = vld [vmem:[#allocation9 + $0x58] sm:$0xff]   ;;  %v7461_v59 = vld [vmem:[#allocation9 + $0x28] sm:$0xff]   ;;  %s7823_s8 = smov 112  }
 0x203   :  { %v1293_v63 = vadd.f32 %v1282_v62, %v1279_v60 }
 0x205   :  { %v1294_v5 = vadd.f32 %v1293_v63, %v1287_v57 }
 0x207   :  { %v1295_v6 = vadd.f32 %v1294_v5, %v1290_v30 }
 0x209   :  { %v1296_v7 = vrot.slane %v1295_v6, 4 }
 0x20b   :  { %v1297_v0 = vadd.f32 %v1296_v7, %v1295_v6  ;;  %v1519_v7 = vld [vmem:[#allocation2 + $0x8] sm:$0xc0] }
 0x20d   :  { %v1298_v12 = vrot.slane %v1297_v0, 2 }
 0x20f   :  { %v1299_v13 = vadd.f32 %v1298_v12, %v1297_v0  ;;  %v7462_v0 = vld [vmem:[#allocation9 + $0xd8] sm:$0xff]   ;;  %v8205_v12 = vrot.slane %v8188_v54, 6 }
 0x211   :  { %v1300_v15 = vrot.slane %v1299_v13, 1 }
 0x213   :  { %v1301_v16 = vadd.f32 %v1300_v15, %v1299_v13 }
 0x215   :  { %6475 = vmatmul.mubr.f32.vlgmr.msra.gmra.mrb[16].mxu1 %v1301_v16 }
 0x216   :  { %5999 = vmatpush3.bf16.msra.mxu1 %v7445_v41  ;;  %v7468_v41 = vld [vmem:[#allocation9 + $0x78] sm:$0xff]  }
 0x217   :  { %6000 = vmatprep.subr.bf16.mxu1 %v7446_v42 }
 0x21a   :  { %6001 = vmatpush3.bf16.msra.mxu1 %v7447_v43 }
 0x21b   :  { %6002 = vmatprep.subr.bf16.mxu1 %v7448_v2 }
 0x21e   :  { %6003 = vmatpush3.bf16.msra.mxu1 %v7449_v44  ;;  %v1579_v44 = vrot.slane %v1567_v34, 6 }
 0x21f   :  { %6004 = vmatprep.subr.bf16.mxu1 %v7452_v48  ;;  %v1528_v48 = vld [vmem:[#allocation2 + $0x90] sm:$0x3f] }
 0x222   :  { %6005 = vmatpush3.bf16.msra.mxu1 %v7453_v45 }
 0x223   :  { %6006 = vmatprep.subr.bf16.mxu1 %v7456_v52  ;;  %v7473_v52 = vld [vmem:[#allocation9 + $0xf0] sm:$0xff]  }
 0x226   :  { %6007 = vmatpush3.bf16.msra.mxu1 %v7457_v53 }
 0x2e8   :  { %v1384_v3 = vpop.f32.mrb[16].mxu1 }
 0x2e9   :  { %v1388_v8 = vmul.f32 0.001953125, %v1384_v3  ;;  %v6476_v21 = vpop.f32.mrb[17].mxu1  ;;  %v1546_v3 = vrot.slane %v1519_v7, 6 }
 0x2eb   :  { %v1392_v22 = vrot.slane %v1388_v8, %v8194_v1  ;;  %v7463_v8 = vld [vmem:[#allocation9 + $0x98] sm:$0xff]  }
 0x2ed   :  { %v1393_v23 = vsub.f32 %v1279_v60, %v1392_v22  ;;  %v1394_v24 = vsub.f32 %v1282_v62, %v1392_v22  ;;  %v1395_v18 = vsub.f32 %v1287_v57, %v1392_v22  ;;  %v1396_v25 = vsub.f32 %v1290_v30, %v1392_v22  ;;  %v1518_v60 = vld [vmem:[#allocation2] sm:$0xc0]  ;;  %v7460_v30 = vld [vmem:[#allocation9 + $0x68] sm:$0xff]  }
 0x2ee   :  { %v1543_v13 = vrot.slane %v1518_v60, 6  ;;  %6008 = vmatprep.subr.bf16.mxu1 %v7460_v30  ;;  %v7475_v60 = vld [vmem:[#allocation9 + $0xb0] sm:$0xff]  }
 0x2ef   :  { %v1397_v26 = vmul.f32 %v1393_v23, %v1393_v23  ;;  %v1398_v4 = vmul.f32 %v1394_v24, %v1394_v24  ;;  %v1399_v9 = vmul.f32 %v1395_v18, %v1395_v18  ;;  %v1400_v27 = vmul.f32 %v1396_v25, %v1396_v25  ;;  %6009 = vmatpush3.bf16.msra.mxu1 %v7461_v59 }
 0x2f0   :  { %v1581_v59 = vsel %vm1542_vm5, %v1579_v44, %v8205_v12 }
 0x2f1   :  { %v1401_v39 = vadd.f32 %v1398_v4, %v1397_v26  ;;  %v1524_v26 = vld [vmem:[#allocation2 + $0x60] sm:$0xc0]  ;;  %v7464_v4 = vld [vmem:[#allocation9 + $0x70] sm:$0xff]  }
 0x2f2   :  { %6010 = vmatprep.subr.bf16.mxu1 %v7464_v4 }
 0x2f3   :  { %v1402_v10 = vadd.f32 %v1401_v39, %v1399_v9  ;;  %v7465_v9 = vld [vmem:[#allocation9 + $0x30] sm:$0xff]  }
 0x2f4   :  { %v1522_v39 = vld [vmem:[#allocation2 + $0x30] sm:$0x3f]  ;;  %6011 = vmatpush3.bf16.msra.mxu1 %v7465_v9 }
 0x2f5   :  { %v1403_v11 = vadd.f32 %v1402_v10, %v1400_v27  ;;  %v1525_v27 = vld [vmem:[#allocation2 + $0x68] sm:$0xc0]  ;;  %v7466_v10 = vld [vmem:[#allocation9 + $0xe0] sm:$0xff]   ;;  %6012 = vmatprep.subr.bf16.mxu1 %v7468_v41 }
 0x2f7   :  { %v1404_v14 = vrot.slane %v1403_v11, 4 }
 0x2f9   :  { %v1405_v28 = vadd.f32 %v1404_v14, %v1403_v11  ;;  %v7467_v14 = vld [vmem:[#allocation9 + $0xa0] sm:$0xff]  }
 0x2fb   :  { %v1406_v29 = vrot.slane %v1405_v28, 2 }
 0x2fd   :  { %v1407_v31 = vadd.f32 %v1406_v29, %v1405_v28  ;;  %v1553_v29 = vrot.slane %v1524_v26, 6 }
 0x2ff   :  { %v1408_v32 = vrot.slane %v1407_v31, 1 }
 0x301   :  { %v1409_v33 = vadd.f32 %v1408_v32, %v1407_v31  ;;  %v1549_v31 = vrot.slane %v1522_v39, 6 }
 0x303   :  { %6510 = vmatmul.mubr.f32.vlgmr.msra.gmra.mrb[20].mxu0 %v1409_v33  ;;  %v1556_v33 = vrot.slane %v1525_v27, 6  ;;  %v1550_v42 = vsel %vm1542_vm5, %v8205_v12, %v1549_v31 }
 0x304   :  { %6027 = vmatpush3.bf16.msra.mxu0 %v7451_v47  ;;  %v7471_v47 = vld [vmem:[#allocation9 + $0xa8] sm:$0xff]  }
 0x305   :  { %6028 = vmatprep.subr.bf16.mxu0 %v7454_v49  ;;  %v7472_v49 = vld [vmem:[#allocation9 + $0x140] sm:$0xff]  }
 0x308   :  { %6029 = vmatpush3.bf16.msra.mxu0 %v7455_v51  ;;  %v1590_v51 = vld [vmem:[#allocation2 + $0x8] sm:$0x80] }
 0x309   :  { %6030 = vmatprep.subr.bf16.mxu0 %v7458_v61  ;;  %v8244_v61 = vrot.slane %v8188_v54, 7  ;;  %v1608_v7 = vrot.slane %v1590_v51, 7 }
 0x30c   :  { %6031 = vmatpush3.bf16.msra.mxu0 %v7459_v58  ;;  %v1559_v58 = vrot.slane %v1528_v48, 6 }
 0x30d   :  { %6032 = vmatprep.subr.bf16.mxu0 %v7462_v0  ;;  %v8252_v0 = vld [vmem:[#allocation2 + $0x50] sm:$0x1] }
 0x30e   :  { %v1560_v4 = vsel %vm1542_vm5, %v8205_v12, %v1559_v58  ;;  %v1681_v39 = vrot.slane %v8252_v0, 1  ;;  %v1593_v0 = vld [vmem:[#allocation2 + $0x60] sm:$0x80] }
 0x310   :  { %6033 = vmatpush3.bf16.msra.mxu0 %v7463_v8 }
 0x311   :  { %6034 = vmatprep.subr.bf16.mxu0 %v7466_v10 }
 0x314   :  { %6035 = vmatpush3.bf16.msra.mxu0 %v7467_v14  ;;  %v7481_v14 = vld [vmem:[#allocation9 + $0x1c0] sm:$0xff]  }
 0x3d6   :  { %v1476_v36 = vpop.f32.mrb[20].mxu0 }
 0x3d7   :  { %v1480_v37 = vmul.f32 0.001953125, %v1476_v36  ;;  %v6511_v38 = vpop.f32.mrb[21].mxu0  ;;  %v7469_v36 = vld [vmem:[#allocation9 + $0x38] sm:$0xff]  }
 0x3d8   :  { %6013 = vmatpush3.bf16.msra.mxu1 %v7469_v36 }
 0x3d9   :  { %v1482_v40 = vadd.f32 1e-05, %v1480_v37  ;;  %v7470_v37 = vld [vmem:[#allocation9 + $0xe8] sm:$0xff]   ;;  %6054 = vmatprep.subr.bf16.mxu1 %v7472_v49 }
 0x3da   :  { %6036 = vmatprep.subr.bf16.mxu0 %v7470_v37 }
 0x3db   :  { %7652 = vrsqrt.f32 %v1482_v40  ;;  %v1555_v40 = vsel %vm1542_vm5, %v1553_v29, %v8205_v12  ;;  %6037 = vmatpush3.bf16.msra.mxu0 %v7471_v47 }
 0x3dc   :  { %6038 = vmatprep.subr.bf16.mxu0 %v7473_v52 }
 0x3df   :  { %6039 = vmatpush3.bf16.msra.mxu0 %v7475_v60 }
 0x3e5   :  { %v7653_v50 = vpop.eup %7652 }
 0x3e6   :  { %v1484_v56 = vmul.f32 %v7653_v50, %v1481_v20  ;;  %v1569_v50 = vld [vmem:[#allocation2 + $0x40] sm:$0x3f] }
 0x3e8   :  { %v1489_v57 = vrot.slane %v1484_v56, %v8194_v1 }
 0x3ea   :  { %v1491_v62 = vmul.f32 %v1489_v57, %v1393_v23  ;;  %v1492_v63 = vmul.f32 %v1489_v57, %v1394_v24  ;;  %v1493_v5 = vmul.f32 %v1489_v57, %v1395_v18  ;;  %v1494_v6 = vmul.f32 %v1489_v57, %v1396_v25  ;;  %v8246_v57 = vld [vmem:[#allocation2 + $0x68] sm:$0x80] }
 0x3eb   :  { %v1545_v25 = vsel %vm1542_vm5, %v1543_v13, %v8205_v12  ;;  %v8254_v13 = vld [vmem:[#allocation2 + $0xb0] sm:$0x1] }
 0x3ec   :  { %v1502_v15 = vadd.f32 %v5631_v55, %v1491_v62  ;;  %v1503_v16 = vadd.f32 %v5631_v55, %v1492_v63  ;;  %v1504_v17 = vadd.f32 %v5631_v55, %v1493_v5  ;;  %v1505_v19 = vadd.f32 %v5631_v55, %v1494_v6  ;;  %v1744_v55 = vld [vmem:[#allocation2 + $0x50] sm:$0x3]  ;;  %v7477_v5 = vld [vmem:[#allocation9 + $0xf8] sm:$0xff]  }
 0x3ed   :  { %v1605_v62 = vrot.slane %v1589_v46, 7  ;;  %v1582_v6 = vrot.slane %v1569_v50, 6  ;;  %6040 = vmatprep.subr.bf16.mxu0 %v7477_v5  ;;  %v1570_v46 = vld [vmem:[#allocation2 + $0x70] sm:$0xc0] }
 0x3ee   :  { %v8207_v21 = vmax.f32 %v1502_v15, 0.0  ;;  %v8209_v22 = vmax.f32 %v1503_v16, 0.0  ;;  %v8211_v23 = vmax.f32 %v1504_v17, 0.0  ;;  %v8213_v24 = vmax.f32 %v1505_v19, 0.0  ;;  %v1591_v50 = vld [vmem:[#allocation2 + $0x30] sm:$0x7f] }
 0x3ef   :  { %v1618_v17 = vrot.slane %v8246_v57, 7  ;;  %v1766_v19 = vrot.slane %v1744_v55, 2  ;;  %v1607_v31 = vsel %vm164_vm0, %v1605_v62, %v8244_v61  ;;  %v1584_v5 = vrot.slane %v1570_v46, 6  ;;  %v1630_v46 = vld [vmem:[#allocation2 + $0x40] sm:$0x7f] }
 0x3f0   :  { %1514 = vst [vmem:[#allocation2 + $0x20] sm:$0xff] %v8207_v21  ;;  %1515 = vst [vmem:[#allocation2 + $0x38] sm:$0xff] %v8209_v22  ;;  %v1547_v18 = vrot.slane %v8207_v21, 6  ;;  %v1557_v32 = vrot.slane %v8211_v23, 6  ;;  %v1609_v16 = vrot.slane %v8207_v21, 7  ;;  %v1619_v47 = vrot.slane %v8211_v23, 7 }
 0x3f1   :  { %1516 = vst [vmem:[#allocation2 + $0x80] sm:$0xff] %v8211_v23  ;;  %1517 = vst [vmem:[#allocation2 + $0x98] sm:$0xff] %v8213_v24  ;;  %v8303_v52 = vrot.slane %v8209_v22, 1  ;;  %v8309_v57 = vrot.slane %v8213_v24, 2 }
 0x3f2   :  { %v8223_v11 = vsel %vm1542_vm5, %v1546_v3, %v1547_v18  ;;  %v8235_v2 = vsel %vm1542_vm5, %v1556_v33, %v1557_v32  ;;  %v7479_v3 = vld [vmem:[#allocation9 + $0xb8] sm:$0xff]   ;;  %v1748_v33 = vld [vmem:[#allocation2 + $0xb0] sm:$0x3]  ;;  %v8281_v41 = vsel %vm164_vm0, %v1608_v7, %v1609_v16 }
 0x3f3   :  { %v6982_v28 = vpack.i.bf16 %v8223_v11, %v1545_v25  ;;  %v7012_v56 = vpack.i.bf16 %v8235_v2, %v1555_v40  ;;  %v8259_v8 = vpack.i.bf16 %v1581_v59, %v8223_v11  ;;  %v8262_v25 = vrot.slane %v8209_v22, 2  ;;  %6041 = vmatpush3.bf16.msra.mxu0 %v7479_v3 }
 0x3f4   :  { %6082 = vmatprep.subr.bf16.mxu0 %v7481_v14  ;;  %v7022_v60 = vpack.i.bf16 %v8281_v41, %v1607_v31  ;;  %v1595_v31 = vld [vmem:[#allocation2 + $0x90] sm:$0x7f] }
 0x3f5   :  { %6973 = vrot.lane.b32.xlu0 %v6982_v28, %s7811_s28  ;;  %v8285_v37 = vsel %vm1757_vm6, %v8262_v25, %v1766_v19 }
 0x3f7   :  { %v1523_v38 = vld [vmem:[#allocation2 + $0x38] sm:$0x3f]  ;;  %v1742_v63 = vld [vmem:[#allocation2 + $0x20] sm:$0xfc] }
 0x3f8   :  { %v1551_v43 = vrot.slane %v1523_v38, 6  ;;  %v1529_v45 = vld [vmem:[#allocation2 + $0x98] sm:$0x3f]  ;;  %v1761_v26 = vrot.slane %v1742_v63, 2  ;;  %v1654_v27 = vld [vmem:[#allocation2 + $0x20] sm:$0xfe] }
 0x3f9   :  { %6983 = vrot.lane.b32.xlu0 %v6982_v28, %s7822_s5  ;;  %v1561_v30 = vrot.slane %v1529_v45, 6  ;;  %v1592_v15 = vld [vmem:[#allocation2 + $0x38] sm:$0x7f]  ;;  %v1658_v10 = vld [vmem:[#allocation2 + $0x80] sm:$0xfe]  ;;  %v1583_v28 = vsel %vm1542_vm5, %v8205_v12, %v1582_v6  ;;  %v1776_v45 = vrot.slane %v1748_v33, 2  ;;  %v8331_v6 = vsel %vm164_vm0, %v1618_v17, %v1619_v47 }
 0x3fa   :  { %v8239_v20 = vsel %vm1542_vm5, %v1547_v18, %v1551_v43  ;;  %v1596_v18 = vld [vmem:[#allocation2 + $0x98] sm:$0x7f]  ;;  %v1613_v29 = vrot.slane %v1592_v15, 7  ;;  %v1746_v34 = vld [vmem:[#allocation2 + $0x80] sm:$0xfc]  ;;  %v8289_v38 = vsel %vm1757_vm6, %v1761_v26, %v8262_v25  ;;  %v1686_v43 = vrot.slane %v1658_v10, 1 }
 0x3fb   :  { %v6987_v53 = vpack.i.bf16 %v8239_v20, %v1550_v42  ;;  %v8269_v9 = vsel %vm1542_vm5, %v1557_v32, %v1561_v30  ;;  %v1691_v32 = vrot.slane %v8254_v13, 1  ;;  %v1623_v36 = vrot.slane %v1596_v18, 7 }
 0x3fc   :  { %v7017_v40 = vpack.i.bf16 %v8269_v9, %v1560_v4  ;;  %v1676_v42 = vrot.slane %v1654_v27, 1  ;;  %v2324_v44 = vpack.c.bf16 %v8285_v37, %v8289_v38  ;;  %v2304_v48 = vpack.c.bf16 %v8239_v20, %v8223_v11  ;;  %v1572_v27 = vld [vmem:[#allocation2 + $0xa0] sm:$0x3f] }
 0x3fd   :  { %6978 = vrot.lane.b32.xlu1 %v6987_v53, %s7811_s28  ;;  %6993 = vrot.lane.b32.xlu0 %v7012_v56, %s7811_s28  ;;  %v1771_v49 = vrot.slane %v1746_v34, 2  ;;  %v8300_v51 = vsel %vm164_vm0, %v1609_v16, %v1613_v29  ;;  %v7007_v55 = vpack.i.bf16 %v1583_v28, %v8239_v20  ;;  %v8316_v58 = vsel %vm164_vm0, %v1619_v47, %v1623_v36  ;;  %v1629_v34 = vld [vmem:[#allocation2 + $0x10] sm:$0x80] }
 0x3fe   :  { %v8320_v30 = vsel %vm237_vm1, %v1676_v42, %v8303_v52  ;;  %v1611_v63 = vrot.slane %v1591_v50, 7  ;;  %v2309_v7 = vpack.c.bf16 %v8300_v51, %v8281_v41  ;;  %v8339_v13 = vsel %vm237_vm1, %v8303_v52, %v1681_v39  ;;  %v1631_v50 = vld [vmem:[#allocation2 + $0x70] sm:$0x80] }
 0x3ff   :  { %v8328_v62 = vsel %vm1757_vm6, %v1771_v49, %v8309_v57  ;;  %v8347_v16 = vsel %vm1757_vm6, %v8309_v57, %v1776_v45  ;;  %v2334_v17 = vpack.c.bf16 %v8316_v58, %v8331_v6  ;;  %v2319_v19 = vpack.c.bf16 %v8339_v13, %v8320_v30 }
 0x400   :  { %v2349_v18 = vpack.c.bf16 %v8347_v16, %v8328_v62  ;;  %v1612_v26 = vsel %vm164_vm0, %v8244_v61, %v1611_v63  ;;  %v1586_v4 = vsel %vm1542_vm5, %v1584_v5, %v8205_v12  ;;  %v1615_v39 = vrot.slane %v1593_v0, 7  ;;  %v1632_v0 = vld [vmem:[#allocation2 + $0xa0] sm:$0x7f] }
 0x401   :  { %6988 = vrot.lane.b32.xlu1 %v6987_v53, %s7822_s5  ;;  %7003 = vrot.lane.b32.xlu0 %v8259_v8, %s7819_s4  ;;  %v8306_v53 = vrot.slane %v8213_v24, 1  ;;  %v7027_v10 = vpack.i.bf16 %v8300_v51, %v1612_v26  ;;  %v7042_v14 = vpack.i.bf16 %v1586_v4, %v8235_v2  ;;  %v1587_v28 = vrot.slane %v1572_v27, 6 }
 0x402   :  { %v1617_v29 = vsel %vm164_vm0, %v1615_v39, %v8244_v61  ;;  %v1637_v42 = vrot.slane %v1629_v34, 7  ;;  %v1640_v45 = vrot.slane %v1630_v46, 7  ;;  %v1642_v63 = vrot.slane %v1631_v50, 7  ;;  %v1697_v46 = vld [vmem:[#allocation2 + $0x20] sm:$0xfe] }
 0x403   :  { %v8324_v59 = vsel %vm237_vm1, %v1686_v43, %v8306_v53  ;;  %v8343_v15 = vsel %vm237_vm1, %v8306_v53, %v1691_v32  ;;  %v7052_v32 = vpack.i.bf16 %v8331_v6, %v1617_v29  ;;  %v1588_v33 = vsel %vm1542_vm5, %v8205_v12, %v1587_v28  ;;  %v1653_v28 = vld [vmem:[#allocation2 + $0x18] sm:$0xfe]  ;;  %v1659_v50 = vld [vmem:[#allocation2 + $0xa8] sm:$0x1] }
 0x404   :  { %v2344_v3 = vpack.c.bf16 %v8343_v15, %v8324_v59  ;;  %v7047_v36 = vpack.i.bf16 %v1588_v33, %v8269_v9  ;;  %v1639_v12 = vsel %vm164_vm0, %v1637_v42, %v8244_v61  ;;  %v1641_v49 = vsel %vm164_vm0, %v8244_v61, %v1640_v45  ;;  %v1657_v42 = vld [vmem:[#allocation2 + $0x78] sm:$0xfe] }
 0x405   :  { %6998 = vrot.lane.b32.xlu1 %v7017_v40, %s7811_s28  ;;  %7013 = vrot.lane.b32.xlu0 %v7012_v56, %s7822_s5  ;;  %v2329_v56 = vpack.c.bf16 %v8269_v9, %v8235_v2  ;;  %v7082_v47 = vpack.i.bf16 %v1639_v12, %v8281_v41  ;;  %v1644_v5 = vsel %vm164_vm0, %v1642_v63, %v8244_v61  ;;  %v1645_v39 = vrot.slane %v1632_v0, 7  ;;  %v1701_v0 = vld [vmem:[#allocation2 + $0x50] sm:$0x1]  ;;  %v7506_v41 = vld [vmem:[#allocation9 + $0x200] sm:$0xff]  }
 0x406   :  { %v7107_v26 = vpack.i.bf16 %v8209_v22, %v8188_v54  ;;  %v7122_v4 = vpack.i.bf16 %v1644_v5, %v8331_v6  ;;  %v7157_v29 = vpack.i.bf16 %v8188_v54, %v8209_v22  ;;  %v7182_v33 = vpack.i.bf16 %v8188_v54, %v8211_v23  ;;  %v1655_v22 = vld [vmem:[#allocation2 + $0x48] sm:$0x1]  ;;  %v7505_v2 = vld [vmem:[#allocation9 + $0x1f0] sm:$0xff]  }
 0x407   :  { %v1646_v27 = vsel %vm164_vm0, %v8244_v61, %v1645_v39  ;;  %v1683_v12 = vrot.slane %v1657_v42, 1  ;;  %v1721_v45 = vrot.slane %v1697_v46, 1 }
 0x409   :  { %7008 = vrot.lane.b32.xlu1 %v7007_v55, %s7819_s4  ;;  %7023 = vrot.lane.b32.xlu0 %v7022_v60, %s7822_s5  ;;  %v1723_v63 = vsel %vm237_vm1, %v1721_v45, %v8303_v52 }
 0x40d   :  { %7018 = vrot.lane.b32.xlu1 %v7017_v40, %s7822_s5  ;;  %7033 = vrot.lane.b32.xlu0 %v8259_v8, %s7823_s8  ;;  %v1621_v8 = vrot.slane %v1595_v31, 7  ;;  %v1673_v31 = vrot.slane %v1653_v28, 1 }
 0x40f   :  { %v1622_v40 = vsel %vm164_vm0, %v8244_v61, %v1621_v8  ;;  %v7162_v61 = vpack.i.bf16 %v8211_v23, %v8188_v54 }
 0x410   :  { %v7057_v43 = vpack.i.bf16 %v8316_v58, %v1622_v40  ;;  %v7187_v40 = vpack.i.bf16 %v8188_v54, %v8213_v24 }
 0x411   :  { %7028 = vrot.lane.b32.xlu1 %v7027_v10, %s7822_s5  ;;  %7043 = vrot.lane.b32.xlu0 %v7042_v14, %s7819_s4 }
 0x415   :  { %7038 = vrot.lane.b32.xlu1 %v7007_v55, %s7823_s8  ;;  %7053 = vrot.lane.b32.xlu0 %v7052_v32, %s7822_s5  ;;  %v7087_v55 = vpack.i.bf16 %v1641_v49, %v8300_v51 }
 0x419   :  { %7048 = vrot.lane.b32.xlu1 %v7047_v36, %s7819_s4  ;;  %7063 = vrot.lane.b32.xlu0 %v7042_v14, %s7823_s8  ;;  %v7152_v14 = vpack.i.bf16 %v8188_v54, %v8207_v21 }
 0x41d   :  { %7058 = vrot.lane.b32.xlu1 %v7057_v43, %s7822_s5  ;;  %7073 = vrot.lane.b32.xlu0 %v7022_v60, %s7811_s28  ;;  %v7102_v60 = vpack.i.bf16 %v8207_v21, %v8188_v54  ;;  %v8426_v21 = vrot.slane %v8188_v54, 1 }
 0x41f   :  { %v1675_v8 = vsel %vm237_vm1, %v1673_v31, %v8426_v21 }
 0x420   :  { %v7192_v34 = vpack.i.bf16 %v8320_v30, %v1675_v8 }
 0x421   :  { %7068 = vrot.lane.b32.xlu1 %v7047_v36, %s7823_s8  ;;  %7083 = vrot.lane.b32.xlu0 %v7082_v47, %s7823_s8  ;;  %v1679_v36 = vrot.slane %v1655_v22, 1 }
 0x423   :  { %v1680_v23 = vsel %vm237_vm1, %v8426_v21, %v1679_v36  ;;  %v1704_v36 = vld [vmem:[#allocation2 + $0x88] sm:$0xfe] }
 0x425   :  { %7078 = vrot.lane.b32.xlu1 %v7027_v10, %s7811_s28  ;;  %7093 = vrot.lane.b32.xlu0 %v7082_v47, %s7819_s4  ;;  %v7127_v10 = vpack.i.bf16 %v1646_v27, %v8316_v58  ;;  %v1698_v47 = vld [vmem:[#allocation2 + $0x28] sm:$0xfe]  ;;  %v1727_v27 = vrot.slane %v1701_v0, 1 }
 0x426   :  { %v1724_v49 = vrot.slane %v1698_v47, 1 }
 0x427   :  { %v1728_v28 = vsel %vm237_vm1, %v8303_v52, %v1727_v27  ;;  %v1743_v52 = vld [vmem:[#allocation2 + $0x48] sm:$0x3]  ;;  %v1745_v27 = vld [vmem:[#allocation2 + $0x78] sm:$0xfc] }
 0x428   :  { %v1726_v5 = vsel %vm237_vm1, %v1724_v49, %v8426_v21  ;;  %v1764_v42 = vrot.slane %v1743_v52, 2  ;;  %v1768_v52 = vrot.slane %v1745_v27, 2  ;;  %v7478_v27 = vld [vmem:[#allocation9 + $0x108] sm:$0xff]  }
 0x429   :  { %7088 = vrot.lane.b32.xlu1 %v7087_v55, %s7823_s8  ;;  %7103 = vrot.lane.b32.xlu0 %v7102_v60, %s7811_s28 }
 0x42d   :  { %7098 = vrot.lane.b32.xlu1 %v7087_v55, %s7819_s4  ;;  %7113 = vrot.lane.b32.xlu0 %v7052_v32, %s7811_s28  ;;  %v7167_v32 = vpack.i.bf16 %v8213_v24, %v8188_v54  ;;  %v1685_v24 = vsel %vm237_vm1, %v1683_v12, %v8426_v21 }
 0x42e   :  { %v7232_v55 = vpack.i.bf16 %v8324_v59, %v1685_v24  ;;  %v7607_v59 = vld [vmem:[#allocation9 + $0x4b8] sm:$0xff]  }
 0x431   :  { %7108 = vrot.lane.b32.xlu1 %v7107_v26, %s7811_s28  ;;  %7123 = vrot.lane.b32.xlu0 %v7122_v4, %s7823_s8 }
 0x435   :  { %7118 = vrot.lane.b32.xlu1 %v7057_v43, %s7811_s28  ;;  %7133 = vrot.lane.b32.xlu0 %v7122_v4, %s7819_s4  ;;  %v7202_v43 = vpack.i.bf16 %v8339_v13, %v1680_v23  ;;  %v7242_v4 = vpack.i.bf16 %v1726_v5, %v1723_v63 }
 0x439   :  { %7128 = vrot.lane.b32.xlu1 %v7127_v10, %s7823_s8  ;;  %7138 = vrot.lane.b32.xlu0 %v7102_v60, %s7822_s5  ;;  %v1689_v60 = vrot.slane %v1659_v50, 1 }
 0x43b   :  { %v1690_v39 = vsel %vm237_vm1, %v8426_v21, %v1689_v60  ;;  %v1707_v60 = vld [vmem:[#allocation2 + $0xb0] sm:$0x1] }
 0x43d   :  { %7143 = vrot.lane.b32.xlu1 %v7127_v10, %s7819_s4  ;;  %7153 = vrot.lane.b32.xlu0 %v7152_v14, %s7819_s4 }
 0x441   :  { %7148 = vrot.lane.b32.xlu1 %v7107_v26, %s7822_s5  ;;  %7163 = vrot.lane.b32.xlu0 %v7162_v61, %s7811_s28  ;;  %v1702_v26 = vld [vmem:[#allocation2 + $0x58] sm:$0x1] }
 0x442   :  { %v1729_v10 = vrot.slane %v1702_v26, 1 }
 0x445   :  { %7158 = vrot.lane.b32.xlu1 %v7157_v29, %s7819_s4  ;;  %7173 = vrot.lane.b32.xlu0 %v7162_v61, %s7822_s5  ;;  %v7237_v61 = vpack.i.bf16 %v8343_v15, %v1690_v39 }
 0x449   :  { %7168 = vrot.lane.b32.xlu1 %v7167_v32, %s7811_s28  ;;  %7183 = vrot.lane.b32.xlu0 %v7182_v33, %s7819_s4 }
 0x44d   :  { %7178 = vrot.lane.b32.xlu1 %v7167_v32, %s7822_s5  ;;  %7193 = vrot.lane.b32.xlu0 %v7192_v34, %s7822_s5  ;;  %v8471_v32 = vrot.slane %v8188_v54, 2 }
 0x44f   :  { %v1765_v50 = vsel %vm1757_vm6, %v8471_v32, %v1764_v42  ;;  %v7474_v42 = vld [vmem:[#allocation9 + $0x100] sm:$0xff]  }
 0x451   :  { %7188 = vrot.lane.b32.xlu1 %v7187_v40, %s7819_s4  ;;  %7198 = vrot.lane.b32.xlu0 %v7152_v14, %s7823_s8  ;;  %v1741_v14 = vld [vmem:[#allocation2 + $0x18] sm:$0xfc] }
 0x452   :  { %v1758_v31 = vrot.slane %v1741_v14, 2  ;;  %v7287_v14 = vpack.i.bf16 %v8285_v37, %v1765_v50 }
 0x454   :  { %v1760_v22 = vsel %vm1757_vm6, %v1758_v31, %v8471_v32 }
 0x455   :  { %7203 = vrot.lane.b32.xlu1 %v7202_v43, %s7822_s5  ;;  %7213 = vrot.lane.b32.xlu0 %v7192_v34, %s7811_s28  ;;  %v1703_v34 = vld [vmem:[#allocation2 + $0x80] sm:$0xfe]  ;;  %v7282_v23 = vpack.i.bf16 %v8289_v38, %v1760_v22 }
 0x456   :  { %v1731_v54 = vrot.slane %v1703_v34, 1 }
 0x458   :  { %v1733_v63 = vsel %vm237_vm1, %v1731_v54, %v8306_v53  ;;  %v1782_v54 = vld [vmem:[#allocation2 + $0x20] sm:$0xfc] }
 0x459   :  { %7208 = vrot.lane.b32.xlu1 %v7157_v29, %s7823_s8  ;;  %7223 = vrot.lane.b32.xlu0 %v7182_v33, %s7823_s8  ;;  %v1730_v29 = vsel %vm237_vm1, %v8426_v21, %v1729_v10 }
 0x45a   :  { %v7247_v33 = vpack.i.bf16 %v1730_v29, %v1728_v28 }
 0x45d   :  { %7218 = vrot.lane.b32.xlu1 %v7202_v43, %s7811_s28  ;;  %7233 = vrot.lane.b32.xlu0 %v7232_v55, %s7822_s5  ;;  %v1734_v43 = vrot.slane %v1704_v36, 1 }
 0x45f   :  { %v1736_v5 = vsel %vm237_vm1, %v1734_v43, %v8426_v21  ;;  %v1783_v43 = vld [vmem:[#allocation2 + $0x28] sm:$0xfc] }
 0x460   :  { %v7292_v22 = vpack.i.bf16 %v1736_v5, %v1733_v63  ;;  %v1770_v63 = vsel %vm1757_vm6, %v1768_v52, %v8471_v32  ;;  %v1798_v5 = vrot.slane %v1782_v54, 2 }
 0x461   :  { %7228 = vrot.lane.b32.xlu1 %v7187_v40, %s7823_s8  ;;  %7243 = vrot.lane.b32.xlu0 %v7242_v4, %s7823_s8  ;;  %v8510_v52 = vpack.i.bf16 %v8328_v62, %v1770_v63 }
 0x465   :  { %7238 = vrot.lane.b32.xlu1 %v7237_v61, %s7822_s5  ;;  %7253 = vrot.lane.b32.xlu0 %v7232_v55, %s7811_s28  ;;  %v1708_v55 = vld [vmem:[#allocation2 + $0xb8] sm:$0x1] }
 0x466   :  { %v1739_v29 = vrot.slane %v1708_v55, 1 }
 0x467   :  { %v6974_v8 = vpop.permute.xlu0 %6973 }
 0x468   :  { %v6976_v12 = vunpack.i.h.bf16 %v6974_v8  ;;  %v6975_v46 = vunpack.i.l.bf16 %v6974_v8  ;;  %v1737_v8 = vrot.slane %v1707_v60, 1 }
 0x469   :  { %7248 = vrot.lane.b32.xlu1 %v7247_v33, %s7823_s8  ;;  %7263 = vrot.lane.b32.xlu0 %v7242_v4, %s7819_s4 }
 0x46a   :  { %v1859_v4 = vsel %vm322_vm2, %v6975_v46, %v6976_v12  ;;  %v1738_v60 = vsel %vm237_vm1, %v8306_v53, %v1737_v8 }
 0x46b   :  { %v6984_v40 = vpop.permute.xlu0 %6983 }
 0x46c   :  { %v6986_v0 = vunpack.i.h.bf16 %v6984_v40  ;;  %v6985_v26 = vunpack.i.l.bf16 %v6984_v40 }
 0x46d   :  { %7258 = vrot.lane.b32.xlu1 %v7237_v61, %s7811_s28  ;;  %7273 = vrot.lane.b32.xlu0 %v7282_v23, %s7811_s28 }
 0x46e   :  { %v1835_v36 = vsel %vm1834_vm7, %v6985_v26, %v6986_v0  ;;  %v1801_v0 = vrot.slane %v1783_v43, 2  ;;  %v7482_v43 = vld [vmem:[#allocation9 + $0x110] sm:$0xff]  }
 0x46f   :  { %v6979_v47 = vpop.permute.xlu1 %6978  ;;  %v6994_v24 = vpop.permute.xlu0 %6993 }
 0x470   :  { %v6981_v45 = vunpack.i.h.bf16 %v6979_v47  ;;  %v6980_v49 = vunpack.i.l.bf16 %v6979_v47  ;;  %v6996_v40 = vunpack.i.h.bf16 %v6994_v24  ;;  %v7476_v47 = vld [vmem:[#allocation9 + $0x148] sm:$0xff]  }
 0x471   :  { %7268 = vrot.lane.b32.xlu1 %v7247_v33, %s7819_s4  ;;  %7283 = vrot.lane.b32.xlu0 %v7282_v23, %s7822_s5  ;;  %v6995_v23 = vunpack.i.l.bf16 %v6994_v24  ;;  %v1747_v24 = vld [vmem:[#allocation2 + $0xa8] sm:$0x3] }
 0x472   :  { %v1860_v39 = vsel %vm322_vm2, %v6980_v49, %v6981_v45  ;;  %v1740_v45 = vsel %vm237_vm1, %v8426_v21, %v1739_v29  ;;  %v1774_v8 = vrot.slane %v1747_v24, 2 }
 0x473   :  { %v6989_v10 = vpop.permute.xlu1 %6988  ;;  %v2303_v61 = vpack.c.bf16 %v1860_v39, %v1859_v4  ;;  %v7004_v28 = vpop.permute.xlu0 %7003  ;;  %v1861_v21 = vsel %vm322_vm2, %v6995_v23, %v6996_v40 }
 0x474   :  { %v6991_v31 = vunpack.i.h.bf16 %v6989_v10  ;;  %v6990_v33 = vunpack.i.l.bf16 %v6989_v10  ;;  %v7006_v26 = vunpack.i.h.bf16 %v7004_v28  ;;  %v7005_v4 = vunpack.i.l.bf16 %v7004_v28  ;;  %v1784_v28 = vld [vmem:[#allocation2 + $0x50] sm:$0x3] }
 0x475   :  { %7278 = vrot.lane.b32.xlu1 %v7287_v14, %s7811_s28  ;;  %3984 = vmatprep.mubr.bf16.mxu1 %v2303_v61  ;;  %v7297_v10 = vpack.i.bf16 %v1740_v45, %v1738_v60  ;;  %v7480_v61 = vld [vmem:[#allocation9 + $0x150] sm:$0xff]   ;;  %v7483_v45 = vld [vmem:[#allocation9 + $0x180] sm:$0xff]   ;;  %v1804_v60 = vrot.slane %v1784_v28, 2 }
 0x476   :  { %v1836_v34 = vsel %vm1834_vm7, %v6990_v33, %v6991_v31  ;;  %7293 = vrot.lane.b32.xlu0 %v7292_v22, %s7823_s8  ;;  %v7488_v28 = vld [vmem:[#allocation9 + $0x160] sm:$0xff]  }
 0x477   :  { %v6999_v12 = vpop.permute.xlu1 %6998  ;;  %v2302_v46 = vpack.c.bf16 %v1836_v34, %v1835_v36  ;;  %v8497_v49 = vpop.permute.xlu0 %7013  ;;  %v1785_v34 = vld [vmem:[#allocation2 + $0x58] sm:$0x3]  ;;  %v1803_v36 = vsel %vm1757_vm6, %v1801_v0, %v8471_v32 }
 0x478   :  { %v7001_v50 = vunpack.i.h.bf16 %v6999_v12  ;;  %v7000_v55 = vunpack.i.l.bf16 %v6999_v12  ;;  %v7016_v40 = vunpack.i.h.bf16 %v8497_v49  ;;  %v7015_v23 = vunpack.i.l.bf16 %v8497_v49  ;;  %v1787_v12 = vld [vmem:[#allocation2 + $0x88] sm:$0xfc] }
 0x479   :  { %7288 = vrot.lane.b32.xlu1 %v7287_v14, %s7822_s5  ;;  %3985 = vmatmul.mubr.bf16.vlgmr.msra.gmra.mrb[20].mxu1 %v2302_v46  ;;  %v1775_v49 = vsel %vm1757_vm6, %v8471_v32, %v1774_v8  ;;  %v1806_v0 = vrot.slane %v1785_v34, 2  ;;  %v7487_v8 = vld [vmem:[#allocation9 + $0x188] sm:$0xff]  }
 0x47a   :  { %6055 = vmatpush3.bf16.msra.mxu1 %v7474_v42  ;;  %v1862_v39 = vsel %vm322_vm2, %v7000_v55, %v7001_v50  ;;  %7303 = vrot.lane.b32.xlu0 %v7292_v22, %s7819_s4  ;;  %v1800_v22 = vsel %vm1757_vm6, %v1798_v5, %v8262_v25  ;;  %v1883_v42 = vsel %vm347_vm3, %v7005_v4, %v7006_v26  ;;  %v7484_v50 = vld [vmem:[#allocation9 + $0x158] sm:$0xff]   ;;  %v7486_v5 = vld [vmem:[#allocation9 + $0x1c8] sm:$0xff]   ;;  %v1786_v26 = vld [vmem:[#allocation2 + $0x80] sm:$0xfc] }
 0x47b   :  { %v7009_v53 = vpop.permute.xlu1 %7008  ;;  %6056 = vmatprep.subr.bf16.mxu1 %v7476_v47  ;;  %v2328_v14 = vpack.c.bf16 %v1862_v39, %v1861_v21  ;;  %v8507_v29 = vpop.permute.xlu0 %7023  ;;  %v8528_v4 = vpack.i.bf16 %v1803_v36, %v1800_v22  ;;  %v1811_v21 = vrot.slane %v1787_v12, 2  ;;  %v1808_v11 = vrot.slane %v1786_v26, 2  ;;  %v7490_v36 = vld [vmem:[#allocation9 + $0x1d0] sm:$0xff]  }
 0x47c   :  { %v7011_v31 = vunpack.i.h.bf16 %v7009_v53  ;;  %v7010_v33 = vunpack.i.l.bf16 %v7009_v53  ;;  %v7026_v39 = vunpack.i.h.bf16 %v8507_v29  ;;  %v1837_v53 = vsel %vm1834_vm7, %v7015_v23, %v7016_v40  ;;  %v1788_v40 = vld [vmem:[#allocation2 + $0xb0] sm:$0x3]  ;;  %v1789_v23 = vld [vmem:[#allocation2 + $0xb8] sm:$0x3] }
 0x47d   :  { %7298 = vrot.lane.b32.xlu1 %v7297_v10, %s7823_s8  ;;  %3992 = vmatprep.mubr.bf16.mxu1 %v2328_v14  ;;  %v1807_v22 = vsel %vm1757_vm6, %v8471_v32, %v1806_v0 }
 0x47e   :  { %6057 = vmatpush3.bf16.msra.mxu1 %v7478_v27  ;;  %v1884_v54 = vsel %vm347_vm3, %v7010_v33, %v7011_v31  ;;  %7313 = vrot.lane.b32.xlu0 %v8510_v52, %s7811_s28  ;;  %v7025_v27 = vunpack.i.l.bf16 %v8507_v29  ;;  %v7337_v31 = vpack.i.bf16 %v8347_v16, %v1775_v49  ;;  %v1805_v29 = vsel %vm1757_vm6, %v8262_v25, %v1804_v60 }
 0x47f   :  { %v7019_v46 = vpop.permute.xlu1 %7018  ;;  %6058 = vmatprep.subr.bf16.mxu1 %v7480_v61  ;;  %v2305_v47 = vpack.c.bf16 %v1884_v54, %v1883_v42  ;;  %v8523_v55 = vpop.permute.xlu0 %7033  ;;  %v7485_v61 = vld [vmem:[#allocation9 + $0x118] sm:$0xff]   ;;  %v7489_v42 = vld [vmem:[#allocation9 + $0x120] sm:$0xff]   ;;  %v1813_v25 = vsel %vm1757_vm6, %v1811_v21, %v8471_v32  ;;  %v1814_v49 = vrot.slane %v1788_v40, 2  ;;  %v7493_v21 = vld [vmem:[#allocation9 + $0x128] sm:$0xff]  }
 0x480   :  { %v7021_v24 = vunpack.i.h.bf16 %v7019_v46  ;;  %v7020_v63 = vunpack.i.l.bf16 %v7019_v46  ;;  %v1932_v54 = vsel %vm1834_vm7, %v7025_v27, %v7026_v39  ;;  %v8551_v46 = vpack.i.bf16 %v1807_v22, %v1805_v29 }
 0x481   :  { %7308 = vrot.lane.b32.xlu1 %v7297_v10, %s7819_s4  ;;  %4033 = vmatprep.mubr.bf16.mxu0 %v2305_v47 }
 0x482   :  { %6059 = vmatpush3.bf16.msra.mxu1 %v7482_v43  ;;  %4034 = vmatmul.mubr.bf16.vlgmr.msra.gmra.mrb[24].mxu0 %v2304_v48  ;;  %v1838_v14 = vsel %vm1834_vm7, %v7020_v63, %v7021_v24  ;;  %v1810_v24 = vsel %vm1757_vm6, %v1808_v11, %v8309_v57  ;;  %v7494_v63 = vld [vmem:[#allocation9 + $0x1d8] sm:$0xff]  }
 0x483   :  { %6083 = vmatpush3.bf16.msra.mxu0 %v7483_v45  ;;  %v7029_v10 = vpop.permute.xlu1 %7028  ;;  %6060 = vmatprep.subr.bf16.mxu1 %v7484_v50  ;;  %v2327_v33 = vpack.c.bf16 %v1838_v14, %v1837_v53  ;;  %v7044_v34 = vpop.permute.xlu0 %7043  ;;  %v7491_v45 = vld [vmem:[#allocation9 + $0x190] sm:$0xff]   ;;  %v7492_v50 = vld [vmem:[#allocation9 + $0x168] sm:$0xff]   ;;  %v7342_v39 = vpack.i.bf16 %v1813_v25, %v1810_v24  ;;  %v7495_v53 = vld [vmem:[#allocation9 + $0x198] sm:$0xff]   ;;  %v7035_v25 = vunpack.i.l.bf16 %v8523_v55 }
 0x484   :  { %v7031_v20 = vunpack.i.h.bf16 %v7029_v10  ;;  %v7030_v48 = vunpack.i.l.bf16 %v7029_v10  ;;  %6084 = vmatprep.subr.bf16.mxu0 %v7486_v5  ;;  %7323 = vrot.lane.b32.xlu0 %v8528_v4, %s7819_s4  ;;  %v1816_v5 = vrot.slane %v1789_v23, 2  ;;  %v7046_v0 = vunpack.i.h.bf16 %v7044_v34  ;;  %v7496_v14 = vld [vmem:[#allocation9 + $0x170] sm:$0xff]   ;;  %v7502_v23 = vld [vmem:[#allocation9 + $0x1e8] sm:$0xff]   ;;  %v7504_v24 = vld [vmem:[#allocation9 + $0x240] sm:$0xff]  }
 0x485   :  { %7318 = vrot.lane.b32.xlu1 %v7337_v31, %s7811_s28  ;;  %3993 = vmatmul.mubr.bf16.gmra.mrb[24].mxu1 %v2327_v33  ;;  %v7045_v26 = vunpack.i.l.bf16 %v7044_v34  ;;  %v1815_v33 = vsel %vm1757_vm6, %v8309_v57, %v1814_v49  ;;  %v7499_v57 = vld [vmem:[#allocation9 + $0x1a0] sm:$0xff]   ;;  %v7507_v49 = vld [vmem:[#allocation9 + $0x1b0] sm:$0xff]  }
 0x486   :  { %6061 = vmatpush3.bf16.msra.mxu1 %v7485_v61  ;;  %v1933_v43 = vsel %vm1834_vm7, %v7030_v48, %v7031_v20  ;;  %v7497_v20 = vld [vmem:[#allocation9 + $0x130] sm:$0xff]  }
 0x487   :  { %6085 = vmatpush3.bf16.msra.mxu0 %v7487_v8  ;;  %v8549_v12 = vpop.permute.xlu1 %7038  ;;  %6062 = vmatprep.subr.bf16.mxu1 %v7488_v28  ;;  %v2307_v47 = vpack.c.bf16 %v1933_v43, %v1932_v54  ;;  %v8553_v60 = vpop.permute.xlu0 %7053  ;;  %v1817_v8 = vsel %vm1757_vm6, %v8471_v32, %v1816_v5  ;;  %v7498_v28 = vld [vmem:[#allocation9 + $0x1e0] sm:$0xff]   ;;  %v1885_v34 = vsel %vm347_vm3, %v7045_v26, %v7046_v0  ;;  %v7036_v43 = vunpack.i.h.bf16 %v8523_v55  ;;  %v7508_v5 = vld [vmem:[#allocation9 + $0x248] sm:$0xff]  }
 0x488   :  { %6086 = vmatprep.subr.bf16.mxu0 %v7490_v36  ;;  %7333 = vrot.lane.b32.xlu0 %v8510_v52, %s7822_s5  ;;  %v7347_v29 = vpack.i.bf16 %v1817_v8, %v1815_v33  ;;  %v7041_v32 = vunpack.i.h.bf16 %v8549_v12  ;;  %v7040_v40 = vunpack.i.l.bf16 %v8549_v12  ;;  %v7501_v12 = vld [vmem:[#allocation9 + $0x138] sm:$0xff]   ;;  %v7510_v8 = vld [vmem:[#allocation9 + $0x208] sm:$0xff]  }
 0x489   :  { %7328 = vrot.lane.b32.xlu1 %v8551_v46, %s7819_s4  ;;  %4082 = vmatprep.mubr.bf16.mxu1 %v2307_v47  ;;  %v7056_v47 = vunpack.i.h.bf16 %v8553_v60 }
 0x48a   :  { %6063 = vmatpush3.bf16.msra.mxu1 %v7489_v42 }
 0x48b   :  { %6087 = vmatpush3.bf16.msra.mxu0 %v7491_v45  ;;  %v7049_v27 = vpop.permute.xlu1 %7048  ;;  %6064 = vmatprep.subr.bf16.mxu1 %v7492_v50  ;;  %v8561_v61 = vpop.permute.xlu0 %7063  ;;  %v7503_v50 = vld [vmem:[#allocation9 + $0x1a8] sm:$0xff]  }
 0x48c   :  { %v7051_v52 = vunpack.i.h.bf16 %v7049_v27  ;;  %v7050_v10 = vunpack.i.l.bf16 %v7049_v27  ;;  %6088 = vmatprep.subr.bf16.mxu0 %v7494_v63  ;;  %7343 = vrot.lane.b32.xlu0 %v7342_v39, %s7819_s4  ;;  %v1909_v63 = vsel %vm1907_vm8, %v7040_v40, %v7041_v32  ;;  %v7514_v32 = vld [vmem:[#allocation9 + $0x2c0] sm:$0xff]  }
 0x48d   :  { %7338 = vrot.lane.b32.xlu1 %v7337_v31, %s7822_s5  ;;  %v7500_v31 = vld [vmem:[#allocation9 + $0x178] sm:$0xff]  }
 0x48e   :  { %6065 = vmatpush3.bf16.msra.mxu1 %v7493_v21  ;;  %v1886_v11 = vsel %vm347_vm3, %v7050_v10, %v7051_v52  ;;  %v7065_v52 = vunpack.i.l.bf16 %v8561_v61 }
 0x48f   :  { %6089 = vmatpush3.bf16.msra.mxu0 %v7495_v53  ;;  %v7059_v48 = vpop.permute.xlu1 %7058  ;;  %6066 = vmatprep.subr.bf16.mxu1 %v7496_v14  ;;  %v2330_v22 = vpack.c.bf16 %v1886_v11, %v1885_v34  ;;  %v8571_v36 = vpop.permute.xlu0 %7073  ;;  %v7066_v14 = vunpack.i.h.bf16 %v8561_v61 }
 0x490   :  { %6090 = vmatprep.subr.bf16.mxu0 %v7498_v28  ;;  %7353 = vrot.lane.b32.xlu0 %v8528_v4, %s7823_s8  ;;  %v7061_v42 = vunpack.i.h.bf16 %v7059_v48  ;;  %v7060_v54 = vunpack.i.l.bf16 %v7059_v48  ;;  %v7055_v4 = vunpack.i.l.bf16 %v8553_v60  ;;  %v7076_v28 = vunpack.i.h.bf16 %v8571_v36  ;;  %v7512_v48 = vld [vmem:[#allocation9 + $0x250] sm:$0xff]  }
 0x491   :  { %7348 = vrot.lane.b32.xlu1 %v7347_v29, %s7819_s4  ;;  %4041 = vmatprep.mubr.bf16.mxu0 %v2330_v22  ;;  %v7075_v34 = vunpack.i.l.bf16 %v8571_v36 }
 0x492   :  { %6067 = vmatpush3.bf16.msra.mxu1 %v7497_v20  ;;  %4042 = vmatmul.mubr.bf16.gmra.mrb[28].mxu0 %v2329_v56  ;;  %v1935_v9 = vsel %vm1834_vm7, %v7060_v54, %v7061_v42  ;;  %v1908_v56 = vsel %vm1907_vm8, %v7035_v25, %v7036_v43  ;;  %v1934_v60 = vsel %vm1834_vm7, %v7055_v4, %v7056_v47  ;;  %v7511_v20 = vld [vmem:[#allocation9 + $0x1b8] sm:$0xff]  }
 0x493   :  { %6091 = vmatpush3.bf16.msra.mxu0 %v7499_v57  ;;  %v7069_v45 = vpop.permute.xlu1 %7068  ;;  %4131 = vmatprep.mubr.bf16.mxu0 %v2309_v7  ;;  %v7084_v55 = vpop.permute.xlu0 %7083  ;;  %v2306_v51 = vpack.c.bf16 %v1909_v63, %v1908_v56  ;;  %v2332_v21 = vpack.c.bf16 %v1935_v9, %v1934_v60  ;;  %v1956_v54 = vsel %vm322_vm2, %v7075_v34, %v7076_v28  ;;  %v7519_v56 = vld [vmem:[#allocation9 + $0x288] sm:$0xff]  }
 0x494   :  { %6068 = vmatprep.subr.bf16.mxu1 %v7500_v31  ;;  %6092 = vmatprep.subr.bf16.mxu0 %v7502_v23  ;;  %v7071_v26 = vunpack.i.h.bf16 %v7069_v45  ;;  %v7086_v10 = vunpack.i.h.bf16 %v7084_v55  ;;  %v7085_v33 = vunpack.i.l.bf16 %v7084_v55  ;;  %v1910_v31 = vsel %vm1907_vm8, %v7065_v52, %v7066_v14  ;;  %v7513_v23 = vld [vmem:[#allocation9 + $0x210] sm:$0xff]   ;;  %v7517_v55 = vld [vmem:[#allocation9 + $0x218] sm:$0xff]  }
 0x495   :  { %7358 = vrot.lane.b32.xlu1 %v8551_v46, %s7823_s8  ;;  %7363 = vrot.lane.b32.xlu0 %v7342_v39, %s7823_s8  ;;  %v7070_v46 = vunpack.i.l.bf16 %v7069_v45  ;;  %v7509_v39 = vld [vmem:[#allocation9 + $0x1f8] sm:$0xff]   ;;  %v7515_v45 = vld [vmem:[#allocation9 + $0x280] sm:$0xff]  }
 0x496   :  { %6069 = vmatpush3.bf16.msra.mxu1 %v7501_v12  ;;  %v2004_v36 = vsel %vm1907_vm8, %v7085_v33, %v7086_v10  ;;  %v7525_v33 = vld [vmem:[#allocation9 + $0x228] sm:$0xff]  }
 0x497   :  { %6093 = vmatpush3.bf16.msra.mxu0 %v7503_v50  ;;  %v7079_v7 = vpop.permute.xlu1 %7078  ;;  %6110 = vmatprep.subr.bf16.mxu1 %v7504_v24  ;;  %v8595_v0 = vpop.permute.xlu0 %7093  ;;  %v1911_v61 = vsel %vm1907_vm8, %v7070_v46, %v7071_v26  ;;  %v7516_v50 = vld [vmem:[#allocation9 + $0x258] sm:$0xff]   ;;  %v7518_v24 = vld [vmem:[#allocation9 + $0x2c8] sm:$0xff]  }
 0x498   :  { %6094 = vmatprep.subr.bf16.mxu0 %v7505_v2  ;;  %v7081_v27 = vunpack.i.h.bf16 %v7079_v7  ;;  %v7080_v53 = vunpack.i.l.bf16 %v7079_v7  ;;  %v2331_v25 = vpack.c.bf16 %v1911_v61, %v1910_v31  ;;  %v7520_v2 = vld [vmem:[#allocation9 + $0x260] sm:$0xff]   ;;  %v7522_v7 = vld [vmem:[#allocation9 + $0x2d0] sm:$0xff]  }
 0x499   :  { %4083 = vmatmul.mubr.bf16.vlgmr.msra.gmra.mrb[28].mxu1 %v2306_v51  ;;  %7368 = vrot.lane.b32.xlu1 %v7347_v29, %s7823_s8 }
 0x49a   :  { %4090 = vmatprep.mubr.bf16.mxu1 %v2332_v21  ;;  %6111 = vmatpush3.bf16.msra.mxu1 %v7506_v41  ;;  %v1957_v40 = vsel %vm322_vm2, %v7080_v53, %v7081_v27  ;;  %v7523_v27 = vld [vmem:[#allocation9 + $0x290] sm:$0xff]   ;;  %v7526_v53 = vld [vmem:[#allocation9 + $0x2d8] sm:$0xff]  }
 0x49b   :  { %6095 = vmatpush3.bf16.msra.mxu0 %v7507_v49  ;;  %v7089_v11 = vpop.permute.xlu1 %7088  ;;  %6112 = vmatprep.subr.bf16.mxu1 %v7508_v5  ;;  %v8602_v22 = vpop.permute.xlu0 %7103  ;;  %v2308_v4 = vpack.c.bf16 %v1957_v40, %v1956_v54  ;;  %v7521_v5 = vld [vmem:[#allocation9 + $0x220] sm:$0xff]  }
 0x49c   :  { %v7091_v29 = vunpack.i.h.bf16 %v7089_v11  ;;  %v7090_v57 = vunpack.i.l.bf16 %v7089_v11  ;;  %6096 = vmatprep.subr.bf16.mxu0 %v7509_v39  ;;  %v7106_v26 = vunpack.i.h.bf16 %v8602_v22  ;;  %v7105_v58 = vunpack.i.l.bf16 %v8602_v22  ;;  %v7528_v11 = vld [vmem:[#allocation9 + $0x270] sm:$0xff]  }
 0x49e   :  { %6113 = vmatpush3.bf16.msra.mxu1 %v7510_v8  ;;  %v2005_v42 = vsel %vm1907_vm8, %v7090_v57, %v7091_v29  ;;  %v2052_v34 = vsel %vm322_vm2, %v7105_v58, %v7106_v26  ;;  %v7530_v29 = vld [vmem:[#allocation9 + $0x2e0] sm:$0xff]   ;;  %v7529_v57 = vld [vmem:[#allocation9 + $0x230] sm:$0xff]  }
 0x49f   :  { %6097 = vmatpush3.bf16.msra.mxu0 %v7511_v20  ;;  %v8610_v43 = vpop.permute.xlu1 %7098  ;;  %6114 = vmatprep.subr.bf16.mxu1 %v7512_v48  ;;  %v2311_v12 = vpack.c.bf16 %v2005_v42, %v2004_v36  ;;  %v7114_v47 = vpop.permute.xlu0 %7113  ;;  %v7527_v48 = vld [vmem:[#allocation9 + $0x298] sm:$0xff]   ;;  %v7531_v36 = vld [vmem:[#allocation9 + $0x2a0] sm:$0xff]  }
 0x4a0   :  { %6138 = vmatprep.subr.bf16.mxu0 %v7514_v32  ;;  %v7116_v60 = vunpack.i.h.bf16 %v7114_v47  ;;  %v7115_v49 = vunpack.i.l.bf16 %v7114_v47  ;;  %v7532_v32 = vld [vmem:[#allocation9 + $0x278] sm:$0xff]   ;;  %v7101_v31 = vunpack.i.h.bf16 %v8610_v43  ;;  %v7095_v47 = vunpack.i.l.bf16 %v8595_v0 }
 0x4a1   :  { %4091 = vmatmul.mubr.bf16.gmra.mrb[32].mxu1 %v2331_v25  ;;  %v7534_v25 = vld [vmem:[#allocation9 + $0x2e8] sm:$0xff]  }
 0x4a2   :  { %4132 = vmatmul.mubr.bf16.vlgmr.msra.gmra.mrb[32].mxu0 %v2308_v4  ;;  %6115 = vmatpush3.bf16.msra.mxu1 %v7513_v23  ;;  %v1958_v52 = vsel %vm322_vm2, %v7115_v49, %v7116_v60  ;;  %v7100_v23 = vunpack.i.l.bf16 %v8610_v43  ;;  %v7533_v4 = vld [vmem:[#allocation9 + $0x238] sm:$0xff]   ;;  %v7540_v49 = vld [vmem:[#allocation9 + $0x348] sm:$0xff]  }
 0x4a3   :  { %4180 = vmatprep.mubr.bf16.mxu1 %v2311_v12  ;;  %4139 = vmatprep.mubr.bf16.mxu0 %v2334_v17  ;;  %v7109_v63 = vpop.permute.xlu1 %7108  ;;  %v8615_v9 = vpop.permute.xlu0 %7123  ;;  %v7524_v17 = vld [vmem:[#allocation9 + $0x268] sm:$0xff]   ;;  %v7096_v12 = vunpack.i.h.bf16 %v8595_v0 }
 0x4a4   :  { %6139 = vmatpush3.bf16.msra.mxu0 %v7515_v45  ;;  %6116 = vmatprep.subr.bf16.mxu1 %v7516_v50  ;;  %v7111_v41 = vunpack.i.h.bf16 %v7109_v63  ;;  %v7110_v51 = vunpack.i.l.bf16 %v7109_v63  ;;  %v7126_v45 = vunpack.i.h.bf16 %v8615_v9  ;;  %v7125_v50 = vunpack.i.l.bf16 %v8615_v9 }
 0x4a5   :  { %6140 = vmatprep.subr.bf16.mxu0 %v7518_v24  ;;  %v1981_v63 = vsel %vm347_vm3, %v7100_v23, %v7101_v31  ;;  %v1980_v0 = vsel %vm347_vm3, %v7095_v47, %v7096_v12  ;;  %v7543_v31 = vld [vmem:[#allocation9 + $0x2b8] sm:$0xff]  }
 0x4a6   :  { %6117 = vmatpush3.bf16.msra.mxu1 %v7517_v55  ;;  %v2053_v14 = vsel %vm322_vm2, %v7110_v51, %v7111_v41  ;;  %v7536_v55 = vld [vmem:[#allocation9 + $0x340] sm:$0xff]   ;;  %v7537_v41 = vld [vmem:[#allocation9 + $0x2f0] sm:$0xff]   ;;  %v2006_v9 = vsel %vm1907_vm8, %v7125_v50, %v7126_v45  ;;  %v7548_v50 = vld [vmem:[#allocation9 + $0x358] sm:$0xff]  }
 0x4a7   :  { %v7119_v6 = vpop.permute.xlu1 %7118  ;;  %6118 = vmatprep.subr.bf16.mxu1 %v7520_v2  ;;  %v8619_v46 = vpop.permute.xlu0 %7133  ;;  %v2313_v22 = vpack.c.bf16 %v2053_v14, %v2052_v34  ;;  %v7535_v2 = vld [vmem:[#allocation9 + $0x2a8] sm:$0xff]   ;;  %v7538_v51 = vld [vmem:[#allocation9 + $0x300] sm:$0xff]  }
 0x4a8   :  { %6141 = vmatpush3.bf16.msra.mxu0 %v7519_v56  ;;  %v7121_v21 = vunpack.i.h.bf16 %v7119_v6  ;;  %v7120_v39 = vunpack.i.l.bf16 %v7119_v6  ;;  %v7135_v14 = vunpack.i.l.bf16 %v8619_v46 }
 0x4a9   :  { %6142 = vmatprep.subr.bf16.mxu0 %v7522_v7  ;;  %v2310_v7 = vpack.c.bf16 %v1981_v63, %v1980_v0 }
 0x4aa   :  { %6119 = vmatpush3.bf16.msra.mxu1 %v7521_v5  ;;  %v1959_v10 = vsel %vm322_vm2, %v7120_v39, %v7121_v21  ;;  %v7136_v21 = vunpack.i.h.bf16 %v8619_v46 }
 0x4ab   :  { %v7129_v8 = vpop.permute.xlu1 %7128  ;;  %6120 = vmatprep.subr.bf16.mxu1 %v7524_v17  ;;  %v2333_v28 = vpack.c.bf16 %v1959_v10, %v1958_v52  ;;  %v8625_v20 = vpop.permute.xlu0 %7138  ;;  %v7539_v17 = vld [vmem:[#allocation9 + $0x2b0] sm:$0xff]  }
 0x4ac   :  { %6143 = vmatpush3.bf16.msra.mxu0 %v7523_v27  ;;  %v7131_v42 = vunpack.i.h.bf16 %v7129_v8  ;;  %v7130_v54 = vunpack.i.l.bf16 %v7129_v8  ;;  %v7542_v8 = vld [vmem:[#allocation9 + $0x308] sm:$0xff]   ;;  %v7140_v46 = vunpack.i.l.bf16 %v8625_v20 }
 0x4ad   :  { %4140 = vmatmul.mubr.bf16.gmra.mrb[36].mxu0 %v2333_v28  ;;  %6144 = vmatprep.subr.bf16.mxu0 %v7526_v53  ;;  %v7541_v53 = vld [vmem:[#allocation9 + $0x2f8] sm:$0xff]  }
 0x4ae   :  { %6121 = vmatpush3.bf16.msra.mxu1 %v7525_v33  ;;  %4229 = vmatprep.mubr.bf16.mxu0 %v2313_v22  ;;  %v2007_v56 = vsel %vm1907_vm8, %v7130_v54, %v7131_v42  ;;  %v7141_v33 = vunpack.i.h.bf16 %v8625_v20  ;;  %v7546_v42 = vld [vmem:[#allocation9 + $0x3c0] sm:$0xff]   ;;  %v1982_v54 = vsel %vm347_vm3, %v7135_v14, %v7136_v21 }
 0x4af   :  { %v8627_v61 = vpop.permute.xlu1 %7143  ;;  %6122 = vmatprep.subr.bf16.mxu1 %v7528_v11  ;;  %v8629_v40 = vpop.permute.xlu0 %7153  ;;  %v2336_v6 = vpack.c.bf16 %v2007_v56, %v2006_v9  ;;  %v7552_v9 = vld [vmem:[#allocation9 + $0x360] sm:$0xff]  }
 0x4b0   :  { %6145 = vmatpush3.bf16.msra.mxu0 %v7527_v48  ;;  %v7146_v26 = vunpack.i.h.bf16 %v8627_v61  ;;  %v7145_v58 = vunpack.i.l.bf16 %v8627_v61  ;;  %v7156_v28 = vunpack.i.h.bf16 %v8629_v40  ;;  %v7155_v34 = vunpack.i.l.bf16 %v8629_v40 }
 0x4b1   :  { %6146 = vmatprep.subr.bf16.mxu0 %v7530_v29  ;;  %v7544_v29 = vld [vmem:[#allocation9 + $0x350] sm:$0xff]  }
 0x4b2   :  { %6123 = vmatpush3.bf16.msra.mxu1 %v7529_v57  ;;  %v1983_v23 = vsel %vm347_vm3, %v7145_v58, %v7146_v26 }
 0x4b3   :  { %v7149_v24 = vpop.permute.xlu1 %7148  ;;  %6124 = vmatprep.subr.bf16.mxu1 %v7532_v32  ;;  %v7164_v43 = vpop.permute.xlu0 %7163  ;;  %v2335_v20 = vpack.c.bf16 %v1983_v23, %v1982_v54  ;;  %v7559_v23 = vld [vmem:[#allocation9 + $0x398] sm:$0xff]  }
 0x4b4   :  { %6147 = vmatpush3.bf16.msra.mxu0 %v7531_v36  ;;  %v7151_v52 = vunpack.i.h.bf16 %v7149_v24  ;;  %v7150_v10 = vunpack.i.l.bf16 %v7149_v24  ;;  %v7166_v48 = vunpack.i.h.bf16 %v7164_v43  ;;  %v7165_v22 = vunpack.i.l.bf16 %v7164_v43  ;;  %v7564_v54 = vld [vmem:[#allocation9 + $0x378] sm:$0xff]  }
 0x4b5   :  { %6148 = vmatprep.subr.bf16.mxu0 %v7534_v25  ;;  %v7545_v25 = vld [vmem:[#allocation9 + $0x310] sm:$0xff]  }
 0x4b6   :  { %6125 = vmatpush3.bf16.msra.mxu1 %v7533_v4  ;;  %v2029_v40 = vsel %vm1834_vm7, %v7150_v10, %v7151_v52  ;;  %v2078_v4 = vsel %vm347_vm3, %v7155_v34, %v7156_v28  ;;  %v2054_v45 = vsel %vm322_vm2, %v7165_v22, %v7166_v48  ;;  %v7556_v52 = vld [vmem:[#allocation9 + $0x368] sm:$0xff]   ;;  %v7555_v28 = vld [vmem:[#allocation9 + $0x390] sm:$0xff]  }
 0x4b7   :  { %v7159_v60 = vpop.permute.xlu1 %7158  ;;  %6166 = vmatprep.subr.bf16.mxu1 %v7536_v55  ;;  %v8641_v5 = vpop.permute.xlu0 %7173  ;;  %v2028_v55 = vsel %vm1834_vm7, %v7140_v46, %v7141_v33  ;;  %v7557_v48 = vld [vmem:[#allocation9 + $0x328] sm:$0xff]  }
 0x4b8   :  { %6149 = vmatpush3.bf16.msra.mxu0 %v7535_v2  ;;  %v7161_v39 = vunpack.i.h.bf16 %v7159_v60  ;;  %v7160_v27 = vunpack.i.l.bf16 %v7159_v60  ;;  %v7547_v2 = vld [vmem:[#allocation9 + $0x380] sm:$0xff]   ;;  %v2312_v56 = vpack.c.bf16 %v2029_v40, %v2028_v55  ;;  %v7176_v26 = vunpack.i.h.bf16 %v8641_v5 }
 0x4b9   :  { %4181 = vmatmul.mubr.bf16.vlgmr.msra.gmra.mrb[36].mxu1 %v2310_v7  ;;  %6150 = vmatprep.subr.bf16.mxu0 %v7537_v41  ;;  %v7550_v41 = vld [vmem:[#allocation9 + $0x3c8] sm:$0xff]   ;;  %v7549_v7 = vld [vmem:[#allocation9 + $0x318] sm:$0xff]   ;;  %v7175_v58 = vunpack.i.l.bf16 %v8641_v5 }
 0x4ba   :  { %4188 = vmatprep.mubr.bf16.mxu1 %v2336_v6  ;;  %6167 = vmatpush3.bf16.msra.mxu1 %v7538_v51  ;;  %v2079_v36 = vsel %vm347_vm3, %v7160_v27, %v7161_v39  ;;  %v7551_v6 = vld [vmem:[#allocation9 + $0x388] sm:$0xff]  }
 0x4bb   :  { %v7169_v11 = vpop.permute.xlu1 %7168  ;;  %6168 = vmatprep.subr.bf16.mxu1 %v7540_v49  ;;  %v8650_v57 = vpop.permute.xlu0 %7183  ;;  %v2315_v43 = vpack.c.bf16 %v2079_v36, %v2078_v4  ;;  %v2030_v5 = vsel %vm1834_vm7, %v7175_v58, %v7176_v26  ;;  %v7562_v36 = vld [vmem:[#allocation9 + $0x3e0] sm:$0xff]   ;;  %v7566_v4 = vld [vmem:[#allocation9 + $0x3e8] sm:$0xff]  }
 0x4bc   :  { %6151 = vmatpush3.bf16.msra.mxu0 %v7539_v17  ;;  %v7171_v61 = vunpack.i.h.bf16 %v7169_v11  ;;  %v7170_v32 = vunpack.i.l.bf16 %v7169_v11  ;;  %v7554_v17 = vld [vmem:[#allocation9 + $0x3d0] sm:$0xff]   ;;  %v7558_v11 = vld [vmem:[#allocation9 + $0x3d8] sm:$0xff]   ;;  %v7572_v26 = vld [vmem:[#allocation9 + $0x448] sm:$0xff]  }
 0x4bd   :  { %6152 = vmatprep.subr.bf16.mxu0 %v7541_v53  ;;  %v7553_v53 = vld [vmem:[#allocation9 + $0x320] sm:$0xff]  }
 0x4be   :  { %6169 = vmatpush3.bf16.msra.mxu1 %v7542_v8  ;;  %v2055_v12 = vsel %vm322_vm2, %v7170_v32, %v7171_v61  ;;  %v7560_v32 = vld [vmem:[#allocation9 + $0x370] sm:$0xff]  }
 0x4bf   :  { %v7179_v47 = vpop.permute.xlu1 %7178  ;;  %6170 = vmatprep.subr.bf16.mxu1 %v7544_v29  ;;  %v7194_v24 = vpop.permute.xlu0 %7193  ;;  %v2338_v63 = vpack.c.bf16 %v2055_v12, %v2054_v45  ;;  %v7563_v12 = vld [vmem:[#allocation9 + $0x3a0] sm:$0xff]   ;;  %v7565_v45 = vld [vmem:[#allocation9 + $0x338] sm:$0xff]  }
 0x4c0   :  { %6153 = vmatpush3.bf16.msra.mxu0 %v7543_v31  ;;  %v7181_v0 = vunpack.i.h.bf16 %v7179_v47  ;;  %v7180_v51 = vunpack.i.l.bf16 %v7179_v47  ;;  %v7196_v21 = vunpack.i.h.bf16 %v7194_v24  ;;  %v7195_v39 = vunpack.i.l.bf16 %v7194_v24 }
 0x4c1   :  { %4189 = vmatmul.mubr.bf16.gmra.mrb[40].mxu1 %v2335_v20  ;;  %6194 = vmatprep.subr.bf16.mxu0 %v7546_v42  ;;  %v7561_v42 = vld [vmem:[#allocation9 + $0x330] sm:$0xff]   ;;  %v7185_v24 = vunpack.i.l.bf16 %v8650_v57 }
 0x4c2   :  { %6171 = vmatpush3.bf16.msra.mxu1 %v7545_v25  ;;  %4278 = vmatprep.mubr.bf16.mxu1 %v2315_v43  ;;  %v2031_v27 = vsel %vm1834_vm7, %v7180_v51, %v7181_v0  ;;  %v2126_v22 = vsel %vm1834_vm7, %v7195_v39, %v7196_v21  ;;  %v7568_v43 = vld [vmem:[#allocation9 + $0x440] sm:$0xff]   ;;  %v7573_v21 = vld [vmem:[#allocation9 + $0x3f8] sm:$0xff]  }
 0x4c3   :  { %4230 = vmatmul.mubr.bf16.vlgmr.msra.gmra.mrb[40].mxu0 %v2312_v56  ;;  %v8661_v60 = vpop.permute.xlu1 %7188  ;;  %6172 = vmatprep.subr.bf16.mxu1 %v7548_v50  ;;  %v8663_v49 = vpop.permute.xlu0 %7198  ;;  %v2337_v34 = vpack.c.bf16 %v2031_v27, %v2030_v5  ;;  %v7186_v50 = vunpack.i.h.bf16 %v8650_v57  ;;  %v7570_v0 = vld [vmem:[#allocation9 + $0x400] sm:$0xff]  }
 0x4c4   :  { %4237 = vmatprep.mubr.bf16.mxu0 %v2338_v63  ;;  %6195 = vmatpush3.bf16.msra.mxu0 %v7547_v2  ;;  %v7191_v47 = vunpack.i.h.bf16 %v8661_v60  ;;  %v7190_v20 = vunpack.i.l.bf16 %v8661_v60  ;;  %v7567_v2 = vld [vmem:[#allocation9 + $0x3a8] sm:$0xff]   ;;  %v7660_v60 = vld [vmem:[#allocation2 + $0x38] sm:$0xff]  ;;  %v7201_v5 = vunpack.i.h.bf16 %v8663_v49 }
 0x4c5   :  { %6196 = vmatprep.subr.bf16.mxu0 %v7550_v41  ;;  %v7569_v41 = vld [vmem:[#allocation9 + $0x3f0] sm:$0xff]   ;;  %v2080_v57 = vsel %vm347_vm3, %v7185_v24, %v7186_v50 }
 0x4c6   :  { %6173 = vmatpush3.bf16.msra.mxu1 %v7549_v7  ;;  %v2081_v56 = vsel %vm347_vm3, %v7190_v20, %v7191_v47  ;;  %v7659_v7 = vld [vmem:[#allocation2 + $0x20] sm:$0xff] }
 0x4c7   :  { %v7204_v14 = vpop.permute.xlu1 %7203  ;;  %6174 = vmatprep.subr.bf16.mxu1 %v7552_v9  ;;  %v8668_v10 = vpop.permute.xlu0 %7213  ;;  %v2314_v9 = vpack.c.bf16 %v7660_v60, %v7659_v7  ;;  %v2340_v58 = vpack.c.bf16 %v2081_v56, %v2080_v57  ;;  %v7585_v57 = vld [vmem:[#allocation9 + $0x420] sm:$0xff]  }
 0x4c8   :  { %6197 = vmatpush3.bf16.msra.mxu0 %v7551_v6  ;;  %v7206_v33 = vunpack.i.h.bf16 %v7204_v14  ;;  %v7205_v8 = vunpack.i.l.bf16 %v7204_v14  ;;  %v7571_v6 = vld [vmem:[#allocation9 + $0x3b0] sm:$0xff]  }
 0x4c9   :  { %6198 = vmatprep.subr.bf16.mxu0 %v7554_v17 }
 0x4ca   :  { %6175 = vmatpush3.bf16.msra.mxu1 %v7553_v53  ;;  %v2127_v29 = vsel %vm1834_vm7, %v7205_v8, %v7206_v33  ;;  %v7574_v53 = vld [vmem:[#allocation9 + $0x408] sm:$0xff]   ;;  %v7576_v8 = vld [vmem:[#allocation9 + $0x450] sm:$0xff]  }
 0x4cb   :  { %4238 = vmatmul.mubr.bf16.gmra.mrb[44].mxu0 %v2337_v34  ;;  %v8673_v46 = vpop.permute.xlu1 %7208  ;;  %6176 = vmatprep.subr.bf16.mxu1 %v7556_v52  ;;  %v2317_v61 = vpack.c.bf16 %v2127_v29, %v2126_v22  ;;  %v8675_v31 = vpop.permute.xlu0 %7223  ;;  %v7575_v34 = vld [vmem:[#allocation9 + $0x3b8] sm:$0xff]   ;;  %v7578_v22 = vld [vmem:[#allocation9 + $0x4c0] sm:$0xff]  }
 0x4cc   :  { %6199 = vmatpush3.bf16.msra.mxu0 %v7555_v28  ;;  %v7211_v39 = vunpack.i.h.bf16 %v8673_v46  ;;  %v7210_v27 = vunpack.i.l.bf16 %v8673_v46  ;;  %v7200_v28 = vunpack.i.l.bf16 %v8663_v49  ;;  %v7577_v46 = vld [vmem:[#allocation9 + $0x410] sm:$0xff]   ;;  %v7225_v7 = vunpack.i.l.bf16 %v8675_v31 }
 0x4cd   :  { %6200 = vmatprep.subr.bf16.mxu0 %v7558_v11  ;;  %4327 = vmatprep.mubr.bf16.mxu0 %v2317_v61 }
 0x4ce   :  { %6177 = vmatpush3.bf16.msra.mxu1 %v7557_v48  ;;  %v2103_v29 = vsel %vm1907_vm8, %v7210_v27, %v7211_v39  ;;  %v7590_v27 = vld [vmem:[#allocation9 + $0x4d8] sm:$0xff]  }
 0x4cf   :  { %v8677_v40 = vpop.permute.xlu1 %7218  ;;  %6178 = vmatprep.subr.bf16.mxu1 %v7560_v32  ;;  %v8679_v25 = vpop.permute.xlu0 %7233 }
 0x4d0   :  { %6201 = vmatpush3.bf16.msra.mxu0 %v7559_v23  ;;  %v7236_v11 = vunpack.i.h.bf16 %v8679_v25  ;;  %v7235_v48 = vunpack.i.l.bf16 %v8679_v25  ;;  %v7661_v23 = vld [vmem:[#allocation2 + $0x80] sm:$0xff] }
 0x4d1   :  { %6202 = vmatprep.subr.bf16.mxu0 %v7562_v36  ;;  %v7662_v36 = vld [vmem:[#allocation2 + $0x98] sm:$0xff]  ;;  %v7579_v25 = vld [vmem:[#allocation9 + $0x480] sm:$0xff]  }
 0x4d2   :  { %6179 = vmatpush3.bf16.msra.mxu1 %v7561_v42  ;;  %v2339_v42 = vpack.c.bf16 %v7662_v36, %v7661_v23  ;;  %v2128_v20 = vsel %vm1834_vm7, %v7235_v48, %v7236_v11  ;;  %v7596_v48 = vld [vmem:[#allocation9 + $0x478] sm:$0xff]   ;;  %v7595_v23 = vld [vmem:[#allocation9 + $0x4a0] sm:$0xff]   ;;  %v7598_v36 = vld [vmem:[#allocation9 + $0x4e8] sm:$0xff]  }
 0x4d3   :  { %v8685_v55 = vpop.permute.xlu1 %7228  ;;  %6180 = vmatprep.subr.bf16.mxu1 %v7564_v54  ;;  %v8687_v63 = vpop.permute.xlu0 %7243  ;;  %v7580_v54 = vld [vmem:[#allocation9 + $0x458] sm:$0xff]  }
 0x4d4   :  { %6203 = vmatpush3.bf16.msra.mxu0 %v7563_v12  ;;  %v2102_v12 = vsel %vm1907_vm8, %v7200_v28, %v7201_v5  ;;  %v7230_v50 = vunpack.i.l.bf16 %v8685_v55  ;;  %v7246_v30 = vunpack.i.h.bf16 %v8687_v63  ;;  %v7245_v13 = vunpack.i.l.bf16 %v8687_v63  ;;  %v7591_v5 = vld [vmem:[#allocation9 + $0x498] sm:$0xff]   ;;  %v7594_v28 = vld [vmem:[#allocation9 + $0x4e0] sm:$0xff]  }
 0x4d5   :  { %6204 = vmatprep.subr.bf16.mxu0 %v7566_v4  ;;  %v2316_v47 = vpack.c.bf16 %v2103_v29, %v2102_v12  ;;  %v7582_v4 = vld [vmem:[#allocation9 + $0x4c8] sm:$0xff]   ;;  %v7220_v29 = vunpack.i.l.bf16 %v8677_v40  ;;  %v7600_v12 = vld [vmem:[#allocation9 + $0x540] sm:$0xff]  }
 0x4d6   :  { %6181 = vmatpush3.bf16.msra.mxu1 %v7565_v45  ;;  %v7231_v45 = vunpack.i.h.bf16 %v8685_v55  ;;  %v7583_v55 = vld [vmem:[#allocation9 + $0x488] sm:$0xff]   ;;  %v2198_v63 = vsel %vm1907_vm8, %v7245_v13, %v7246_v30 }
 0x4d7   :  { %v7239_v51 = vpop.permute.xlu1 %7238  ;;  %6222 = vmatprep.subr.bf16.mxu1 %v7568_v43  ;;  %v8691_v17 = vpop.permute.xlu0 %7253  ;;  %v7581_v43 = vld [vmem:[#allocation9 + $0x418] sm:$0xff]  }
 0x4d8   :  { %6205 = vmatpush3.bf16.msra.mxu0 %v7567_v2  ;;  %v7241_v14 = vunpack.i.h.bf16 %v7239_v51  ;;  %v7240_v52 = vunpack.i.l.bf16 %v7239_v51  ;;  %v7226_v51 = vunpack.i.h.bf16 %v8675_v31  ;;  %v7255_v30 = vunpack.i.l.bf16 %v8691_v17 }
 0x4d9   :  { %4279 = vmatmul.mubr.bf16.vlgmr.msra.gmra.mrb[44].mxu1 %v2314_v9  ;;  %6206 = vmatprep.subr.bf16.mxu0 %v7569_v41  ;;  %v2105_v9 = vsel %vm1907_vm8, %v7230_v50, %v7231_v45  ;;  %v7602_v50 = vld [vmem:[#allocation9 + $0x500] sm:$0xff]  }
 0x4da   :  { %4286 = vmatprep.mubr.bf16.mxu1 %v2340_v58  ;;  %6223 = vmatpush3.bf16.msra.mxu1 %v7570_v0  ;;  %v2129_v49 = vsel %vm1834_vm7, %v7240_v52, %v7241_v14  ;;  %v7584_v0 = vld [vmem:[#allocation9 + $0x460] sm:$0xff]   ;;  %v7588_v58 = vld [vmem:[#allocation9 + $0x468] sm:$0xff]  }
 0x4db   :  { %v7249_v33 = vpop.permute.xlu1 %7248  ;;  %6224 = vmatprep.subr.bf16.mxu1 %v7572_v26  ;;  %v8700_v61 = vpop.permute.xlu0 %7263  ;;  %v2342_v24 = vpack.c.bf16 %v2129_v49, %v2128_v20  ;;  %v7589_v52 = vld [vmem:[#allocation9 + $0x428] sm:$0xff]   ;;  %v7215_v49 = vunpack.i.l.bf16 %v8668_v10  ;;  %v7601_v20 = vld [vmem:[#allocation9 + $0x4f0] sm:$0xff]  }
 0x4dc   :  { %6207 = vmatpush3.bf16.msra.mxu0 %v7571_v6  ;;  %v7251_v2 = vunpack.i.h.bf16 %v7249_v33  ;;  %v7250_v56 = vunpack.i.l.bf16 %v7249_v33  ;;  %v2104_v6 = vsel %vm1907_vm8, %v7225_v7, %v7226_v51  ;;  %v7605_v7 = vld [vmem:[#allocation9 + $0x4f8] sm:$0xff]  }
 0x4dd   :  { %6208 = vmatprep.subr.bf16.mxu0 %v7573_v21  ;;  %v7587_v21 = vld [vmem:[#allocation9 + $0x490] sm:$0xff]   ;;  %v2341_v39 = vpack.c.bf16 %v2105_v9, %v2104_v6  ;;  %v7265_v6 = vunpack.i.l.bf16 %v8700_v61 }
 0x4de   :  { %6225 = vmatpush3.bf16.msra.mxu1 %v7574_v53  ;;  %v2199_v31 = vsel %vm1907_vm8, %v7250_v56, %v7251_v2  ;;  %v7603_v56 = vld [vmem:[#allocation9 + $0x4b0] sm:$0xff]  }
 0x4df   :  { %v8702_v32 = vpop.permute.xlu1 %7258  ;;  %6226 = vmatprep.subr.bf16.mxu1 %v7576_v8  ;;  %v8716_v60 = vpop.permute.xlu0 %7273  ;;  %v2321_v53 = vpack.c.bf16 %v2199_v31, %v2198_v63  ;;  %v7592_v8 = vld [vmem:[#allocation9 + $0x470] sm:$0xff]   ;;  %v7610_v63 = vld [vmem:[#allocation9 + $0x5c0] sm:$0xff]  }
 0x4e0   :  { %6209 = vmatpush3.bf16.msra.mxu0 %v7575_v34  ;;  %v7593_v34 = vld [vmem:[#allocation9 + $0x430] sm:$0xff]   ;;  %v7260_v2 = vunpack.i.l.bf16 %v8702_v32 }
 0x4e1   :  { %4287 = vmatmul.mubr.bf16.gmra.mrb[48].mxu1 %v2339_v42  ;;  %6250 = vmatprep.subr.bf16.mxu0 %v7578_v22  ;;  %v7221_v22 = vunpack.i.h.bf16 %v8677_v40  ;;  %v7216_v42 = vunpack.i.h.bf16 %v8668_v10  ;;  %v7599_v40 = vld [vmem:[#allocation9 + $0x4a8] sm:$0xff]  }
 0x4e2   :  { %6227 = vmatpush3.bf16.msra.mxu1 %v7577_v46  ;;  %4376 = vmatprep.mubr.bf16.mxu1 %v2319_v19  ;;  %v7586_v19 = vld [vmem:[#allocation9 + $0x4d0] sm:$0xff]   ;;  %v7604_v10 = vld [vmem:[#allocation9 + $0x548] sm:$0xff]  }
 0x4e3   :  { %4328 = vmatmul.mubr.bf16.vlgmr.msra.gmra.mrb[48].mxu0 %v2316_v47  ;;  %v8712_v41 = vpop.permute.xlu1 %7268  ;;  %6228 = vmatprep.subr.bf16.mxu1 %v7580_v54  ;;  %v8726_v14 = vpop.permute.xlu0 %7283  ;;  %v7597_v54 = vld [vmem:[#allocation9 + $0x438] sm:$0xff]  }
 0x4e4   :  { %4335 = vmatprep.mubr.bf16.mxu0 %v2342_v24  ;;  %6251 = vmatpush3.bf16.msra.mxu0 %v7579_v25  ;;  %v2151_v25 = vsel %vm322_vm2, %v7220_v29, %v7221_v22  ;;  %v7271_v13 = vunpack.i.h.bf16 %v8712_v41  ;;  %v7611_v22 = vld [vmem:[#allocation9 + $0x580] sm:$0xff]  }
 0x4e5   :  { %6252 = vmatprep.subr.bf16.mxu0 %v7582_v4  ;;  %v2150_v4 = vsel %vm322_vm2, %v7215_v49, %v7216_v42 }
 0x4e6   :  { %6229 = vmatpush3.bf16.msra.mxu1 %v7581_v43  ;;  %v2318_v24 = vpack.c.bf16 %v2151_v25, %v2150_v4  ;;  %v7261_v43 = vunpack.i.h.bf16 %v8702_v32  ;;  %v7606_v32 = vld [vmem:[#allocation9 + $0x508] sm:$0xff]  }
 0x4e7   :  { %v8721_v26 = vpop.permute.xlu1 %7278  ;;  %6230 = vmatprep.subr.bf16.mxu1 %v7584_v0 }
 0x4e8   :  { %6253 = vmatpush3.bf16.msra.mxu0 %v7583_v55  ;;  %v8734_v46 = vpop.permute.xlu0 %7293  ;;  %v7281_v0 = vunpack.i.h.bf16 %v8721_v26  ;;  %v7280_v51 = vunpack.i.l.bf16 %v8721_v26  ;;  %v7256_v55 = vunpack.i.h.bf16 %v8691_v17  ;;  %v7275_v26 = vunpack.i.l.bf16 %v8716_v60 }
 0x4e9   :  { %6254 = vmatprep.subr.bf16.mxu0 %v7586_v19  ;;  %v7270_v19 = vunpack.i.l.bf16 %v8712_v41  ;;  %v7266_v41 = vunpack.i.h.bf16 %v8700_v61  ;;  %v2153_v15 = vsel %vm322_vm2, %v7260_v2, %v7261_v43  ;;  %v7609_v61 = vld [vmem:[#allocation9 + $0x510] sm:$0xff]  }
 0x4ea   :  { %6231 = vmatpush3.bf16.msra.mxu1 %v7585_v57  ;;  %v7276_v57 = vunpack.i.h.bf16 %v8716_v60  ;;  %v7295_v60 = vunpack.i.l.bf16 %v8734_v46 }
 0x4eb   :  { %4336 = vmatmul.mubr.bf16.gmra.mrb[52].mxu0 %v2341_v39  ;;  %v8728_v33 = vpop.permute.xlu1 %7288  ;;  %6232 = vmatprep.subr.bf16.mxu1 %v7588_v58  ;;  %v7608_v58 = vld [vmem:[#allocation9 + $0x550] sm:$0xff]   ;;  %v2247_v39 = vsel %vm322_vm2, %v7280_v51, %v7281_v0  ;;  %v7620_v51 = vld [vmem:[#allocation9 + $0x568] sm:$0xff]  }
 0x4ec   :  { %6255 = vmatpush3.bf16.msra.mxu0 %v7587_v21  ;;  %4425 = vmatprep.mubr.bf16.mxu0 %v2321_v53  ;;  %v8742_v45 = vpop.permute.xlu0 %7303  ;;  %v2152_v53 = vsel %vm322_vm2, %v7255_v30, %v7256_v55  ;;  %v7619_v55 = vld [vmem:[#allocation9 + $0x590] sm:$0xff]  }
 0x4ed   :  { %6256 = vmatprep.subr.bf16.mxu0 %v7590_v27  ;;  %v2175_v27 = vsel %vm347_vm3, %v7270_v19, %v7271_v13  ;;  %v7306_v4 = vunpack.i.h.bf16 %v8742_v45  ;;  %v7622_v13 = vld [vmem:[#allocation9 + $0x5d8] sm:$0xff]  }
 0x4ee   :  { %6233 = vmatpush3.bf16.msra.mxu1 %v7589_v52  ;;  %v2343_v52 = vpack.c.bf16 %v2153_v15, %v2152_v53  ;;  %v7290_v15 = vunpack.i.l.bf16 %v8728_v33  ;;  %v7286_v53 = vunpack.i.h.bf16 %v8726_v14 }
 0x4ef   :  { %v8730_v11 = vpop.permute.xlu1 %7298  ;;  %6234 = vmatprep.subr.bf16.mxu1 %v7592_v8  ;;  %v2246_v8 = vsel %vm322_vm2, %v7275_v26, %v7276_v57  ;;  %v7621_v57 = vld [vmem:[#allocation9 + $0x528] sm:$0xff]   ;;  %v7624_v26 = vld [vmem:[#allocation9 + $0x570] sm:$0xff]  }
 0x4f0   :  { %6257 = vmatpush3.bf16.msra.mxu0 %v7591_v5  ;;  %v7301_v31 = vunpack.i.h.bf16 %v8730_v11  ;;  %v7300_v17 = vunpack.i.l.bf16 %v8730_v11  ;;  %v8763_v21 = vpop.permute.xlu0 %7313 }
 0x4f1   :  { %6258 = vmatprep.subr.bf16.mxu0 %v7594_v28  ;;  %v7612_v28 = vld [vmem:[#allocation9 + $0x558] sm:$0xff]  }
 0x4f2   :  { %6235 = vmatpush3.bf16.msra.mxu1 %v7593_v34  ;;  %v2201_v5 = vsel %vm1907_vm8, %v7300_v17, %v7301_v31  ;;  %v2174_v34 = vsel %vm347_vm3, %v7265_v6, %v7266_v41  ;;  %v7623_v17 = vld [vmem:[#allocation9 + $0x598] sm:$0xff]   ;;  %v7625_v41 = vld [vmem:[#allocation9 + $0x530] sm:$0xff]  }
 0x4f3   :  { %6236 = vmatprep.subr.bf16.mxu1 %v7596_v48  ;;  %v8739_v47 = vpop.permute.xlu1 %7308  ;;  %v2323_v48 = vpack.c.bf16 %v2247_v39, %v2246_v8  ;;  %v2320_v29 = vpack.c.bf16 %v2175_v27, %v2174_v34  ;;  %v7628_v6 = vld [vmem:[#allocation9 + $0x578] sm:$0xff]   ;;  %v7630_v27 = vld [vmem:[#allocation9 + $0x5e8] sm:$0xff]  }
 0x4f4   :  { %6259 = vmatpush3.bf16.msra.mxu0 %v7595_v23  ;;  %v7614_v23 = vld [vmem:[#allocation9 + $0x5c8] sm:$0xff]   ;;  %v7310_v42 = vunpack.i.l.bf16 %v8739_v47  ;;  %v7629_v8 = vld [vmem:[#allocation9 + $0x538] sm:$0xff]  }
 0x4f5   :  { %6260 = vmatprep.subr.bf16.mxu0 %v7598_v36  ;;  %v7311_v36 = vunpack.i.h.bf16 %v8739_v47  ;;  %v7618_v47 = vld [vmem:[#allocation9 + $0x5d0] sm:$0xff]  }
 0x4f6   :  { %6237 = vmatpush3.bf16.msra.mxu1 %v7597_v54  ;;  %v7324_v49 = vpop.permute.xlu0 %7323 }
 0x4f7   :  { %6278 = vmatprep.subr.bf16.mxu1 %v7600_v12  ;;  %v8752_v9 = vpop.permute.xlu1 %7318  ;;  %v7613_v12 = vld [vmem:[#allocation9 + $0x518] sm:$0xff]   ;;  %v7325_v43 = vunpack.i.l.bf16 %v7324_v49  ;;  %v2177_v2 = vsel %vm347_vm3, %v7310_v42, %v7311_v36 }
 0x4f8   :  { %6261 = vmatpush3.bf16.msra.mxu0 %v7599_v40  ;;  %v7321_v39 = vunpack.i.h.bf16 %v8752_v9 }
 0x4f9   :  { %4377 = vmatmul.mubr.bf16.vlgmr.msra.gmra.mrb[52].mxu1 %v2318_v24  ;;  %6262 = vmatprep.subr.bf16.mxu0 %v7601_v20  ;;  %v7616_v20 = vld [vmem:[#allocation9 + $0x560] sm:$0xff]   ;;  %v7615_v24 = vld [vmem:[#allocation9 + $0x588] sm:$0xff]  }
 0x4fa   :  { %4384 = vmatprep.mubr.bf16.mxu1 %v2344_v3  ;;  %6279 = vmatpush3.bf16.msra.mxu1 %v7602_v50  ;;  %v7296_v3 = vunpack.i.h.bf16 %v8734_v46  ;;  %v7305_v50 = vunpack.i.l.bf16 %v8742_v45  ;;  %v8785_v31 = vpop.permute.xlu0 %7333 }
 0x4fb   :  { %6280 = vmatprep.subr.bf16.mxu1 %v7604_v10  ;;  %v7329_v11 = vpop.permute.xlu1 %7328  ;;  %v7326_v10 = vunpack.i.h.bf16 %v7324_v49 }
 0x4fc   :  { %6263 = vmatpush3.bf16.msra.mxu0 %v7603_v56  ;;  %v2200_v46 = vsel %vm1907_vm8, %v7295_v60, %v7296_v3  ;;  %v7331_v25 = vunpack.i.h.bf16 %v7329_v11  ;;  %v7330_v40 = vunpack.i.l.bf16 %v7329_v11  ;;  %v7617_v56 = vld [vmem:[#allocation9 + $0x520] sm:$0xff]   ;;  %v7631_v11 = vld [vmem:[#allocation9 + $0x5a8] sm:$0xff]  }
 0x4fd   :  { %6264 = vmatprep.subr.bf16.mxu0 %v7605_v7  ;;  %v2346_v54 = vpack.c.bf16 %v2201_v5, %v2200_v46  ;;  %v2176_v7 = vsel %vm347_vm3, %v7305_v50, %v7306_v4  ;;  %v2270_v30 = vsel %vm347_vm3, %v7325_v43, %v7326_v10  ;;  %v7627_v60 = vld [vmem:[#allocation9 + $0x5a0] sm:$0xff]   ;;  %v7316_v5 = vunpack.i.h.bf16 %v8763_v21 }
 0x4fe   :  { %6281 = vmatpush3.bf16.msra.mxu1 %v7606_v32  ;;  %v2271_v0 = vsel %vm347_vm3, %v7330_v40, %v7331_v25  ;;  %v2345_v45 = vpack.c.bf16 %v2177_v2, %v2176_v7  ;;  %v7636_v40 = vld [vmem:[#allocation9 + $0x5f8] sm:$0xff]   ;;  %v7335_v4 = vunpack.i.l.bf16 %v8785_v31 }
 0x4ff   :  { %6282 = vmatprep.subr.bf16.mxu1 %v7608_v58  ;;  %v8783_v19 = vpop.permute.xlu1 %7338  ;;  %v2325_v32 = vpack.c.bf16 %v2271_v0, %v2270_v30  ;;  %v7626_v58 = vld [vmem:[#allocation9 + $0x5e0] sm:$0xff]   ;;  %v7637_v2 = vld [vmem:[#allocation9 + $0x5b8] sm:$0xff]  }
 0x500   :  { %6265 = vmatpush3.bf16.msra.mxu0 %v7607_v59  ;;  %v7291_v59 = vunpack.i.h.bf16 %v8728_v33  ;;  %v7315_v33 = vunpack.i.l.bf16 %v8763_v21  ;;  %v7341_v21 = vunpack.i.h.bf16 %v8783_v19  ;;  %v7340_v36 = vunpack.i.l.bf16 %v8783_v19  ;;  %v7639_v19 = vld [vmem:[#allocation9 + $0x618] sm:$0xff]  }
 0x501   :  { %4385 = vmatmul.mubr.bf16.gmra.mrb[56].mxu1 %v2343_v52  ;;  %6306 = vmatprep.subr.bf16.mxu0 %v7610_v63  ;;  %v7320_v63 = vunpack.i.l.bf16 %v8752_v9  ;;  %v7344_v52 = vpop.permute.xlu0 %7343 }
 0x502   :  { %6283 = vmatpush3.bf16.msra.mxu1 %v7609_v61  ;;  %4474 = vmatprep.mubr.bf16.mxu1 %v2323_v48  ;;  %v7285_v61 = vunpack.i.l.bf16 %v8726_v14  ;;  %v2223_v34 = vsel %vm1834_vm7, %v7290_v15, %v7291_v59  ;;  %v7633_v48 = vld [vmem:[#allocation9 + $0x5f0] sm:$0xff]   ;;  %v2248_v46 = vsel %vm322_vm2, %v7315_v33, %v7316_v5  ;;  %v7346_v0 = vunpack.i.h.bf16 %v7344_v52 }
 0x503   :  { %4426 = vmatmul.mubr.bf16.vlgmr.msra.gmra.mrb[56].mxu0 %v2320_v29  ;;  %6284 = vmatprep.subr.bf16.mxu1 %v7612_v28  ;;  %v8789_v3 = vpop.permute.xlu1 %7348  ;;  %v7632_v28 = vld [vmem:[#allocation9 + $0x600] sm:$0xff]   ;;  %v2249_v9 = vsel %vm322_vm2, %v7320_v63, %v7321_v39 }
 0x504   :  { %4433 = vmatprep.mubr.bf16.mxu0 %v2346_v54  ;;  %6307 = vmatpush3.bf16.msra.mxu0 %v7611_v22  ;;  %v2222_v22 = vsel %vm1834_vm7, %v7285_v61, %v7286_v53  ;;  %v2348_v49 = vpack.c.bf16 %v2249_v9, %v2248_v46  ;;  %v7634_v54 = vld [vmem:[#allocation9 + $0x5b0] sm:$0xff]   ;;  %v7351_v50 = vunpack.i.h.bf16 %v8789_v3 }
 0x505   :  { %6308 = vmatprep.subr.bf16.mxu0 %v7614_v23  ;;  %v2322_v29 = vpack.c.bf16 %v2223_v34, %v2222_v22  ;;  %v7635_v23 = vld [vmem:[#allocation9 + $0x608] sm:$0xff]   ;;  %v7354_v42 = vpop.permute.xlu0 %7353 }
 0x506   :  { %6285 = vmatpush3.bf16.msra.mxu1 %v7613_v12  ;;  %v7356_v10 = vunpack.i.h.bf16 %v7354_v42  ;;  %v7355_v43 = vunpack.i.l.bf16 %v7354_v42 }
 0x507   :  { %6286 = vmatprep.subr.bf16.mxu1 %v7616_v20  ;;  %v7359_v14 = vpop.permute.xlu1 %7358  ;;  %v7336_v20 = vunpack.i.h.bf16 %v8785_v31  ;;  %v7640_v31 = vld [vmem:[#allocation9 + $0x620] sm:$0xff]  }
 0x508   :  { %6309 = vmatpush3.bf16.msra.mxu0 %v7615_v24  ;;  %v7361_v12 = vunpack.i.h.bf16 %v7359_v14  ;;  %v7360_v25 = vunpack.i.l.bf16 %v7359_v14  ;;  %v7350_v24 = vunpack.i.l.bf16 %v8789_v3  ;;  %v2294_v30 = vsel %vm1907_vm8, %v7355_v43, %v7356_v10 }
 0x509   :  { %6310 = vmatprep.subr.bf16.mxu0 %v7618_v47  ;;  %v7638_v47 = vld [vmem:[#allocation9 + $0x610] sm:$0xff]   ;;  %v7364_v38 = vpop.permute.xlu0 %7363 }
 0x50a   :  { %6287 = vmatpush3.bf16.msra.mxu1 %v7617_v56  ;;  %v2225_v56 = vsel %vm1834_vm7, %v7340_v36, %v7341_v21  ;;  %v2295_v7 = vsel %vm1907_vm8, %v7360_v25, %v7361_v12  ;;  %v7366_v15 = vunpack.i.h.bf16 %v7364_v38  ;;  %v7365_v3 = vunpack.i.l.bf16 %v7364_v38 }
 0x50b   :  { %4434 = vmatmul.mubr.bf16.gmra.mrb[60].mxu0 %v2345_v45  ;;  %6288 = vmatprep.subr.bf16.mxu1 %v7620_v51  ;;  %v7345_v51 = vunpack.i.l.bf16 %v7344_v52  ;;  %v7369_v37 = vpop.permute.xlu1 %7368 }
 0x50c   :  { %6311 = vmatpush3.bf16.msra.mxu0 %v7619_v55  ;;  %4523 = vmatprep.mubr.bf16.mxu0 %v2325_v32  ;;  %v2224_v55 = vsel %vm1834_vm7, %v7335_v4, %v7336_v20  ;;  %v2326_v32 = vpack.c.bf16 %v2295_v7, %v2294_v30  ;;  %v7370_v59 = vunpack.i.l.bf16 %v7369_v37  ;;  %v2296_v16 = vsel %vm1907_vm8, %v7365_v3, %v7366_v15  ;;  %v4598_v15 = vld [vmem:[#allocation6] sm:$0xff]  ;;  %v4599_v3 = vld [vmem:[#allocation6 + $0x8] sm:$0xff] }
 0x50d   :  { %6312 = vmatprep.subr.bf16.mxu0 %v7622_v13  ;;  %v2347_v45 = vpack.c.bf16 %v2225_v56, %v2224_v55  ;;  %v2273_v13 = vsel %vm347_vm3, %v7350_v24, %v7351_v50 }
 0x50e   :  { %6289 = vmatpush3.bf16.msra.mxu1 %v7621_v57  ;;  %v2272_v57 = vsel %vm347_vm3, %v7345_v51, %v7346_v0 }
 0x50f   :  { %6290 = vmatprep.subr.bf16.mxu1 %v7624_v26  ;;  %v2350_v26 = vpack.c.bf16 %v2273_v13, %v2272_v57 }
 0x510   :  { %6313 = vmatpush3.bf16.msra.mxu0 %v7623_v17  ;;  %v7641_v17 = vld [vmem:[#allocation9 + $0x628] sm:$0xff]  }
 0x511   :  { %6314 = vmatprep.subr.bf16.mxu0 %v7626_v58  ;;  %v7642_v58 = vld [vmem:[#allocation9 + $0x630] sm:$0xff]  }
 0x512   :  { %6291 = vmatpush3.bf16.msra.mxu1 %v7625_v41  ;;  %v8820_v41 = vld [vmem:[#allocation2 + $0x18] sm:$0xff] }
 0x513   :  { %6292 = vmatprep.subr.bf16.mxu1 %v7628_v6  ;;  %v7371_v6 = vunpack.i.h.bf16 %v7369_v37 }
 0x514   :  { %6315 = vmatpush3.bf16.msra.mxu0 %v7627_v60 }
 0x515   :  { %6316 = vmatprep.subr.bf16.mxu0 %v7630_v27  ;;  %v2297_v62 = vsel %vm1907_vm8, %v7370_v59, %v7371_v6 }
 0x516   :  { %6293 = vmatpush3.bf16.msra.mxu1 %v7629_v8 }
 0x517   :  { %6512 = vmatprep.subr.bf16.mxu1 %v7632_v28 }
 0x518   :  { %6317 = vmatpush3.bf16.msra.mxu0 %v7631_v11 }
 0x519   :  { %4475 = vmatmul.mubr.bf16.vlgmr.msra.gmra.mrb[60].mxu1 %v2322_v29  ;;  %6318 = vmatprep.subr.bf16.mxu0 %v7633_v48 }
 0x51a   :  { %4482 = vmatprep.mubr.bf16.mxu1 %v2348_v49  ;;  %6513 = vmatpush3.bf16.msra.mxu1 %v7632_v28 }
 0x51b   :  { %6514 = vmatprep.subr.bf16.mxu1 %v7635_v23 }
 0x51c   :  { %6319 = vmatpush3.bf16.msra.mxu0 %v7634_v54 }
 0x51d   :  { %6320 = vmatprep.subr.bf16.mxu0 %v7636_v40 }
 0x51e   :  { %6515 = vmatpush3.bf16.msra.mxu1 %v7635_v23 }
 0x51f   :  { %6516 = vmatprep.subr.bf16.mxu1 %v7638_v47 }
 0x520   :  { %6321 = vmatpush3.bf16.msra.mxu0 %v7637_v2 }
 0x521   :  { %4483 = vmatmul.mubr.bf16.gmra.mrb[64].mxu1 %v2347_v45  ;;  %6740 = vmatprep.subr.bf16.mxu0 %v7820_v35 }
 0x522   :  { %6517 = vmatpush3.bf16.msra.mxu1 %v7638_v47  ;;  %6528 = vmatprep.mubr.bf16.mxu1 %v2326_v32 }
 0x523   :  { %4524 = vmatmul.mubr.bf16.vlgmr.msra.gmra.mrb[64].mxu0 %v2324_v44  ;;  %6518 = vmatprep.subr.bf16.mxu1 %v7639_v19  ;;  %v7643_v44 = vld [vmem:[#allocation9 + $0x638] sm:$0xff]  }
 0x524   :  { %4531 = vmatprep.mubr.bf16.mxu0 %v2350_v26 }
 0x526   :  { %6519 = vmatpush3.bf16.msra.mxu1 %v7639_v19 }
 0x527   :  { %6520 = vmatprep.subr.bf16.mxu1 %v7640_v31 }
 0x52a   :  { %6521 = vmatpush3.bf16.msra.mxu1 %v7640_v31 }
 0x52b   :  { %4532 = vmatmul.mubr.bf16.gmra.mrb[68].mxu0 %v2349_v18  ;;  %6522 = vmatprep.subr.bf16.mxu1 %v7641_v17  ;;  %v2351_v18 = vpack.c.bf16 %v2297_v62, %v2296_v16  ;;  %v4600_v62 = vld [vmem:[#allocation6 + $0x10] sm:$0xff] }
 0x52c   :  { %6564 = vmatprep.mubr.msk.f32.mxu0 %vm7821_vm4, %v8820_v41 }
 0x52e   :  { %6523 = vmatpush3.bf16.msra.mxu1 %v7641_v17 }
 0x52f   :  { %6524 = vmatprep.subr.bf16.mxu1 %v7642_v58 }
 0x532   :  { %6525 = vmatpush3.bf16.msra.mxu1 %v7642_v58 }
 0x533   :  { %6526 = vmatprep.subr.bf16.mxu1 %v7643_v44 }
 0x536   :  { %6527 = vmatpush3.bf16.msra.mxu1 %v7643_v44 }
 0x537   :  { %6764 = vmatprep.subr.bf16.mxu1 %v7820_v35 }
 0x539   :  { %6529 = vmatmul.mubr.bf16.vlgmr.msra.gmra.mrb[68].mxu1 %v2351_v18  ;;  %v8829_v18 = vpack.c.bf16 %v4599_v3, %v4598_v15 }
 0x53a   :  { %6599 = vmatprep.mubr.msk.f32.mxu1 %vm7821_vm4, %v8820_v41 }
 0x53b   :  { %6742 = vmatpush3.bf16.msra.mxu0 %v8829_v18  ;;  %6766 = vmatpush3.bf16.msra.mxu1 %v8829_v18 }
 0x53c   :  { %6743 = vmatprep.subr.bf16.mxu0 %v7820_v35  ;;  %6767 = vmatprep.subr.bf16.mxu1 %v7820_v35 }
 0x54c   :  { %v6014_v60 = vpop.f32.mrb[20].mxu1 }
 0x54d   :  { %v6015_v39 = vpop.f32.mrb[21].mxu1 }
 0x54e   :  { %v6016_v63 = vadd.f32 %v6015_v39, %v6014_v60  ;;  %v6017_v27 = vpop.f32.mrb[22].mxu1  ;;  %v4601_v60 = vld [vmem:[#allocation6 + $0x18] sm:$0xff] }
 0x54f   :  { %v6018_v53 = vpop.f32.mrb[23].mxu1 }
 0x550   :  { %v6019_v61 = vadd.f32 %v6018_v53, %v6017_v27  ;;  %v8832_v27 = vpack.c.bf16 %v4601_v60, %v4600_v62 }
 0x552   :  { %6745 = vmatpush3.bf16.msra.mxu0 %v8832_v27  ;;  %6769 = vmatpush3.bf16.msra.mxu1 %v8832_v27 }
 0x553   :  { %6746 = vmatprep.subr.bf16.mxu0 %v7820_v35  ;;  %6770 = vmatprep.subr.bf16.mxu1 %v7820_v35 }
 0x555   :  { %v6042_v52 = vpop.f32.mrb[24].mxu0 }
 0x556   :  { %v6043_v8 = vpop.f32.mrb[25].mxu0 }
 0x557   :  { %v6044_v5 = vadd.f32 %v6043_v8, %v6042_v52  ;;  %v6045_v33 = vpop.f32.mrb[26].mxu0 }
 0x558   :  { %v6020_v28 = vpop.f32.mrb[24].mxu1  ;;  %v6046_v34 = vpop.f32.mrb[27].mxu0 }
 0x559   :  { %v4036_v11 = vadd.f32 %v6044_v5, %v6016_v63  ;;  %v6047_v9 = vadd.f32 %v6046_v34, %v6045_v33  ;;  %v6021_v48 = vpop.f32.mrb[25].mxu1  ;;  %v4602_v33 = vld [vmem:[#allocation6 + $0x20] sm:$0xff] }
 0x55a   :  { %v6022_v22 = vadd.f32 %v6021_v48, %v6020_v28  ;;  %v6023_v14 = vpop.f32.mrb[26].mxu1  ;;  %v4603_v28 = vld [vmem:[#allocation6 + $0x28] sm:$0xff] }
 0x55b   :  { %v4039_v29 = vadd.f32 %v6047_v9, %v6019_v61  ;;  %v6024_v46 = vpop.f32.mrb[27].mxu1 }
 0x55c   :  { %v6025_v23 = vadd.f32 %v6024_v46, %v6023_v14 }
 0x565   :  { %v6048_v21 = vpop.f32.mrb[28].mxu0 }
 0x566   :  { %v6049_v36 = vpop.f32.mrb[29].mxu0 }
 0x567   :  { %v6050_v42 = vadd.f32 %v6049_v36, %v6048_v21  ;;  %v6051_v49 = vpop.f32.mrb[30].mxu0 }
 0x568   :  { %v6052_v54 = vpop.f32.mrb[31].mxu0 }
 0x569   :  { %v4044_v12 = vadd.f32 %v6050_v42, %v6022_v22  ;;  %v6053_v25 = vadd.f32 %v6052_v54, %v6051_v49 }
 0x56b   :  { %v4047_v40 = vadd.f32 %v6053_v25, %v6025_v23 }
 0x56c   :  { %v6070_v20 = vpop.f32.mrb[28].mxu1 }
 0x56d   :  { %v6071_v4 = vpop.f32.mrb[29].mxu1 }
 0x56e   :  { %v6072_v50 = vadd.f32 %v6071_v4, %v6070_v20  ;;  %v6073_v24 = vpop.f32.mrb[30].mxu1 }
 0x56f   :  { %v6074_v10 = vpop.f32.mrb[31].mxu1 }
 0x570   :  { %v4085_v43 = vadd.f32 %v6072_v50, %v4036_v11  ;;  %v6075_v47 = vadd.f32 %v6074_v10, %v6073_v24  ;;  %v8841_v11 = vpack.c.bf16 %v4603_v28, %v4602_v33 }
 0x572   :  { %v4088_v2 = vadd.f32 %v6075_v47, %v4039_v29  ;;  %6748 = vmatpush3.bf16.msra.mxu0 %v8841_v11  ;;  %6772 = vmatpush3.bf16.msra.mxu1 %v8841_v11 }
 0x573   :  { %6749 = vmatprep.subr.bf16.mxu0 %v7820_v35  ;;  %6773 = vmatprep.subr.bf16.mxu1 %v7820_v35 }
 0x574   :  { %v6076_v56 = vpop.f32.mrb[32].mxu1 }
 0x575   :  { %v6077_v0 = vpop.f32.mrb[33].mxu1  ;;  %v6098_v51 = vpop.f32.mrb[32].mxu0 }
 0x576   :  { %v6078_v7 = vadd.f32 %v6077_v0, %v6076_v56  ;;  %v6079_v55 = vpop.f32.mrb[34].mxu1  ;;  %v6099_v45 = vpop.f32.mrb[33].mxu0  ;;  %v4604_v56 = vld [vmem:[#allocation6 + $0x30] sm:$0xff]  ;;  %v4605_v0 = vld [vmem:[#allocation6 + $0x38] sm:$0xff] }
 0x577   :  { %v6100_v30 = vadd.f32 %v6099_v45, %v6098_v51  ;;  %v6080_v13 = vpop.f32.mrb[35].mxu1  ;;  %v6101_v19 = vpop.f32.mrb[34].mxu0  ;;  %v4606_v51 = vld [vmem:[#allocation6 + $0x40] sm:$0xff]  ;;  %v4607_v45 = vld [vmem:[#allocation6 + $0x48] sm:$0xff] }
 0x578   :  { %v4093_v32 = vadd.f32 %v6078_v7, %v4044_v12  ;;  %v6081_v57 = vadd.f32 %v6080_v13, %v6079_v55  ;;  %v6102_v26 = vpop.f32.mrb[35].mxu0  ;;  %v8847_v55 = vpack.c.bf16 %v4605_v0, %v4604_v56 }
 0x579   :  { %v4134_v31 = vadd.f32 %v6100_v30, %v4085_v43  ;;  %v6103_v17 = vadd.f32 %v6102_v26, %v6101_v19  ;;  %v8850_v19 = vpack.c.bf16 %v4607_v45, %v4606_v51  ;;  %v4609_v26 = vld [vmem:[#allocation6 + $0x58] sm:$0xff] }
 0x57a   :  { %v4096_v58 = vadd.f32 %v6081_v57, %v4047_v40  ;;  %6751 = vmatpush3.bf16.msra.mxu0 %v8847_v55  ;;  %6775 = vmatpush3.bf16.msra.mxu1 %v8847_v55  ;;  %v4608_v57 = vld [vmem:[#allocation6 + $0x50] sm:$0xff] }
 0x57b   :  { %v4137_v37 = vadd.f32 %v6103_v17, %v4088_v2  ;;  %6752 = vmatprep.subr.bf16.mxu0 %v7820_v35  ;;  %6776 = vmatprep.subr.bf16.mxu1 %v7820_v35  ;;  %v4610_v17 = vld [vmem:[#allocation6 + $0x60] sm:$0xff] }
 0x57e   :  { %6754 = vmatpush3.bf16.msra.mxu0 %v8850_v19  ;;  %6778 = vmatpush3.bf16.msra.mxu1 %v8850_v19 }
 0x57f   :  { %6755 = vmatprep.subr.bf16.mxu0 %v7820_v35  ;;  %6779 = vmatprep.subr.bf16.mxu1 %v7820_v35 }
 0x580   :  { %v6104_v38 = vpop.f32.mrb[36].mxu0 }
 0x581   :  { %v6105_v44 = vpop.f32.mrb[37].mxu0 }
 0x582   :  { %v6106_v6 = vadd.f32 %v6105_v44, %v6104_v38  ;;  %v6107_v59 = vpop.f32.mrb[38].mxu0  ;;  %v4612_v44 = vld [vmem:[#allocation6 + $0x70] sm:$0xff] }
 0x583   :  { %v6108_v16 = vpop.f32.mrb[39].mxu0 }
 0x584   :  { %v4142_v39 = vadd.f32 %v6106_v6, %v4093_v32  ;;  %v6109_v63 = vadd.f32 %v6108_v16, %v6107_v59  ;;  %v4613_v6 = vld [vmem:[#allocation6 + $0x78] sm:$0xff] }
 0x585   :  { %v8868_v16 = vpack.c.bf16 %v4613_v6, %v4612_v44 }
 0x586   :  { %v4145_v53 = vadd.f32 %v6109_v63, %v4096_v58  ;;  %v4611_v58 = vld [vmem:[#allocation6 + $0x68] sm:$0xff] }
 0x58c   :  { %v6126_v61 = vpop.f32.mrb[36].mxu1 }
 0x58d   :  { %v6127_v52 = vpop.f32.mrb[37].mxu1 }
 0x58e   :  { %v6128_v8 = vadd.f32 %v6127_v52, %v6126_v61  ;;  %v6129_v5 = vpop.f32.mrb[38].mxu1 }
 0x58f   :  { %v6130_v34 = vpop.f32.mrb[39].mxu1 }
 0x590   :  { %v4183_v9 = vadd.f32 %v6128_v8, %v4134_v31  ;;  %v6131_v48 = vadd.f32 %v6130_v34, %v6129_v5  ;;  %v8856_v31 = vpack.c.bf16 %v4609_v26, %v4608_v57 }
 0x592   :  { %v4186_v22 = vadd.f32 %v6131_v48, %v4137_v37  ;;  %6757 = vmatpush3.bf16.msra.mxu0 %v8856_v31  ;;  %v8862_v37 = vpack.c.bf16 %v4611_v58, %v4610_v17  ;;  %6781 = vmatpush3.bf16.msra.mxu1 %v8856_v31 }
 0x593   :  { %6758 = vmatprep.subr.bf16.mxu0 %v7820_v35  ;;  %6782 = vmatprep.subr.bf16.mxu1 %v7820_v35 }
 0x594   :  { %v6132_v14 = vpop.f32.mrb[40].mxu1 }
 0x595   :  { %v6133_v29 = vpop.f32.mrb[41].mxu1 }
 0x596   :  { %v6134_v46 = vadd.f32 %v6133_v29, %v6132_v14  ;;  %v6154_v23 = vpop.f32.mrb[40].mxu0  ;;  %v6135_v21 = vpop.f32.mrb[42].mxu1  ;;  %6760 = vmatpush3.bf16.msra.mxu0 %v8862_v37  ;;  %6784 = vmatpush3.bf16.msra.mxu1 %v8862_v37 }
 0x597   :  { %v6155_v36 = vpop.f32.mrb[41].mxu0  ;;  %v6136_v42 = vpop.f32.mrb[43].mxu1  ;;  %6761 = vmatprep.subr.bf16.mxu0 %v7820_v35  ;;  %6785 = vmatprep.subr.bf16.mxu1 %v7820_v35 }
 0x598   :  { %v4191_v49 = vadd.f32 %v6134_v46, %v4142_v39  ;;  %v6156_v54 = vadd.f32 %v6155_v36, %v6154_v23  ;;  %v6137_v12 = vadd.f32 %v6136_v42, %v6135_v21  ;;  %v6157_v25 = vpop.f32.mrb[42].mxu0 }
 0x599   :  { %v6158_v40 = vpop.f32.mrb[43].mxu0 }
 0x59a   :  { %v4232_v20 = vadd.f32 %v6156_v54, %v4183_v9  ;;  %v4194_v4 = vadd.f32 %v6137_v12, %v4145_v53  ;;  %v6159_v50 = vadd.f32 %v6158_v40, %v6157_v25  ;;  %6763 = vmatpush3.bf16.msra.mxu0 %v8868_v16  ;;  %6787 = vmatpush3.bf16.msra.mxu1 %v8868_v16 }
 0x59b   :  { %6788 = vmatprep.subr.bf16.mxu1 %v7820_v35 }
 0x59c   :  { %v4235_v24 = vadd.f32 %v6159_v50, %v4186_v22 }
 0x59e   :  { %v6160_v10 = vpop.f32.mrb[44].mxu0 }
 0x59f   :  { %v6161_v43 = vpop.f32.mrb[45].mxu0 }
 0x5a0   :  { %v6162_v47 = vadd.f32 %v6161_v43, %v6160_v10  ;;  %v6163_v2 = vpop.f32.mrb[46].mxu0 }
 0x5a1   :  { %v6164_v7 = vpop.f32.mrb[47].mxu0 }
 0x5a2   :  { %v4240_v30 = vadd.f32 %v6162_v47, %v4191_v49  ;;  %v6165_v13 = vadd.f32 %v6164_v7, %v6163_v2 }
 0x5a4   :  { %v4243_v32 = vadd.f32 %v6165_v13, %v4194_v4 }
 0x5ac   :  { %v6182_v38 = vpop.f32.mrb[44].mxu1 }
 0x5ad   :  { %v6183_v59 = vpop.f32.mrb[45].mxu1 }
 0x5ae   :  { %v6184_v15 = vadd.f32 %v6183_v59, %v6182_v38  ;;  %v6185_v3 = vpop.f32.mrb[46].mxu1 }
 0x5af   :  { %v6186_v62 = vpop.f32.mrb[47].mxu1 }
 0x5b0   :  { %v4281_v60 = vadd.f32 %v6184_v15, %v4232_v20  ;;  %v6187_v39 = vadd.f32 %v6186_v62, %v6185_v3 }
 0x5b2   :  { %v4284_v63 = vadd.f32 %v6187_v39, %v4235_v24 }
 0x5b4   :  { %v6188_v53 = vpop.f32.mrb[48].mxu1 }
 0x5b5   :  { %v6189_v61 = vpop.f32.mrb[49].mxu1 }
 0x5b6   :  { %v6190_v52 = vadd.f32 %v6189_v61, %v6188_v53  ;;  %v6210_v8 = vpop.f32.mrb[48].mxu0  ;;  %v6191_v5 = vpop.f32.mrb[50].mxu1 }
 0x5b7   :  { %v6211_v33 = vpop.f32.mrb[49].mxu0  ;;  %v6192_v28 = vpop.f32.mrb[51].mxu1 }
 0x5b8   :  { %v4289_v34 = vadd.f32 %v6190_v52, %v4240_v30  ;;  %v6212_v9 = vadd.f32 %v6211_v33, %v6210_v8  ;;  %v6193_v48 = vadd.f32 %v6192_v28, %v6191_v5  ;;  %v6213_v22 = vpop.f32.mrb[50].mxu0 }
 0x5b9   :  { %v6214_v14 = vpop.f32.mrb[51].mxu0 }
 0x5ba   :  { %v4330_v29 = vadd.f32 %v6212_v9, %v4281_v60  ;;  %v4292_v46 = vadd.f32 %v6193_v48, %v4243_v32  ;;  %v6215_v23 = vadd.f32 %v6214_v14, %v6213_v22 }
 0x5bc   :  { %v4333_v21 = vadd.f32 %v6215_v23, %v4284_v63 }
 0x5be   :  { %v6216_v36 = vpop.f32.mrb[52].mxu0 }
 0x5bf   :  { %v6217_v42 = vpop.f32.mrb[53].mxu0 }
 0x5c0   :  { %v6218_v49 = vadd.f32 %v6217_v42, %v6216_v36  ;;  %v6219_v54 = vpop.f32.mrb[54].mxu0 }
 0x5c1   :  { %v6220_v12 = vpop.f32.mrb[55].mxu0 }
 0x5c2   :  { %v4338_v25 = vadd.f32 %v6218_v49, %v4289_v34  ;;  %v6221_v40 = vadd.f32 %v6220_v12, %v6219_v54 }
 0x5c4   :  { %v4341_v20 = vadd.f32 %v6221_v40, %v4292_v46 }
 0x5cc   :  { %v6238_v4 = vpop.f32.mrb[52].mxu1 }
 0x5cd   :  { %v6239_v50 = vpop.f32.mrb[53].mxu1 }
 0x5ce   :  { %v6240_v24 = vadd.f32 %v6239_v50, %v6238_v4  ;;  %v6241_v10 = vpop.f32.mrb[54].mxu1 }
 0x5cf   :  { %v6242_v43 = vpop.f32.mrb[55].mxu1 }
 0x5d0   :  { %v4379_v47 = vadd.f32 %v6240_v24, %v4330_v29  ;;  %v6243_v2 = vadd.f32 %v6242_v43, %v6241_v10 }
 0x5d2   :  { %v4382_v56 = vadd.f32 %v6243_v2, %v4333_v21 }
 0x5d4   :  { %v6244_v0 = vpop.f32.mrb[56].mxu1 }
 0x5d5   :  { %v6245_v51 = vpop.f32.mrb[57].mxu1 }
 0x5d6   :  { %v6246_v7 = vadd.f32 %v6245_v51, %v6244_v0  ;;  %v6266_v45 = vpop.f32.mrb[56].mxu0  ;;  %v6247_v30 = vpop.f32.mrb[58].mxu1 }
 0x5d7   :  { %v6267_v13 = vpop.f32.mrb[57].mxu0  ;;  %v6248_v32 = vpop.f32.mrb[59].mxu1 }
 0x5d8   :  { %v4387_v57 = vadd.f32 %v6246_v7, %v4338_v25  ;;  %v6268_v26 = vadd.f32 %v6267_v13, %v6266_v45  ;;  %v6249_v17 = vadd.f32 %v6248_v32, %v6247_v30  ;;  %v6269_v58 = vpop.f32.mrb[58].mxu0 }
 0x5d9   :  { %v6270_v38 = vpop.f32.mrb[59].mxu0 }
 0x5da   :  { %v4428_v44 = vadd.f32 %v6268_v26, %v4379_v47  ;;  %v4390_v6 = vadd.f32 %v6249_v17, %v4341_v20  ;;  %v6271_v59 = vadd.f32 %v6270_v38, %v6269_v58 }
 0x5dc   :  { %v4431_v15 = vadd.f32 %v6271_v59, %v4382_v56 }
 0x5de   :  { %v6272_v3 = vpop.f32.mrb[60].mxu0 }
 0x5df   :  { %v6273_v62 = vpop.f32.mrb[61].mxu0 }
 0x5e0   :  { %v6274_v60 = vadd.f32 %v6273_v62, %v6272_v3  ;;  %v6275_v39 = vpop.f32.mrb[62].mxu0 }
 0x5e1   :  { %v6276_v63 = vpop.f32.mrb[63].mxu0 }
 0x5e2   :  { %v4436_v53 = vadd.f32 %v6274_v60, %v4387_v57  ;;  %v6277_v61 = vadd.f32 %v6276_v63, %v6275_v39  ;;  %v7644_v63 = vld [vmem:[#allocation11] sm:$0xff]  }
 0x5e3   :  { %6602 = vmatprep.subr.bf16.mxu0 %v7644_v63 }
 0x5e4   :  { %v4439_v52 = vadd.f32 %v6277_v61, %v4390_v6 }
 0x5ec   :  { %v6294_v8 = vpop.f32.mrb[60].mxu1 }
 0x5ed   :  { %v6295_v5 = vpop.f32.mrb[61].mxu1 }
 0x5ee   :  { %v6296_v33 = vadd.f32 %v6295_v5, %v6294_v8  ;;  %v6297_v28 = vpop.f32.mrb[62].mxu1 }
 0x5ef   :  { %v6298_v34 = vpop.f32.mrb[63].mxu1 }
 0x5f0   :  { %v4477_v9 = vadd.f32 %v6296_v33, %v4428_v44  ;;  %v6299_v48 = vadd.f32 %v6298_v34, %v6297_v28 }
 0x5f2   :  { %v4480_v22 = vadd.f32 %v6299_v48, %v4431_v15 }
 0x5f4   :  { %v6300_v14 = vpop.f32.mrb[64].mxu1 }
 0x5f5   :  { %v6301_v29 = vpop.f32.mrb[65].mxu1 }
 0x5f6   :  { %v6302_v46 = vadd.f32 %v6301_v29, %v6300_v14  ;;  %v6322_v23 = vpop.f32.mrb[64].mxu0  ;;  %v6303_v21 = vpop.f32.mrb[66].mxu1 }
 0x5f7   :  { %v6323_v36 = vpop.f32.mrb[65].mxu0  ;;  %v6304_v42 = vpop.f32.mrb[67].mxu1 }
 0x5f8   :  { %v4485_v49 = vadd.f32 %v6302_v46, %v4436_v53  ;;  %v6324_v54 = vadd.f32 %v6323_v36, %v6322_v23  ;;  %v6305_v12 = vadd.f32 %v6304_v42, %v6303_v21  ;;  %v6325_v25 = vpop.f32.mrb[66].mxu0 }
 0x5f9   :  { %v6326_v40 = vpop.f32.mrb[67].mxu0 }
 0x5fa   :  { %v4488_v20 = vadd.f32 %v6305_v12, %v4439_v52  ;;  %v6327_v4 = vadd.f32 %v6326_v40, %v6325_v25  ;;  %v4526_v50 = vadd.f32 %v6324_v54, %v4477_v9  ;;  %v7645_v25 = vld [vmem:[#allocation11 + $0x8] sm:$0xff]   ;;  %v7646_v40 = vld [vmem:[#allocation11 + $0x10] sm:$0xff]  }
 0x5fc   :  { %v4529_v24 = vadd.f32 %v6327_v4, %v4480_v22  ;;  %v7648_v4 = vld [vmem:[#allocation11 + $0x20] sm:$0xff]  }
 0x5fe   :  { %v6328_v10 = vpop.f32.mrb[68].mxu0 }
 0x5ff   :  { %v6329_v43 = vpop.f32.mrb[69].mxu0 }
 0x600   :  { %v6330_v47 = vadd.f32 %v6329_v43, %v6328_v10  ;;  %v6331_v2 = vpop.f32.mrb[70].mxu0  ;;  %v7651_v10 = vld [vmem:[#allocation11 + $0x38] sm:$0xff]  }
 0x601   :  { %v6332_v56 = vpop.f32.mrb[71].mxu0 }
 0x602   :  { %v6333_v0 = vadd.f32 %v6332_v56, %v6331_v2  ;;  %v4534_v51 = vadd.f32 %v6330_v47, %v4485_v49 }
 0x604   :  { %v4537_v7 = vadd.f32 %v6333_v0, %v4488_v20  ;;  %v7647_v20 = vld [vmem:[#allocation11 + $0x18] sm:$0xff]   ;;  %v4777_v0 = vld [vmem:[%s9188_s6] sm:$0x1] }
 0x60c   :  { %v6530_v45 = vpop.f32.mrb[68].mxu1 }
 0x60d   :  { %v4583_v30 = vadd.f32 %v6530_v45, %v4534_v51  ;;  %v4574_v13 = vpop.f32.mrb[69].mxu1 }
 0x60e   :  { %v4575_v32 = vadd.f32 %v4574_v13, %v4526_v50  ;;  %v6531_v57 = vpop.f32.mrb[70].mxu1  ;;  %v7649_v50 = vld [vmem:[#allocation11 + $0x28] sm:$0xff]  }
 0x60f   :  { %v4586_v26 = vadd.f32 %v6531_v57, %v4537_v7  ;;  %v4577_v17 = vpop.f32.mrb[71].mxu1 }
 0x610   :  { %v4578_v58 = vadd.f32 %v4577_v17, %v4529_v24  ;;  %v7650_v24 = vld [vmem:[#allocation11 + $0x30] sm:$0xff]  }
 0x612   :  { %v4589_v38 = vadd.f32 %v4578_v58, %v4575_v32 }
 0x614   :  { %v4590_v44 = vadd.f32 %v4589_v38, %v4583_v30 }
 0x616   :  { %v4591_v6 = vadd.f32 %v4590_v44, %v4586_v26 }
 0x618   :  { %v4592_v59 = vrot.slane %v4591_v6, 4 }
 0x61a   :  { %v4593_v15 = vadd.f32 %v4592_v59, %v4591_v6 }
 0x61c   :  { %v4594_v3 = vrot.slane %v4593_v15, 2 }
 0x61e   :  { %v4595_v62 = vadd.f32 %v4594_v3, %v4593_v15 }
 0x620   :  { %v4596_v60 = vrot.slane %v4595_v62, 1 }
 0x622   :  { %v4597_v39 = vadd.f32 %v4596_v60, %v4595_v62  ;;  %v7664_v62 = vld [vmem:[#allocation2 + $0x20] sm:$0xff] }
 0x624   :  { %6565 = vmatmul.mubr.f32.vlgmr.msra.gmra.mrb[22].mxu0 %v4597_v39  ;;  %v7665_v39 = vld [vmem:[#allocation2 + $0x38] sm:$0xff] }
 0x625   :  { %6603 = vmatpush3.bf16.msra.mxu0 %v7644_v63 }
 0x626   :  { %6604 = vmatprep.subr.bf16.mxu0 %v7645_v25 }
 0x629   :  { %6605 = vmatpush3.bf16.msra.mxu0 %v7645_v25 }
 0x62a   :  { %6606 = vmatprep.subr.bf16.mxu0 %v7646_v40 }
 0x62d   :  { %6607 = vmatpush3.bf16.msra.mxu0 %v7646_v40 }
 0x62e   :  { %6608 = vmatprep.subr.bf16.mxu0 %v7647_v20 }
 0x631   :  { %6609 = vmatpush3.bf16.msra.mxu0 %v7647_v20 }
 0x632   :  { %6610 = vmatprep.subr.bf16.mxu0 %v7648_v4 }
 0x635   :  { %6611 = vmatpush3.bf16.msra.mxu0 %v7648_v4 }
 0x636   :  { %6612 = vmatprep.subr.bf16.mxu0 %v7649_v50 }
 0x639   :  { %6613 = vmatpush3.bf16.msra.mxu0 %v7649_v50 }
 0x63a   :  { %6614 = vmatprep.subr.bf16.mxu0 %v7650_v24 }
 0x63d   :  { %6615 = vmatpush3.bf16.msra.mxu0 %v7650_v24 }
 0x63e   :  { %6616 = vmatprep.subr.bf16.mxu0 %v7651_v10 }
 0x641   :  { %6617 = vmatpush3.bf16.msra.mxu0 %v7651_v10 }
 0x642   :  { %6812 = vmatprep.subr.bf16.mxu0 %v7820_v35 }
 0x6f7   :  { %v4680_v53 = vpop.f32.mrb[22].mxu0 }
 0x6f8   :  { %v4684_v61 = vmul.f32 0.001953125, %v4680_v53  ;;  %v6566_v52 = vpop.f32.mrb[23].mxu0  ;;  %v7666_v53 = vld [vmem:[#allocation2 + $0x80] sm:$0xff] }
 0x6f9   :  { %v7667_v52 = vld [vmem:[#allocation2 + $0x98] sm:$0xff] }
 0x6fa   :  { %v4688_v8 = vrot.slane %v4684_v61, %v8194_v1 }
 0x6fc   :  { %v8877_v5 = vsub.f32 %v4575_v32, %v4688_v8  ;;  %v8879_v33 = vsub.f32 %v4578_v58, %v4688_v8  ;;  %v8881_v28 = vsub.f32 %v4583_v30, %v4688_v8  ;;  %v8883_v34 = vsub.f32 %v4586_v26, %v4688_v8  ;;  %v5832_v30 = vld [vmem:[%s9191_s9] ss:$0 sm:$0xff] }
 0x6fe   :  { %v4693_v9 = vmul.f32 %v8877_v5, %v8877_v5  ;;  %v4694_v48 = vmul.f32 %v8879_v33, %v8879_v33  ;;  %v4695_v22 = vmul.f32 %v8881_v28, %v8881_v28  ;;  %v4696_v29 = vmul.f32 %v8883_v34, %v8883_v34 }
 0x700   :  { %v4697_v14 = vadd.f32 %v4694_v48, %v4693_v9 }
 0x702   :  { %v4698_v46 = vadd.f32 %v4697_v14, %v4695_v22 }
 0x704   :  { %v4699_v23 = vadd.f32 %v4698_v46, %v4696_v29  ;;  %v5210_v46 = vld [vmem:[#allocation2 + $0x10] sm:$0x80] }
 0x706   :  { %v4700_v21 = vrot.slane %v4699_v23, 4 }
 0x708   :  { %v4701_v36 = vadd.f32 %v4700_v21, %v4699_v23 }
 0x70a   :  { %v4702_v42 = vrot.slane %v4701_v36, 2 }
 0x70c   :  { %v4703_v49 = vadd.f32 %v4702_v42, %v4701_v36 }
 0x70e   :  { %v4704_v54 = vrot.slane %v4703_v49, 1 }
 0x710   :  { %v4705_v12 = vadd.f32 %v4704_v54, %v4703_v49 }
 0x712   :  { %6600 = vmatmul.mubr.f32.vlgmr.msra.gmra.mrb[18].mxu1 %v4705_v12 }
 0x713   :  { %6790 = vmatpush3.bf16.msra.mxu1 %v8829_v18  ;;  %6654 = vmatprep.mubr.msk.f32.mxu1 %vm7821_vm4, %v8820_v41 }
 0x714   :  { %6791 = vmatprep.subr.bf16.mxu1 %v7820_v35 }
 0x717   :  { %6793 = vmatpush3.bf16.msra.mxu1 %v8832_v27 }
 0x718   :  { %6794 = vmatprep.subr.bf16.mxu1 %v7820_v35 }
 0x71b   :  { %6796 = vmatpush3.bf16.msra.mxu1 %v8841_v11 }
 0x71c   :  { %6797 = vmatprep.subr.bf16.mxu1 %v7820_v35 }
 0x71f   :  { %6799 = vmatpush3.bf16.msra.mxu1 %v8847_v55 }
 0x720   :  { %6800 = vmatprep.subr.bf16.mxu1 %v7820_v35 }
 0x723   :  { %6802 = vmatpush3.bf16.msra.mxu1 %v8850_v19 }
 0x724   :  { %6803 = vmatprep.subr.bf16.mxu1 %v7820_v35 }
 0x727   :  { %6805 = vmatpush3.bf16.msra.mxu1 %v8856_v31 }
 0x728   :  { %6806 = vmatprep.subr.bf16.mxu1 %v7820_v35 }
 0x72b   :  { %6808 = vmatpush3.bf16.msra.mxu1 %v8862_v37 }
 0x72c   :  { %6809 = vmatprep.subr.bf16.mxu1 %v7820_v35 }
 0x72f   :  { %6811 = vmatpush3.bf16.msra.mxu1 %v8868_v16 }
 0x7e5   :  { %v4772_v43 = vpop.f32.mrb[18].mxu1 }
 0x7e6   :  { %v4776_v47 = vmul.f32 0.001953125, %v4772_v43  ;;  %v6601_v2 = vpop.f32.mrb[19].mxu1 }
 0x7e8   :  { %v4778_v56 = vadd.f32 1e-05, %v4776_v47 }
 0x7ea   :  { %7654 = vrsqrt.f32 %v4778_v56 }
 0x7f4   :  { %v7655_v51 = vpop.eup %7654 }
 0x7f5   :  { %v4780_v7 = vmul.f32 %v7655_v51, %v4777_v0 }
 0x7f7   :  { %v4785_v45 = vrot.slane %v4780_v7, %v8194_v1 }
 0x7f9   :  { %v4787_v13 = vmul.f32 %v4785_v45, %v8877_v5  ;;  %v4788_v32 = vmul.f32 %v4785_v45, %v8879_v33  ;;  %v4789_v57 = vmul.f32 %v4785_v45, %v8881_v28  ;;  %v4790_v26 = vmul.f32 %v4785_v45, %v8883_v34 }
 0x7fb   :  { %v4798_v17 = vadd.f32 %v5832_v30, %v4787_v13  ;;  %v4799_v58 = vadd.f32 %v5832_v30, %v4788_v32  ;;  %v4800_v38 = vadd.f32 %v5832_v30, %v4789_v57  ;;  %v4801_v44 = vadd.f32 %v5832_v30, %v4790_v26  ;;  %v5213_v32 = vld [vmem:[#allocation2 + $0x70] sm:$0x80] }
 0x7fc   :  { %v5227_v57 = vrot.slane %v5213_v32, 7 }
 0x7fd   :  { %v4802_v6 = vmax.f32 %v4798_v17, 0.0  ;;  %v4803_v59 = vmax.f32 %v4799_v58, 0.0  ;;  %v4804_v15 = vmax.f32 %v4800_v38, 0.0  ;;  %v4805_v3 = vmax.f32 %v4801_v44, 0.0  ;;  %v5215_v17 = vld [vmem:[#allocation2 + $0xa0] sm:$0x7f] }
 0x7fe   :  { %v5230_v58 = vrot.slane %v5215_v17, 7  ;;  %v5417_v44 = vld [vmem:[#allocation2 + $0x28] sm:$0xfe] }
 0x7ff   :  { %v4806_v60 = vadd.f32 %v7664_v62, %v4802_v6  ;;  %v4807_v63 = vadd.f32 %v7665_v39, %v4803_v59  ;;  %v4808_v61 = vadd.f32 %v7666_v53, %v4804_v15  ;;  %v4809_v8 = vadd.f32 %v7667_v52, %v4805_v3  ;;  %v5421_v15 = vld [vmem:[#allocation2 + $0x58] sm:$0x1] }
 0x800   :  { %v5443_v6 = vrot.slane %v5417_v44, 1  ;;  %v8962_v59 = vrot.slane %v8820_v41, 1  ;;  %v5448_v62 = vrot.slane %v5421_v15, 1 }
 0x801   :  { %v4810_v5 = vpack.c.bf16 %v4807_v63, %v4806_v60  ;;  %v4811_v33 = vpack.c.bf16 %v4809_v8, %v4808_v61 }
 0x802   :  { %v5445_v3 = vsel %vm237_vm1, %v5443_v6, %v8962_v59  ;;  %v5449_v60 = vsel %vm237_vm1, %v8962_v59, %v5448_v62  ;;  %v5420_v6 = vld [vmem:[#allocation2 + $0x50] sm:$0x1] }
 0x803   :  { %6618 = vmatprep.mubr.bf16.mxu0 %v4810_v5 }
 0x804   :  { %6619 = vmatmul.mubr.bf16.vlgmr.msra.gmra.mrb[72].mxu0 %v4811_v33  ;;  %v5841_v33 = vld [vmem:[%s9192_s10] ss:$0 sm:$0xff] }
 0x805   :  { %6814 = vmatpush3.bf16.msra.mxu0 %v8829_v18  ;;  %6689 = vmatprep.mubr.msk.f32.mxu0 %vm7821_vm4, %v8820_v41 }
 0x806   :  { %6815 = vmatprep.subr.bf16.mxu0 %v7820_v35 }
 0x809   :  { %6817 = vmatpush3.bf16.msra.mxu0 %v8832_v27 }
 0x80a   :  { %6818 = vmatprep.subr.bf16.mxu0 %v7820_v35 }
 0x80d   :  { %6820 = vmatpush3.bf16.msra.mxu0 %v8841_v11 }
 0x80e   :  { %6821 = vmatprep.subr.bf16.mxu0 %v7820_v35 }
 0x811   :  { %6823 = vmatpush3.bf16.msra.mxu0 %v8847_v55 }
 0x812   :  { %6824 = vmatprep.subr.bf16.mxu0 %v7820_v35 }
 0x815   :  { %6826 = vmatpush3.bf16.msra.mxu0 %v8850_v19 }
 0x816   :  { %6827 = vmatprep.subr.bf16.mxu0 %v7820_v35 }
 0x819   :  { %6829 = vmatpush3.bf16.msra.mxu0 %v8856_v31 }
 0x81a   :  { %6830 = vmatprep.subr.bf16.mxu0 %v7820_v35 }
 0x81d   :  { %6832 = vmatpush3.bf16.msra.mxu0 %v8862_v37  ;;  %v8940_v37 = vrot.slane %v8820_v41, 7 }
 0x81e   :  { %6833 = vmatprep.subr.bf16.mxu0 %v7820_v35  ;;  %v5212_v35 = vld [vmem:[#allocation2 + $0x40] sm:$0x7f] }
 0x81f   :  { %v5225_v23 = vrot.slane %v5212_v35, 7  ;;  %v5229_v26 = vsel %vm164_vm0, %v5227_v57, %v8940_v37  ;;  %v5231_v38 = vsel %vm164_vm0, %v8940_v37, %v5230_v58 }
 0x821   :  { %6835 = vmatpush3.bf16.msra.mxu0 %v8868_v16  ;;  %v5222_v16 = vrot.slane %v5210_v46, 7  ;;  %v5226_v36 = vsel %vm164_vm0, %v8940_v37, %v5225_v23 }
 0x823   :  { %v5224_v21 = vsel %vm164_vm0, %v5222_v16, %v8940_v37  ;;  %v5423_v16 = vld [vmem:[#allocation2 + $0x88] sm:$0xfe] }
 0x824   :  { %5234 = vrot.lane.b32.xlu1 %v5224_v21, %s7823_s8 }
 0x828   :  { %5238 = vrot.lane.b32.xlu1 %v5226_v36, %s7823_s8 }
 0x82c   :  { %5242 = vrot.lane.b32.xlu1 %v5229_v26, %s7823_s8 }
 0x830   :  { %5246 = vrot.lane.b32.xlu1 %v5231_v38, %s7823_s8 }
 0x834   :  { %5308 = vrot.lane.b32.xlu1 %v8820_v41, %s7823_s8 }
 0x838   :  { %5312 = vrot.lane.b32.xlu1 %v8820_v41, %s7823_s8 }
 0x83c   :  { %5316 = vrot.lane.b32.xlu1 %v8820_v41, %s7823_s8 }
 0x840   :  { %5320 = vrot.lane.b32.xlu1 %v8820_v41, %s7823_s8  ;;  %v5097_v41 = vld [vmem:[%s9189_s7] sm:$0x1]  ;;  %s7824_s7 = smov [#allocation12]  }
 0x841   :  { %s5545_s10 = sshll.u32 %s7824_s7, 4  ;;  %s5546_s10 = int_to_ptr.vmem [resolvable:$true] %s5545_s10 }
 0x842   :  { %s7779_s17 = scalar_lea.vmem %s5546_s10, 512  ;;  %p7784_p13 = scmp.lt.s32.totalorder %s5546_s10, %s5546_s10 }
 0x843   :  { %p7780_p12 = scmp.ne.s32.totalorder %s5546_s10, %s7779_s17  ;;  %p7785_p0 = scmp.lt.s32.totalorder %s7779_s17, %s7779_s17 }
 0x844   :  { %5462 = vrot.lane.b32.xlu1 %v5445_v3, %s7823_s8  ;;  %v5446_v3 = vrot.slane %v5420_v6, 1 }
 0x845   :  { %p7786_p1 = por %p7785_p0, %p7784_p13 }
 0x847   :  { %p7787_p2 = pnand %p7786_p1, %p7780_p12 }
 0x848   :  { %5466 = vrot.lane.b32.xlu1 %v5449_v60, %s7823_s8 }
 0x8d7   :  { %v6620_v18 = vpop.f32.mrb[72].mxu0 }
 0x8d8   :  { %v4910_v27 = vpop.f32.mrb[73].mxu0 }
 0x8d9   :  { %v6621_v11 = vpop.f32.mrb[74].mxu0 }
 0x8da   :  { %v4913_v55 = vpop.f32.mrb[75].mxu0 }
 0x8db   :  { %v4925_v28 = vadd.f32 %v4913_v55, %v4910_v27 }
 0x8dd   :  { %v4926_v34 = vadd.f32 %v6620_v18, %v4925_v28 }
 0x8df   :  { %v4927_v9 = vadd.f32 %v6621_v11, %v4926_v34 }
 0x8e1   :  { %v4928_v19 = vrot.slane %v4927_v9, 4 }
 0x8e3   :  { %v4929_v48 = vadd.f32 %v4928_v19, %v4927_v9 }
 0x8e5   :  { %v4930_v22 = vrot.slane %v4929_v48, 2 }
 0x8e7   :  { %v4931_v14 = vadd.f32 %v4930_v22, %v4929_v48 }
 0x8e9   :  { %v4932_v31 = vrot.slane %v4931_v14, 1 }
 0x8eb   :  { %v4933_v29 = vadd.f32 %v4932_v31, %v4931_v14 }
 0x8ed   :  { %6655 = vmatmul.mubr.f32.vlgmr.msra.gmra.mrb[72].mxu1 %v4933_v29 }
 0x9c0   :  { %v5000_v42 = vpop.f32.mrb[72].mxu1 }
 0x9c1   :  { %v5004_v49 = vmul.f32 0.001953125, %v5000_v42  ;;  %v6656_v54 = vpop.f32.mrb[73].mxu1  ;;  %v5453_v42 = vrot.slane %v5423_v16, 1 }
 0x9c2   :  { %v5345_v54 = vld [vmem:[#allocation2 + $0x50] sm:$0x1] }
 0x9c3   :  { %v5008_v12 = vrot.slane %v5004_v49, %v8194_v1 }
 0x9c5   :  { %v5009_v25 = vsub.f32 %v4910_v27, %v5008_v12  ;;  %v5010_v40 = vsub.f32 %v4913_v55, %v5008_v12  ;;  %v5011_v20 = vsub.f32 %v6620_v18, %v5008_v12  ;;  %v5012_v4 = vsub.f32 %v6621_v11, %v5008_v12 }
 0x9c6   :  { %v5455_v12 = vsel %vm237_vm1, %v5453_v42, %v8962_v59  ;;  %v5134_v42 = vld [vmem:[#allocation2 + $0x30] sm:$0x7f] }
 0x9c7   :  { %v5013_v50 = vmul.f32 %v5009_v25, %v5009_v25  ;;  %v5014_v24 = vmul.f32 %v5010_v40, %v5010_v40  ;;  %v5015_v10 = vmul.f32 %v5011_v20, %v5011_v20  ;;  %v5016_v47 = vmul.f32 %v5012_v4, %v5012_v4 }
 0x9c9   :  { %v5017_v43 = vadd.f32 %v5014_v24, %v5013_v50  ;;  %v5137_v24 = vld [vmem:[#allocation2 + $0x68] sm:$0x80] }
 0x9cb   :  { %v5018_v2 = vadd.f32 %v5017_v43, %v5015_v10  ;;  %v5427_v10 = vld [vmem:[#allocation2 + $0xb8] sm:$0x1] }
 0x9cd   :  { %v5019_v56 = vadd.f32 %v5018_v2, %v5016_v47 }
 0x9cf   :  { %v5020_v0 = vrot.slane %v5019_v56, 4 }
 0x9d1   :  { %v5021_v51 = vadd.f32 %v5020_v0, %v5019_v56  ;;  %v5167_v0 = vrot.slane %v5137_v24, 7 }
 0x9d3   :  { %v5022_v7 = vrot.slane %v5021_v51, 2 }
 0x9d5   :  { %v5023_v45 = vadd.f32 %v5022_v7, %v5021_v51  ;;  %v5458_v51 = vrot.slane %v5427_v10, 1 }
 0x9d7   :  { %v5024_v30 = vrot.slane %v5023_v45, 1 }
 0x9d9   :  { %v5025_v13 = vadd.f32 %v5024_v30, %v5023_v45  ;;  %v5459_v30 = vsel %vm237_vm1, %v8962_v59, %v5458_v51 }
 0x9db   :  { %6690 = vmatmul.mubr.f32.vlgmr.msra.gmra.mrb[76].mxu0 %v5025_v13 }
 0xaae   :  { %v5092_v39 = vpop.f32.mrb[76].mxu0 }
 0xaaf   :  { %v5096_v63 = vmul.f32 0.001953125, %v5092_v39  ;;  %v6691_v53 = vpop.f32.mrb[77].mxu0 }
 0xab1   :  { %v5098_v61 = vadd.f32 1e-05, %v5096_v63  ;;  %v5426_v63 = vld [vmem:[#allocation2 + $0xb0] sm:$0x1] }
 0xab3   :  { %7656 = vrsqrt.f32 %v5098_v61  ;;  %v5456_v61 = vrot.slane %v5426_v63, 1 }
 0xabd   :  { %v7657_v52 = vpop.eup %7656 }
 0xabe   :  { %v5100_v8 = vmul.f32 %v7657_v52, %v5097_v41  ;;  %v5235_v52 = vpop.permute.xlu1 %5234 }
 0xac0   :  { %v5105_v5 = vrot.slane %v5100_v8, %v8194_v1 }
 0xac2   :  { %v5107_v18 = vmul.f32 %v5105_v5, %v5009_v25  ;;  %v5108_v27 = vmul.f32 %v5105_v5, %v5010_v40  ;;  %v5109_v11 = vmul.f32 %v5105_v5, %v5011_v20  ;;  %v5110_v55 = vmul.f32 %v5105_v5, %v5012_v4  ;;  %v5131_v25 = vld [vmem:[#allocation2 + $0x8] sm:$0x80]  ;;  %v5349_v4 = vld [vmem:[#allocation2 + $0xb0] sm:$0x1]  ;;  %v5239_v8 = vpop.permute.xlu1 %5238 }
 0xac3   :  { %v5368_v20 = vrot.slane %v5345_v54, 1  ;;  %v5157_v50 = vrot.slane %v5131_v25, 7  ;;  %v5378_v2 = vrot.slane %v5349_v4, 1 }
 0xac4   :  { %v5118_v28 = vadd.f32 %v5841_v33, %v5107_v18  ;;  %v5119_v34 = vadd.f32 %v5841_v33, %v5108_v27  ;;  %v5120_v9 = vadd.f32 %v5841_v33, %v5109_v11  ;;  %v5121_v19 = vadd.f32 %v5841_v33, %v5110_v55 }
 0xac6   :  { %v8979_v48 = vmax.f32 %v5118_v28, 0.0  ;;  %v8981_v22 = vmax.f32 %v5119_v34, 0.0  ;;  %v8983_v14 = vmax.f32 %v5120_v9, 0.0  ;;  %v8985_v31 = vmax.f32 %v5121_v19, 0.0  ;;  %v5243_v5 = vpop.permute.xlu1 %5242 }
 0xac8   :  { %5126 = vst [vmem:[#allocation2 + $0x20] sm:$0xff] %v8979_v48  ;;  %5127 = vst [vmem:[#allocation2 + $0x38] sm:$0xff] %v8981_v22  ;;  %5284 = vrot.lane.b32.xlu1 %v8981_v22, %s7819_s4  ;;  %5282 = vrot.lane.b32.xlu0 %v8979_v48, %s7819_s4  ;;  %v5158_v46 = vrot.slane %v8979_v48, 7  ;;  %v5168_v36 = vrot.slane %v8983_v14, 7  ;;  %v5364_v40 = vrot.slane %v8981_v22, 1  ;;  %v5374_v43 = vrot.slane %v8985_v31, 1 }
 0xac9   :  { %5128 = vst [vmem:[#allocation2 + $0x80] sm:$0xff] %v8983_v14  ;;  %5129 = vst [vmem:[#allocation2 + $0x98] sm:$0xff] %v8985_v31 }
 0xaca   :  { %v9025_v47 = vsel %vm237_vm1, %v5364_v40, %v5368_v20  ;;  %v9030_v56 = vsel %vm164_vm0, %v5157_v50, %v5158_v46  ;;  %v9035_v7 = vsel %vm237_vm1, %v5374_v43, %v5378_v2  ;;  %v9040_v45 = vsel %vm164_vm0, %v5167_v0, %v5168_v36  ;;  %v5247_v33 = vpop.permute.xlu1 %5246  ;;  %v5136_v50 = vld [vmem:[#allocation2 + $0x60] sm:$0x80] }
 0xacb   :  { %v5447_v60 = vsel %vm237_vm1, %v5364_v40, %v5446_v3  ;;  %v5457_v41 = vsel %vm237_vm1, %v5374_v43, %v5456_v61 }
 0xacc   :  { %5288 = vrot.lane.b32.xlu1 %v8985_v31, %s7819_s4  ;;  %5286 = vrot.lane.b32.xlu0 %v8983_v14, %s7819_s4 }
 0xace   :  { %v9073_v18 = vpop.permute.xlu1 %5308 }
 0xacf   :  { %v5135_v1 = vld [vmem:[#allocation2 + $0x38] sm:$0x7f]  ;;  %v5343_v13 = vld [vmem:[#allocation2 + $0x20] sm:$0xfe] }
 0xad0   :  { %v5141_v29 = vld [vmem:[#allocation2 + $0x98] sm:$0x7f]  ;;  %5306 = vrot.lane.b32.xlu0 %v8979_v48, %s7823_s8  ;;  %v5162_v35 = vrot.slane %v5135_v1, 7  ;;  %v5363_v32 = vrot.slane %v5343_v13, 1  ;;  %v5347_v57 = vld [vmem:[#allocation2 + $0x80] sm:$0xfe] }
 0xad1   :  { %v5172_v21 = vrot.slane %v5141_v29, 7  ;;  %v5373_v17 = vrot.slane %v5347_v57, 1  ;;  %v5416_v58 = vld [vmem:[#allocation2 + $0x20] sm:$0xfe] }
 0xad2   :  { %v9003_v23 = vsel %vm164_vm0, %v5158_v46, %v5162_v35  ;;  %v9056_v26 = vsel %vm237_vm1, %v5363_v32, %v5364_v40  ;;  %v5440_v44 = vrot.slane %v5416_v58, 1  ;;  %v5422_v62 = vld [vmem:[#allocation2 + $0x80] sm:$0xfe]  ;;  %v9075_v27 = vpop.permute.xlu1 %5312 }
 0xad3   :  { %5192 = vrot.lane.b32.xlu1 %v9003_v23, %s7819_s4  ;;  %v9011_v49 = vsel %vm164_vm0, %v5168_v36, %v5172_v21  ;;  %v9061_v38 = vsel %vm237_vm1, %v5373_v17, %v5374_v43  ;;  %v5450_v39 = vrot.slane %v5422_v62, 1  ;;  %v5130_v36 = vld [vmem:[#allocation2] sm:$0x80] }
 0xad4   :  { %5310 = vrot.lane.b32.xlu0 %v8981_v22, %s7823_s8  ;;  %v5442_v15 = vsel %vm237_vm1, %v5440_v44, %v5364_v40  ;;  %v5154_v54 = vrot.slane %v5130_v36, 7  ;;  %v5160_v40 = vrot.slane %v5134_v42, 7 }
 0xad5   :  { %v5452_v53 = vsel %vm237_vm1, %v5450_v39, %v5374_v43  ;;  %v5140_v43 = vld [vmem:[#allocation2 + $0x90] sm:$0x7f]  ;;  %v7668_v39 = vld [vmem:[#allocation2 + $0x18] sm:$0xff] }
 0xad6   :  { %v9077_v11 = vpop.permute.xlu1 %5316  ;;  %v5156_v20 = vsel %vm164_vm0, %v5154_v54, %v8940_v37  ;;  %v5161_v24 = vsel %vm164_vm0, %v8940_v37, %v5160_v40  ;;  %v5170_v44 = vrot.slane %v5140_v43, 7 }
 0xad7   :  { %5196 = vrot.lane.b32.xlu1 %v9011_v49, %s7819_s4 }
 0xad8   :  { %5314 = vrot.lane.b32.xlu0 %v8983_v14, %s7823_s8 }
 0xada   :  { %v9081_v34 = vpop.permute.xlu1 %5320 }
 0xadb   :  { %5470 = vrot.lane.b32.xlu1 %v5455_v12, %s7823_s8 }
 0xadc   :  { %5318 = vrot.lane.b32.xlu0 %v8985_v31, %s7823_s8 }
 0xade   :  { %v9085_v19 = vpop.permute.xlu1 %5462 }
 0xadf   :  { %5398 = vrot.lane.b32.xlu1 %v9025_v47, %s7819_s4 }
 0xae0   :  { %5190 = vrot.lane.b32.xlu0 %v9030_v56, %s7819_s4 }
 0xae2   :  { %v9091_v46 = vpop.permute.xlu1 %5466 }
 0xae3   :  { %5402 = vrot.lane.b32.xlu1 %v9035_v7, %s7819_s4 }
 0xae4   :  { %5194 = vrot.lane.b32.xlu0 %v9040_v45, %s7819_s4 }
 0xae7   :  { %5474 = vrot.lane.b32.xlu1 %v5459_v30, %s7823_s8  ;;  %v5164_v30 = vrot.slane %v5136_v50, 7  ;;  %v5344_v50 = vld [vmem:[#allocation2 + $0x48] sm:$0x1] }
 0xae8   :  { %5232 = vrot.lane.b32.xlu0 %v9030_v56, %s7823_s8 }
 0xae9   :  { %v5166_v3 = vsel %vm164_vm0, %v5164_v30, %v8940_v37 }
 0xaec   :  { %5236 = vrot.lane.b32.xlu0 %v9003_v23, %s7823_s8 }
 0xaf0   :  { %5240 = vrot.lane.b32.xlu0 %v9040_v45, %s7823_s8 }
 0xaf4   :  { %5244 = vrot.lane.b32.xlu0 %v9011_v49, %s7823_s8 }
 0xaf8   :  { %5396 = vrot.lane.b32.xlu0 %v9056_v26, %s7819_s4 }
 0xafc   :  { %5400 = vrot.lane.b32.xlu0 %v9061_v38, %s7819_s4 }
 0xb00   :  { %5460 = vrot.lane.b32.xlu0 %v5442_v15, %s7823_s8 }
 0xb04   :  { %5464 = vrot.lane.b32.xlu0 %v5447_v60, %s7823_s8 }
 0xb08   :  { %5468 = vrot.lane.b32.xlu0 %v5452_v53, %s7823_s8  ;;  %v5171_v53 = vsel %vm164_vm0, %v8940_v37, %v5170_v44 }
 0xb0c   :  { %5472 = vrot.lane.b32.xlu0 %v5457_v41, %s7823_s8 }
 0xb3a   :  { %v5283_v55 = vpop.permute.xlu0 %5282  ;;  %v5285_v16 = vpop.permute.xlu1 %5284 }
 0xb3e   :  { %v9079_v28 = vpop.permute.xlu0 %5286  ;;  %v9095_v25 = vpop.permute.xlu1 %5288 }
 0xb42   :  { %v9083_v9 = vpop.permute.xlu0 %5306 }
 0xb45   :  { %v5193_v10 = vpop.permute.xlu1 %5192 }
 0xb46   :  { %v9087_v1 = vpop.permute.xlu0 %5310  ;;  %v5204_v32 = vadd.f32 %v5193_v10, %v5161_v24  ;;  %v5205_v58 = vadd.f32 %v5193_v10, %v9003_v23 }
 0xb49   :  { %v5197_v61 = vpop.permute.xlu1 %5196 }
 0xb4a   :  { %v9089_v29 = vpop.permute.xlu0 %5314  ;;  %v5208_v40 = vadd.f32 %v5197_v61, %v5171_v53  ;;  %v5209_v37 = vadd.f32 %v5197_v61, %v9011_v49 }
 0xb4e   :  { %v9093_v35 = vpop.permute.xlu0 %5318 }
 0xb52   :  { %v5191_v21 = vpop.permute.xlu0 %5190 }
 0xb53   :  { %v5202_v2 = vadd.f32 %v5191_v21, %v5156_v20  ;;  %v5203_v51 = vadd.f32 %v5191_v21, %v9030_v56  ;;  %v5342_v21 = vld [vmem:[#allocation2 + $0x18] sm:$0xfe] }
 0xb54   :  { %v5360_v10 = vrot.slane %v5342_v21, 1 }
 0xb56   :  { %v5195_v12 = vpop.permute.xlu0 %5194  ;;  %v5362_v49 = vsel %vm237_vm1, %v5360_v10, %v8962_v59 }
 0xb57   :  { %v5207_v41 = vadd.f32 %v5195_v12, %v9040_v45 }
 0xb5a   :  { %v5233_v4 = vpop.permute.xlu0 %5232 }
 0xb5b   :  { %v5248_v0 = vsel %vm1907_vm8, %v5233_v4, %v5235_v52  ;;  %v5260_v57 = vadd.f32 %v5233_v4, %v5202_v2  ;;  %v5206_v52 = vadd.f32 %v5195_v12, %v5166_v3 }
 0xb5c   :  { %v5261_v6 = vadd.f32 %v5248_v0, %v5203_v51  ;;  %v5322_v51 = vsel %vm1907_vm8, %v9083_v9, %v9073_v18 }
 0xb5d   :  { %v5272_v63 = vadd.f32 %v7668_v39, %v5260_v57 }
 0xb5e   :  { %v5237_v13 = vpop.permute.xlu0 %5236  ;;  %v5273_v23 = vadd.f32 %v5261_v6, %v8979_v48 }
 0xb5f   :  { %v5249_v17 = vsel %vm1907_vm8, %v5237_v13, %v5239_v8  ;;  %v5262_v15 = vadd.f32 %v5237_v13, %v5204_v32  ;;  %v5294_v20 = vadd.f32 %v5283_v55, %v5272_v63  ;;  %v5471_v13 = vpop.permute.xlu1 %5470 }
 0xb60   :  { %v5263_v62 = vadd.f32 %v5249_v17, %v5205_v58  ;;  %v5295_v24 = vadd.f32 %v5283_v55, %v5273_v23  ;;  %v5323_v55 = vsel %vm1907_vm8, %v9087_v1, %v9075_v27  ;;  %v5348_v17 = vld [vmem:[#allocation2 + $0xa8] sm:$0x1] }
 0xb61   :  { %v5274_v8 = vadd.f32 %v7668_v39, %v5262_v15 }
 0xb62   :  { %v5241_v60 = vpop.permute.xlu0 %5240  ;;  %v5275_v36 = vadd.f32 %v5263_v62, %v8981_v22  ;;  %v5366_v22 = vrot.slane %v5344_v50, 1  ;;  %v5335_v32 = vadd.f32 %v5322_v51, %v5295_v24 }
 0xb63   :  { %v5250_v56 = vsel %vm1907_vm8, %v5241_v60, %v5243_v5  ;;  %v5264_v4 = vadd.f32 %v5241_v60, %v5206_v52  ;;  %v5296_v45 = vadd.f32 %v5285_v16, %v5274_v8  ;;  %v5376_v60 = vrot.slane %v5348_v17, 1 }
 0xb64   :  { %v5265_v42 = vadd.f32 %v5250_v56, %v5207_v41  ;;  %v5297_v48 = vadd.f32 %v5285_v16, %v5275_v36  ;;  %v5346_v16 = vld [vmem:[#allocation2 + $0x78] sm:$0xfe]  ;;  %v5367_v6 = vsel %vm237_vm1, %v8962_v59, %v5366_v22  ;;  %v5389_v62 = vadd.f32 %v9056_v26, %v5335_v32  ;;  %v5399_v56 = vpop.permute.xlu1 %5398 }
 0xb65   :  { %v5276_v30 = vadd.f32 %v7668_v39, %v5264_v4  ;;  %v5336_v57 = vadd.f32 %v9087_v1, %v5296_v45  ;;  %v5370_v27 = vrot.slane %v5346_v16, 1  ;;  %v5324_v1 = vsel %vm1907_vm8, %v9089_v29, %v9077_v11 }
 0xb66   :  { %v5245_v54 = vpop.permute.xlu0 %5244  ;;  %v5277_v12 = vadd.f32 %v5265_v42, %v8983_v14  ;;  %v5377_v36 = vsel %vm237_vm1, %v8962_v59, %v5376_v60 }
 0xb67   :  { %v5251_v5 = vsel %vm1907_vm8, %v5245_v54, %v5247_v33  ;;  %v5266_v43 = vadd.f32 %v5245_v54, %v5208_v40  ;;  %v5334_v33 = vadd.f32 %v9083_v9, %v5294_v20  ;;  %v5337_v9 = vadd.f32 %v5323_v55, %v5297_v48 }
 0xb68   :  { %v5267_v2 = vadd.f32 %v5251_v5, %v5209_v37  ;;  %v5299_v58 = vadd.f32 %v9079_v28, %v5277_v12  ;;  %v5298_v15 = vadd.f32 %v9079_v28, %v5276_v30  ;;  %v5372_v11 = vsel %vm237_vm1, %v5370_v27, %v8962_v59  ;;  %v5403_v59 = vpop.permute.xlu1 %5402 }
 0xb69   :  { %v5278_v14 = vadd.f32 %v7668_v39, %v5266_v43  ;;  %v5388_v3 = vadd.f32 %v5362_v49, %v5334_v33  ;;  %v5391_v28 = vadd.f32 %v9025_v47, %v5337_v9 }
 0xb6a   :  { %v5397_v0 = vpop.permute.xlu0 %5396  ;;  %v5279_v18 = vadd.f32 %v5267_v2, %v8985_v31  ;;  %v5390_v31 = vadd.f32 %v5367_v6, %v5336_v57  ;;  %v5339_v41 = vadd.f32 %v5324_v1, %v5299_v58  ;;  %v5338_v26 = vadd.f32 %v9089_v29, %v5298_v15 }
 0xb6b   :  { %v5300_v39 = vadd.f32 %v9095_v25, %v5278_v14  ;;  %v5408_v63 = vadd.f32 %v5397_v0, %v5388_v3  ;;  %v5409_v61 = vadd.f32 %v5397_v0, %v5389_v62 }
 0xb6c   :  { %v5301_v53 = vadd.f32 %v9095_v25, %v5279_v18  ;;  %v5325_v25 = vsel %vm1907_vm8, %v9093_v35, %v9081_v34  ;;  %v5410_v54 = vadd.f32 %v5399_v56, %v5390_v31  ;;  %v5393_v29 = vadd.f32 %v9061_v38, %v5339_v41  ;;  %v5475_v0 = vpop.permute.xlu1 %5474 }
 0xb6d   :  { %v5340_v47 = vadd.f32 %v9093_v35, %v5300_v39  ;;  %v5392_v5 = vadd.f32 %v5372_v11, %v5338_v26 }
 0xb6e   :  { %v5401_v44 = vpop.permute.xlu0 %5400  ;;  %v5341_v4 = vadd.f32 %v5325_v25, %v5301_v53 }
 0xb6f   :  { %v5412_v34 = vadd.f32 %v5401_v44, %v5392_v5  ;;  %v5394_v35 = vadd.f32 %v5377_v36, %v5340_v47  ;;  %v5413_v45 = vadd.f32 %v5401_v44, %v5393_v29 }
 0xb70   :  { %v5395_v48 = vadd.f32 %v9035_v7, %v5341_v4 }
 0xb71   :  { %v5414_v51 = vadd.f32 %v5403_v59, %v5394_v35 }
 0xb72   :  { %v5461_v23 = vpop.permute.xlu0 %5460  ;;  %v5415_v33 = vadd.f32 %v5403_v59, %v5395_v48 }
 0xb73   :  { %v5476_v52 = vsel %vm1907_vm8, %v5461_v23, %v9085_v19  ;;  %v5488_v8 = vadd.f32 %v5461_v23, %v5408_v63  ;;  %v5411_v19 = vadd.f32 %v5399_v56, %v5391_v28 }
 0xb74   :  { %v5489_v21 = vadd.f32 %v5476_v52, %v5409_v61 }
 0xb75   :  { %v5496_v42 = vmul.f32 0.11111111, %v5488_v8 }
 0xb76   :  { %v5497_v40 = vmul.f32 0.11111111, %v5489_v21  ;;  %v5465_v20 = vpop.permute.xlu0 %5464 }
 0xb77   :  { %v5477_v50 = vsel %vm1907_vm8, %v5465_v20, %v9091_v46  ;;  %v5490_v37 = vadd.f32 %v5465_v20, %v5410_v54  ;;  %5512 = vrot.lane.b32.xlu0 %v5496_v42, %s7811_s28 }
 0xb78   :  { %v5491_v24 = vadd.f32 %v5477_v50, %v5411_v19  ;;  %5514 = vrot.lane.b32.xlu1 %v5497_v40, %s7811_s28 }
 0xb79   :  { %v5498_v10 = vmul.f32 0.11111111, %v5490_v37 }
 0xb7a   :  { %v5499_v38 = vmul.f32 0.11111111, %v5491_v24  ;;  %v5469_v43 = vpop.permute.xlu0 %5468 }
 0xb7b   :  { %v5478_v12 = vsel %vm1907_vm8, %v5469_v43, %v5471_v13  ;;  %v5492_v2 = vadd.f32 %v5469_v43, %v5412_v34  ;;  %5516 = vrot.lane.b32.xlu0 %v5498_v10, %s7811_s28 }
 0xb7c   :  { %v5493_v46 = vadd.f32 %v5478_v12, %v5413_v45  ;;  %5518 = vrot.lane.b32.xlu1 %v5499_v38, %s7811_s28 }
 0xb7d   :  { %v5500_v22 = vmul.f32 0.11111111, %v5492_v2 }
 0xb7e   :  { %v5501_v30 = vmul.f32 0.11111111, %v5493_v46  ;;  %v5473_v32 = vpop.permute.xlu0 %5472 }
 0xb7f   :  { %v5479_v49 = vsel %vm1907_vm8, %v5473_v32, %v5475_v0  ;;  %v5494_v55 = vadd.f32 %v5473_v32, %v5414_v51  ;;  %5520 = vrot.lane.b32.xlu0 %v5500_v22, %s7811_s28 }
 0xb80   :  { %v5495_v7 = vadd.f32 %v5479_v49, %v5415_v33  ;;  %5522 = vrot.lane.b32.xlu1 %v5501_v30, %s7811_s28 }
 0xb81   :  { %v5502_v13 = vmul.f32 0.11111111, %v5494_v55 }
 0xb82   :  { %v5503_v14 = vmul.f32 0.11111111, %v5495_v7 }
 0xb83   :  { %5524 = vrot.lane.b32.xlu0 %v5502_v13, %s7811_s28 }
 0xb84   :  { %5526 = vrot.lane.b32.xlu1 %v5503_v14, %s7811_s28 }
 0xbe9   :  { %v5513_v16 = vpop.permute.xlu0 %5512 }
 0xbea   :  { %v5515_v57 = vpop.permute.xlu1 %5514 }
 0xbeb   :  { %v5528_v17 = vsel %vm322_vm2, %v5513_v16, %v5515_v57 }
 0xbec   :  { %5536 = vst [vmem:[#allocation12] sm:$0xff] %v5528_v17 }
 0xbed   :  { %v5517_v58 = vpop.permute.xlu0 %5516 }
 0xbee   :  { %v5519_v18 = vpop.permute.xlu1 %5518 }
 0xbef   :  { %v5529_v44 = vsel %vm322_vm2, %v5517_v58, %v5519_v18 }
 0xbf0   :  { %5537 = vst [vmem:[#allocation12 + $0x8] sm:$0xff] %v5529_v44 }
 0xbf1   :  { %v5521_v9 = vpop.permute.xlu0 %5520 }
 0xbf2   :  { %v5523_v6 = vpop.permute.xlu1 %5522 }
 0xbf3   :  { %v5530_v15 = vsel %vm322_vm2, %v5521_v9, %v5523_v6 }
 0xbf4   :  { %5538 = vst [vmem:[#allocation12 + $0x10] sm:$0xff] %v5530_v15 }
 0xbf5   :  { %v5525_v3 = vpop.permute.xlu0 %5524 }
 0xbf6   :  { %v5527_v62 = vpop.permute.xlu1 %5526 }
 0xbf7   :  { %v5531_v27 = vsel %vm322_vm2, %v5525_v3, %v5527_v62 }
 0xbf8   :  { %5539 = vst [vmem:[#allocation12 + $0x18] sm:$0xff] %v5531_v27 }
 0xbf9   :  { %7790 = shalt.err (!%p7787_p2)
}
 0xbfa   :  { %s7791_s3 = scalar_lea.hbm %s9193_s11, 512 }
 0xbfb   :  { %p7792_p3 = scmp.ne.s32.totalorder %s9193_s11, %s7791_s3  ;;  %p7795_p4 = scmp.lt.u32.totalorder %s7791_s3, %s9193_s11 }
 0xbfd   :  { %p7797_p5 = pnand %p7795_p4, %p7792_p3 }
 0xbff   :  { %7800 = shalt.err (!%p7797_p5)
}
 0xc00   :  { %5551 = dma.vmem_to_hbm [thread:$0]  %s5546_s10, 512, %s9193_s11, [#allocation5], %s7810_s27, %s7810_s27, %s7811_s28  }
 0xc01   :  { %7807 = dma.done.wait [#allocation5], 512  }
 0xc02   :  { %7808 = vsyncadd [#allocation5], 4294966784 }
 0xc03   :  { %5555 = vsyncpa [#allocation4], 1 }
 0xc04   :  { %5556 = vsyncpa [#allocation7], 1 }
 0xc05   :  { %5557 = vsyncpa [#allocation10], 1 }
 0xc06   :  { %5558 = vsyncpa [#allocation5], 1 }

</bundles_post_ra>
